<compile_context>
chip_gen: v7x
topology: tpu7x:2x2x1
jax: 0.10.0
libtpu: 0.0.40
codegen_flags: <defaults>
</compile_context>

<pallas_src>
import jax
import jax.numpy as jnp
from jax.experimental import pallas as pl
from jax.experimental.pallas import tpu as pltpu


def squeeze_attention_kernel(x_ref, wf_ref, b_ref, o_ref):
    # x_ref:  (TB, C, H, W)   TB batch elements per grid step
    # wf_ref: (R, C*H)        conv weight flattened over (in_channels, kernel_h); R == H
    # b_ref:  (R, 1)          conv bias
    # o_ref:  (TB, C, H, W)
    x = x_ref[...].astype(jnp.float32)            # single upcast (f32 softmax path, v5e-safe)
    TB, C, H, W = x.shape
    K = C * H
    R = wf_ref.shape[0]

    # (C, H) -> C*H merge is tile-aligned for (H, W) = (8, 128) f32 tiles -> free view.
    xf = x.reshape(TB, K, W)                      # (TB, K, W)

    # Conv2d((H,1)) == matmul over the flattened (c, h) axis, per width column.
    # Batched contraction over all TB elements in one dot_general (natural layout,
    # no relayout pass); weights broadcast from the resident (R, K) VMEM tile.
    wf_b = jnp.broadcast_to(wf_ref[...], (TB, R, K))
    logits = jnp.einsum('nrk,nkw->nrw', wf_b, xf,
                        preferred_element_type=jnp.float32)      # (TB, R, W)
    logits = logits + b_ref[...][None, :, :]                     # (1, R, 1) broadcast

    # Softmax over the conv output channel (PyTorch Softmax(dim=1)); here axis=1 (R).
    m = jnp.max(logits, axis=1, keepdims=True)
    e = jnp.exp(logits - m)
    denom = jnp.sum(e, axis=1, keepdims=True)
    soft = e * pl.reciprocal(denom, approx=True)                 # (TB, R, W), R == H

    # m.transpose(1, 2): the softmax channel indexes H; broadcast over C.
    y = x * soft[:, None, :, :]                                  # (TB, C, H, W)
    o_ref[...] = y.astype(o_ref.dtype)


def squeeze_attention(x, weight, bias, *, block_n=64):
    """x: (N, C, H, W); weight: (R, C, R, 1) with R == H; bias: (R,)."""
    N, C, H, W = x.shape
    R = weight.shape[0]
    assert R == H, "in_rows must equal the input height"

    # Parameter glue (plain JAX): flatten conv weight to (R, C*H), bias to (R, 1).
    wf = weight.reshape(R, C * H).astype(jnp.float32)
    b2 = bias.reshape(R, 1).astype(jnp.float32)

    tb = min(block_n, N)                 # TB in the 32-128 range; ~4 MiB double-buffered
    grid_n = pl.cdiv(N, tb)

    out = pl.pallas_call(
        squeeze_attention_kernel,
        out_shape=jax.ShapeDtypeStruct((N, C, H, W), x.dtype),
        grid_spec=pltpu.PrefetchScalarGridSpec(
            num_scalar_prefetch=0,
            grid=(grid_n,),
            in_specs=[
                pl.BlockSpec((tb, C, H, W), lambda n: (n, 0, 0, 0)),
                pl.BlockSpec((R, C * H), lambda n: (0, 0)),   # resident across steps
                pl.BlockSpec((R, 1), lambda n: (0, 0)),       # resident across steps
            ],
            out_specs=pl.BlockSpec((tb, C, H, W), lambda n: (n, 0, 0, 0)),
        ),
        compiler_params=pltpu.CompilerParams(
            dimension_semantics=("parallel",)),   # shards batched steps across v7x's 2 TCs
    )(x, wf, b2)

    # Final reshape matches PyTorch: (N, C*H, 1, W) -- metadata-only on contiguous NCHW.
    return out.reshape(N, C * H, 1, W)


def squeeze_attention_ref(x, weight, bias):
    """Pure-JAX reference mirroring the PyTorch forward."""
    N, C, H, W = x.shape
    R = weight.shape[0]
    wf = weight.reshape(R, C * H)                            # (c, kh, kw=1) flattened
    xf = x.reshape(N, C * H, W)
    logits = jnp.einsum('rk,nkw->nrw', wf, xf) + bias[None, :, None]  # (N, R, W)
    soft = jax.nn.softmax(logits, axis=1)                    # softmax over dim=1
    y = x * soft[:, None, :, :]                              # broadcast over channels
    return y.reshape(N, C * H, 1, W)


if __name__ == "__main__":
    # Shapes consistent with the module: in_channels=4, in_rows=8 (== H), W=128.
    # N=128 with TB=64 gives 2 batched grid steps (both v7x cores busy) while the
    # whole problem is still only 2 MiB.
    N, C, H, W = 128, 4, 8, 128
    in_channels, in_rows = C, H

    key = jax.random.PRNGKey(0)
    k_x, k_w, k_b = jax.random.split(key, 3)

    x = jax.random.normal(k_x, (N, C, H, W), dtype=jnp.float32)

    # Deterministic Conv2d-style init: weight (out=in_rows, in=in_channels, kh=in_rows, kw=1)
    fan_in = in_channels * in_rows * 1
    bound = 1.0 / (fan_in ** 0.5)
    weight = jax.random.uniform(k_w, (in_rows, in_channels, in_rows, 1),
                                minval=-bound, maxval=bound, dtype=jnp.float32)
    bias = jax.random.uniform(k_b, (in_rows,),
                              minval=-bound, maxval=bound, dtype=jnp.float32)

    out = squeeze_attention(x, weight, bias, block_n=64)
    out = jax.block_until_ready(out)

    ref = squeeze_attention_ref(x, weight, bias)
    assert out.shape == (N, C * H, 1, W), out.shape
    # Tolerance loosened vs. the previous exact-divide version because of the
    # approximate EUP reciprocal in the softmax denominator (per review).
    assert jnp.allclose(out, ref, atol=2e-2, rtol=2e-2), "mismatch vs reference"

    print("KERNEL_OK")
</pallas_src>

<mosaic_0001>
module attributes {stable_mosaic.version = 11 : i64} {
  func.func @squeeze_attention_kernel(%arg0: i32, %arg1: memref<64x4x8x128xf32, #tpu.memory_space<vmem>>, %arg2: memref<8x32xf32, #tpu.memory_space<vmem>>, %arg3: memref<8x1xf32, #tpu.memory_space<vmem>>, %arg4: memref<64x4x8x128xf32, #tpu.memory_space<vmem>>) attributes {dimension_semantics = [#tpu.dimension_semantics<parallel>], iteration_bounds = array<i64: 2>, scalar_prefetch = 0 : i64, scratch_operands = 0 : i64, tpu.core_type = #tpu.core_type<tc>, window_params = [{transform_indices = @transform_0, window_bounds = array<i64: 64, 4, 8, 128>}, {pipeline_mode = #tpu.pipeline_mode<synchronous>, transform_indices = @transform_1, window_bounds = array<i64: 8, 32>}, {pipeline_mode = #tpu.pipeline_mode<synchronous>, transform_indices = @transform_2, window_bounds = array<i64: 8, 1>}, {transform_indices = @transform_3, window_bounds = array<i64: 64, 4, 8, 128>}]} {
    %c0 = arith.constant 0 : index
    %c0_0 = arith.constant 0 : index
    %c0_1 = arith.constant 0 : index
    %c0_2 = arith.constant 0 : index
    %0 = vector.load %arg1[%c0, %c0_0, %c0_1, %c0_2] : memref<64x4x8x128xf32, #tpu.memory_space<vmem>>, vector<64x4x8x128xf32>
    %1 = vector.shape_cast %0 : vector<64x4x8x128xf32> to vector<64x32x128xf32>
    %c0_3 = arith.constant 0 : index
    %c0_4 = arith.constant 0 : index
    %2 = vector.load %arg2[%c0_3, %c0_4] : memref<8x32xf32, #tpu.memory_space<vmem>>, vector<8x32xf32>
    %3 = vector.shape_cast %2 : vector<8x32xf32> to vector<1x8x32xf32>
    %4 = vector.broadcast %3 : vector<1x8x32xf32> to vector<64x8x32xf32>
    "tpu.trace_start"() <{level = 10 : i32, message = "nrk,nkw->nrw"}> : () -> ()
    %cst = arith.constant dense<0.000000e+00> : vector<64x8x128xf32>
    %5 = tpu.matmul %4, %1, %cst {dimension_numbers = #tpu.dot_dimension_numbers<[2], [1], [1], [2], [0, 0, 0, 1, 1, 2], [0], [0]>} : vector<64x8x32xf32>, vector<64x32x128xf32>, vector<64x8x128xf32> -> vector<64x8x128xf32>
    "tpu.trace_stop"() : () -> ()
    %c0_5 = arith.constant 0 : index
    %c0_6 = arith.constant 0 : index
    %6 = vector.load %arg3[%c0_5, %c0_6] : memref<8x1xf32, #tpu.memory_space<vmem>>, vector<8x1xf32>
    %7 = vector.shape_cast %6 : vector<8x1xf32> to vector<1x8x1xf32>
    %8 = vector.broadcast %7 : vector<1x8x1xf32> to vector<64x8x128xf32>
    %9 = arith.addf %5, %8 : vector<64x8x128xf32>
    %cst_7 = arith.constant dense<0xFF800000> : vector<64x128xf32>
    %10 = vector.multi_reduction <maximumf>, %9, %cst_7 [1] : vector<64x8x128xf32> to vector<64x128xf32>
    %11 = vector.shape_cast %10 : vector<64x128xf32> to vector<64x1x128xf32>
    %12 = vector.broadcast %11 : vector<64x1x128xf32> to vector<64x8x128xf32>
    %13 = arith.subf %9, %12 : vector<64x8x128xf32>
    %14 = math.exp %13 : vector<64x8x128xf32>
    %cst_8 = arith.constant dense<0.000000e+00> : vector<64x128xf32>
    %15 = vector.multi_reduction <add>, %14, %cst_8 [1] : vector<64x8x128xf32> to vector<64x128xf32>
    %16 = vector.shape_cast %15 : vector<64x128xf32> to vector<64x1x128xf32>
    %17 = tpu.reciprocal %16 {approx = true} : vector<64x1x128xf32> -> vector<64x1x128xf32>
    %18 = vector.broadcast %17 : vector<64x1x128xf32> to vector<64x8x128xf32>
    %19 = arith.mulf %14, %18 : vector<64x8x128xf32>
    %20 = vector.shape_cast %19 : vector<64x8x128xf32> to vector<64x1x8x128xf32>
    %21 = vector.broadcast %20 : vector<64x1x8x128xf32> to vector<64x4x8x128xf32>
    %22 = arith.mulf %0, %21 : vector<64x4x8x128xf32>
    %c0_9 = arith.constant 0 : index
    %c0_10 = arith.constant 0 : index
    %c0_11 = arith.constant 0 : index
    %c0_12 = arith.constant 0 : index
    %23 = vector.load %arg4[%c0_9, %c0_10, %c0_11, %c0_12] : memref<64x4x8x128xf32, #tpu.memory_space<vmem>>, vector<64x4x8x128xf32>
    tpu.vector_store %arg4[%c0_9, %c0_10, %c0_11, %c0_12], %22 {strides = array<i32>} : memref<64x4x8x128xf32, #tpu.memory_space<vmem>>, vector<64x4x8x128xf32>,
    return
  }
  func.func @transform_0(%arg0: i32) -> (i32, i32, i32, i32) {
    %c0_i32 = arith.constant 0 : i32
    %c0_i32_0 = arith.constant 0 : i32
    %c0_i32_1 = arith.constant 0 : i32
    %c0_i32_2 = arith.constant 0 : i32
    return %arg0, %c0_i32, %c0_i32_0, %c0_i32_1 : i32, i32, i32, i32
  }
  func.func @transform_1(%arg0: i32) -> (i32, i32) {
    %c0_i32 = arith.constant 0 : i32
    %c0_i32_0 = arith.constant 0 : i32
    %c0_i32_1 = arith.constant 0 : i32
    return %c0_i32, %c0_i32_0 : i32, i32
  }
  func.func @transform_2(%arg0: i32) -> (i32, i32) {
    %c0_i32 = arith.constant 0 : i32
    %c0_i32_0 = arith.constant 0 : i32
    %c0_i32_1 = arith.constant 0 : i32
    return %c0_i32, %c0_i32_0 : i32, i32
  }
  func.func @transform_3(%arg0: i32) -> (i32, i32, i32, i32) {
    %c0_i32 = arith.constant 0 : i32
    %c0_i32_0 = arith.constant 0 : i32
    %c0_i32_1 = arith.constant 0 : i32
    %c0_i32_2 = arith.constant 0 : i32
    return %arg0, %c0_i32, %c0_i32_0, %c0_i32_1 : i32, i32, i32, i32
  }
}

</mosaic_0001>

<bundles_post_ra>
// kernel: tpu_custom_call.1
= control target key start
LH: loop header
LB: loop body
LE: loop exit
PB: predicated region body
PF: predicated region fallthrough
CT: control target
= control target key end

     0   :  { %8 = vsyncpa [#allocation3], 0  ;;  %s11137_s0 = inlined_call_operand.hbm [shape: f32[128,4,8,128], index: 0, kind: input, shape index: {}]   ;;  %s11138_s1 = inlined_call_operand.hbm [shape: f32[8,32], index: 1, kind: input, shape index: {}]   ;;  %s11139_s2 = inlined_call_operand.vmem [shape: f32[8,1], index: 2, kind: input, shape index: {}]   ;;  %s11140_s3 = inlined_call_operand.hbm [shape: f32[128,4,8,128], index: 3, kind: output, shape index: {}]  }
   0x1   :  { %10 = vsyncpa [#allocation3 + $0x1], 0 }
   0x2   :  { %11 = vsyncpa [#allocation6], 0 }
   0x3   :  { %12 = vsyncpa [#allocation4], 0 }
   0x4   :  { %14 = vsyncpa [#allocation4 + $0x1], 0  ;;  %s8884_s12 = smov 0   ;;  %s8886_s13 = smov 0  }
   0x5   :  { %s8888_s14 = smov 0   ;;  %s8890_s15 = smov 0  }
   0x6 LB: > { %s8905_s16 = sadd.s32 4294967295, %s8851_s15   ;;  %s6650_s17 = sadd.s32 4294967294, %s8851_s15   ;;  %s8851_s15 = sphi %s8890_s15, %s11165_s15   ;;  %s8847_s14 = sphi %s8888_s14, %s11164_s14   ;;  %s8843_s13 = sphi %s8886_s13, %s11163_s13   ;;  %s8839_s12 = sphi %s8884_s12, %s11162_s12  }
   0x7   : > { %s8909_s18 = sadd.s32 1, %s8851_s15   ;;  %s27_s19 = sadd.s32 1, %s8847_s14 }
   0x8   : > { %s24_s20 = ssub.s32 %s8851_s15, %s8909_s18  ;;  %p34_p0 = scmp.ne.s32.totalorder %s8847_s14, %s8843_s13 }
   0x9   : > { %p25_p1 = scmp.eq.s32.totalorder %s24_s20, 0  ;;  %p35_p2 = scmp.eq.s32.totalorder %s8851_s15, 0 }
   0xa   : > { %p40_p3 = scmp.ne.s32.totalorder %s8843_s13, %s8839_s12  ;;  %p11141_p4 = scmp.eq.s32.totalorder %s8905_s16, 0 }
   0xb   : > { %s8921_s21 = scalar_select %p25_p1, %s8847_s14, %s27_s19  }
   0xc   : > { %p8923_p5 = por %p35_p2, %p34_p0  ;;  %p8929_p6 = por %p11141_p4, %p40_p3 }
   0xd   : > { %p106_p7 = scmp.eq.s32.totalorder %s8905_s16, 1  ;;  %p112_p8 = scmp.eq.s32.totalorder %s6650_s17, 1 }
   0xe   : > { %s11147_s23 = scalar_select %p8929_p6, 1, 0 }
   0xf   : > { %p6651_p9 = scmp.ge.s32.totalorder %s8851_s15, 1  ;;  %p119_p10 = scmp.lt.s32.totalorder %s8851_s15, 3 }
  0x10   : > { %p8936_p11 = por %p106_p7, %p34_p0  ;;  %p8940_p12 = por %p112_p8, %p40_p3 }
  0x11   : > { %p8944_p13 = pnand %p6651_p9, %p119_p10  ;;  %s8853_s27 = smov [#allocation5]  }
  0x12   : > { %s11148_s24 = scalar_select %p8936_p11, 1, 0 }
  0x13   : > { %s11149_s25 = scalar_select %p8940_p12, 1, 0 }
  0x14   : > { %s11150_s26 = scalar_select %p8944_p13, 1, 0 }
  0x15   : > { %p8152_p2 = pneg %p8944_p13  ;;  %s132_s28 = sshll.u32 %s8853_s27, 4  ;;  %s133_s28 = int_to_ptr.vmem [resolvable:$true] %s132_s28 }
  0x16   : > { %p8165_p4 = scmp.lt.s32.totalorder %s8851_s15, 2  ;;  %p11151_p0 = scmp.eq.s32.totalorder %s8905_s16, 0 }
  0x17   : > { %s146_s30 = sand.u32 1, %s8847_s14   ;;  %s8723_s8 = scalar_lea.hbm %s11138_s1, 128 }
  0x18   : > { %p8954_p7 = pnand %p8152_p2, %p11151_p0  ;;  %p8961_p3 = pnand %p8165_p4, %p8923_p5 }
  0x19   : > { %s6654_s5 = sshll.u32 %s146_s30, 11  ;;  %p8724_p8 = scmp.ne.s32.totalorder %s11138_s1, %s8723_s8 }
  0x1a   : > { %s11153_s4 = scalar_select %p8961_p3, 1, 0 }
  0x1b   : > { %p8725_p9 = pneg %p8954_p7  ;;  %p8730_p4 = scmp.lt.u32.totalorder %s8723_s8, %s11138_s1 }
  0x1d   : > { %p8726_p10 = pnand %p8725_p9, %p8724_p8 }
  0x1f   : > { %p8727_p2 = pneg %p8726_p10 }
  0x21   : > { %p8732_p5 = pnand %p8730_p4, %p8727_p2 }
  0x23   : > { %8735 = shalt.err (!%p8732_p5)
}
  0x24   : > { %s8736_s19 = scalar_lea.vmem %s133_s28, 128  ;;  %p8744_p11 = scmp.lt.s32.totalorder %s133_s28, %s133_s28 }
  0x25   : > { %p8737_p0 = scmp.ne.s32.totalorder %s133_s28, %s8736_s19  ;;  %p8745_p6 = scmp.lt.s32.totalorder %s8736_s19, %s8736_s19 }
  0x27   : > { %p8739_p1 = pnand %p8737_p0, %p8725_p9  ;;  %p8746_p13 = por %p8745_p6, %p8744_p11 }
  0x29   : > { %p8740_p12 = pneg %p8739_p1 }
  0x2b   : > { %p8747_p3 = pnand %p8746_p13, %p8740_p12 }
  0x2d   : > { %8750 = shalt.err (!%p8747_p3)
}
  0x2e   : > { %8155 = dma.hbm_to_vmem [thread:$0]  (!%p8954_p7), %s11138_s1, 128, %s133_s28, [#allocation6]  }
  0x2f   : > { %s6733_s27 = sshll.u32 %s8851_s15, 15  ;;  %s150_s6 = scalar_lea.vmem [#allocation2], %s6654_s5 }
  0x30   : > { %s158_s7 = sshll.u32 %s150_s6, 4  ;;  %s8985_s10 = scalar_lea.hbm %s11137_s0, %s6733_s27  ;;  %s8987_s7 = int_to_ptr.vmem [resolvable:$true] %s158_s7 }
  0x31   : > { %s8989_s29 = scalar_lea.sflag [#allocation3], %s146_s30  ;;  %s8751_s11 = scalar_lea.hbm %s8985_s10, 32768 }
  0x32   : > { %p8752_p6 = scmp.ne.s32.totalorder %s8985_s10, %s8751_s11  ;;  %p11154_p11 = scmp.ne.s32.totalorder %s11153_s4, 0 }
  0x33   : > { %s8756_s17 = scalar_lea.hbm %s11137_s0, 65536  ;;  %p8757_p7 = scmp.lt.u32.totalorder %s8985_s10, %s11137_s0 }
  0x34   : > { %p8753_p12 = pneg %p11154_p11  ;;  %p8758_p3 = scmp.lt.u32.totalorder %s8756_s17, %s8751_s11 }
  0x35   : > { %p8760_p9 = scmp.lt.u32.totalorder %s8751_s11, %s8985_s10 }
  0x36   : > { %p8754_p13 = pnand %p8753_p12, %p8752_p6  ;;  %p8759_p8 = por %p8758_p3, %p8757_p7 }
  0x38   : > { %p8755_p1 = pneg %p8754_p13  ;;  %p8761_p10 = por %p8760_p9, %p8759_p8 }
  0x3a   : > { %p8762_p2 = pnand %p8761_p10, %p8755_p1 }
  0x3c   : > { %8765 = shalt.err (!%p8762_p2)
}
  0x3d   : > { %s8766_s30 = scalar_lea.vmem %s8987_s7, 32768  ;;  %s8854_s22 = smov [#allocation2]  }
  0x3e   : > { %p8767_p4 = scmp.ne.s32.totalorder %s8987_s7, %s8766_s30  ;;  %s8771_s27 = sshll.u32 %s8854_s22, 4  ;;  %s8772_s27 = int_to_ptr.vmem [resolvable:$false] %s8771_s27 }
  0x3f   : > { %s8773_s6 = scalar_lea.vmem %s8772_s27, 65536  ;;  %p8774_p6 = scmp.lt.s32.totalorder %s8987_s7, %s8772_s27 }
  0x40   : > { %p8769_p5 = pnand %p8767_p4, %p8753_p12  ;;  %p8775_p13 = scmp.lt.s32.totalorder %s8773_s6, %s8766_s30 }
  0x42   : > { %p8770_p0 = pneg %p8769_p5  ;;  %p8776_p7 = por %p8775_p13, %p8774_p6 }
  0x44   : > { %p8777_p3 = pnand %p8776_p7, %p8770_p0 }
  0x46   : > { %8780 = shalt.err (!%p8777_p3)
}
  0x47   : > { %s8855_s8 = smov 128   ;;  %s8856_s9 = smov 8  }
  0x48   : > { %8159 = dma.hbm_to_vmem [thread:$0]  (!%p11154_p11), %s8985_s10, 32768, %s8987_s7, %s8989_s29, %s8855_s8, %s8855_s8, %s8856_s9  }
  0x49   : > { %p11155_p12 = scmp.ne.s32.totalorder %s11150_s26, 0 }
  0x4a   : > { %s9020_s11 = sand.u32 (!%p11155_p12), 1, %s8843_s13   ;;  %p11156_p1 = scmp.ne.s32.totalorder (!%p11155_p12), %s11147_s23, 0 }
  0x4b   : > { %170 = sbr.rel (%p11155_p12) target bundleno = 727 (0x2d7), region = 32  ;;  %s6659_s28 = sshll.u32 (!%p11155_p12), %s9020_s11, 11 }
  0x4c   : > { %s173_s5 = scalar_lea.sflag (!%p11155_p12), [#allocation3], %s9020_s11  ;;  %s9026_s17 = scalar_lea.vmem (!%p11155_p12), [#allocation2], %s6659_s28 }
  0x52   : > { %8826 = dma.done.wait (%p11156_p1), %s173_s5, 32768  }
  0x53   : > { %8828 = vsyncadd (%p11156_p1), %s173_s5, 4294934528  ;;  %p11157_p11 = scmp.eq.s32.totalorder %s8905_s16, 0 }
  0x55   : > { %8830 = dma.done.wait (%p11157_p11), [#allocation6], 128   ;;  %p11158_p8 = pmov %p11157_p11 }
  0x56   : > { %v8857_v0 = vmov 0.0|0.0   ;;  %vm8858_vm0 = vmmov 0   ;;  %v8859_v1 = vmov 0.0   ;;  %v8860_v2 = vmov 0   ;;  %v205_v3 = vld [vmem:[%s9026_s17] sm:$0xff]  ;;  %v206_v4 = vld [vmem:[%s9026_s17 + $0x8] sm:$0xff] }
  0x57   : > { %8832 = vsyncadd (%p11158_p8), [#allocation6], 4294967168  ;;  %7760 = vmatprep.subr.bf16.mxu0 %v8857_v0  ;;  %7766 = vmatprep.subr.bf16.mxu1 %v8857_v0  ;;  %v209_v5 = vld [vmem:[%s9026_s17 + $0x20] sm:$0xff]  ;;  %v7761_v6 = vpack.c.bf16 %v206_v4, %v205_v3  ;;  %v210_v7 = vld [vmem:[%s9026_s17 + $0x28] sm:$0xff]  ;;  %vm468_vm1 = vcmask 261120   ;;  %s9804_s4 = scalar_lea.vmem [#allocation7], %s6659_s28 }
  0x58   : > { %7064 = vmatprep.mubr.msk.f32.mxu0 %vm8858_vm0, %v8859_v1  ;;  %7075 = vmatprep.mubr.msk.f32.mxu1 %vm8858_vm0, %v8859_v1  ;;  %v207_v8 = vld [vmem:[%s9026_s17 + $0x10] sm:$0xff]  ;;  %v208_v9 = vld [vmem:[%s9026_s17 + $0x18] sm:$0xff]  ;;  %v7767_v10 = vpack.c.bf16 %v210_v7, %v209_v5  ;;  %v213_v15 = vld [vmem:[%s9026_s17 + $0x40] sm:$0xff]  ;;  %s6735_s7 = sshll.u32 %s8905_s16, 15  ;;  %s6567_s10 = sshll.u32 %s9804_s4, 4  ;;  %s11085_s10 = int_to_ptr.vmem [resolvable:$true] %s6567_s10 }
  0x59   : > { %8209 = vset.pattern.permute.xlu0 %v8860_v2  ;;  %v211_v11 = vld [vmem:[%s9026_s17 + $0x30] sm:$0xff]  ;;  %v212_v12 = vld [vmem:[%s9026_s17 + $0x38] sm:$0xff]  ;;  %7762 = vmatpush3.bf16.msra.mxu0 %v7761_v6  ;;  %v7764_v13 = vpack.c.bf16 %v208_v9, %v207_v8  ;;  %v214_v16 = vld [vmem:[%s9026_s17 + $0x48] sm:$0xff]  ;;  %s11083_s19 = scalar_lea.hbm %s11140_s3, %s6735_s7  ;;  %s6553_s20 = scalar_lea.sflag [#allocation4], %s9020_s11 }
  0x5a   : > { %7768 = vmatpush3.bf16.msra.mxu1 %v7767_v10  ;;  %7763 = vmatprep.subr.bf16.mxu0 %v8857_v0  ;;  %v7770_v14 = vpack.c.bf16 %v212_v12, %v211_v11  ;;  %v217_v17 = vld [vmem:[%s9026_s17 + $0x60] sm:$0xff]  ;;  %v218_v18 = vld [vmem:[%s9026_s17 + $0x68] sm:$0xff]  ;;  %v7773_v20 = vpack.c.bf16 %v214_v16, %v213_v15  ;;  %v215_v22 = vld [vmem:[%s9026_s17 + $0x50] sm:$0xff]  ;;  %s8781_s30 = scalar_lea.vmem %s11085_s10, 32768  ;;  %p11159_p10 = scmp.ne.s32.totalorder %s11148_s24, 0 }
  0x5b   : > { %7769 = vmatprep.subr.bf16.mxu1 %v8857_v0  ;;  %v9056_v19 = vld [vmem:[#allocation5] sm:$0xff]  ;;  %v7779_v21 = vpack.c.bf16 %v218_v18, %v217_v17  ;;  %v216_v23 = vld [vmem:[%s9026_s17 + $0x58] sm:$0xff]  ;;  %v219_v24 = vld [vmem:[%s9026_s17 + $0x70] sm:$0xff]  ;;  %p8782_p9 = scmp.ne.s32.totalorder %s11085_s10, %s8781_s30  ;;  %s8861_s22 = smov [#allocation7]  }
  0x5c   : > { %v220_v25 = vld [vmem:[%s9026_s17 + $0x78] sm:$0xff]  ;;  %v7776_v26 = vpack.c.bf16 %v216_v23, %v215_v22  ;;  %v221_v28 = vld [vmem:[%s9026_s17 + $0x80] sm:$0xff]  ;;  %v222_v29 = vld [vmem:[%s9026_s17 + $0x88] sm:$0xff]  ;;  %s8785_s27 = sshll.u32 %s8861_s22, 4  ;;  %s8786_s27 = int_to_ptr.vmem [resolvable:$false] %s8785_s27 }
  0x5d   : > { %7765 = vmatpush3.bf16.msra.mxu0 %v7764_v13  ;;  %v7782_v27 = vpack.c.bf16 %v220_v25, %v219_v24  ;;  %v225_v30 = vld [vmem:[%s9026_s17 + $0xa0] sm:$0xff]  ;;  %v226_v31 = vld [vmem:[%s9026_s17 + $0xa8] sm:$0xff]  ;;  %v7785_v32 = vpack.c.bf16 %v222_v29, %v221_v28  ;;  %v223_v34 = vld [vmem:[%s9026_s17 + $0x90] sm:$0xff]  ;;  %p8783_p2 = pnand %p8782_p9, %p11159_p10  ;;  %s8787_s6 = scalar_lea.vmem %s8786_s27, 65536 }
  0x5e   : > { %7771 = vmatpush3.bf16.msra.mxu1 %v7770_v14  ;;  %7772 = vmatprep.subr.bf16.mxu0 %v8857_v0  ;;  %v7791_v33 = vpack.c.bf16 %v226_v31, %v225_v30  ;;  %v224_v35 = vld [vmem:[%s9026_s17 + $0x98] sm:$0xff]  ;;  %v227_v36 = vld [vmem:[%s9026_s17 + $0xb0] sm:$0xff]  ;;  %v229_v40 = vld [vmem:[%s9026_s17 + $0xc0] sm:$0xff]  ;;  %p8788_p5 = scmp.lt.s32.totalorder %s11085_s10, %s8786_s27  ;;  %p8789_p0 = scmp.lt.s32.totalorder %s8787_s6, %s8781_s30 }
  0x5f   : > { %7778 = vmatprep.subr.bf16.mxu1 %v8857_v0  ;;  %v228_v37 = vld [vmem:[%s9026_s17 + $0xb8] sm:$0xff]  ;;  %v7788_v38 = vpack.c.bf16 %v224_v35, %v223_v34  ;;  %v230_v41 = vld [vmem:[%s9026_s17 + $0xc8] sm:$0xff]  ;;  %v233_v42 = vld [vmem:[%s9026_s17 + $0xe0] sm:$0xff]  ;;  %p8784_p4 = pneg %p8783_p2 }
  0x60   : > { %7065 = vmatmul.mubr.msk.f32.vlgmr.msra.gmra.mrb[0].mxu0 %vm468_vm1, %v9056_v19  ;;  %v7794_v39 = vpack.c.bf16 %v228_v37, %v227_v36  ;;  %v234_v43 = vld [vmem:[%s9026_s17 + $0xe8] sm:$0xff]  ;;  %v7797_v44 = vpack.c.bf16 %v230_v41, %v229_v40  ;;  %v231_v46 = vld [vmem:[%s9026_s17 + $0xd0] sm:$0xff]  ;;  %v232_v47 = vld [vmem:[%s9026_s17 + $0xd8] sm:$0xff]  ;;  %p8790_p6 = por %p8789_p0, %p8788_p5 }
  0x61   : > { %7076 = vmatmul.mubr.msk.f32.vlgmr.msra.gmra.mrb[0].mxu1 %vm468_vm1, %v9056_v19  ;;  %7774 = vmatpush3.bf16.msra.mxu0 %v7773_v20  ;;  %v7803_v45 = vpack.c.bf16 %v234_v43, %v233_v42  ;;  %v235_v48 = vld [vmem:[%s9026_s17 + $0xf0] sm:$0xff]  ;;  %v236_v49 = vld [vmem:[%s9026_s17 + $0xf8] sm:$0xff]  ;;  %v7800_v50 = vpack.c.bf16 %v232_v47, %v231_v46  ;;  %v237_v52 = vld [vmem:[%s9026_s17 + $0x100] sm:$0xff] }
  0x62   : > { %7780 = vmatpush3.bf16.msra.mxu1 %v7779_v21  ;;  %7775 = vmatprep.subr.bf16.mxu0 %v8857_v0  ;;  %v7806_v51 = vpack.c.bf16 %v236_v49, %v235_v48  ;;  %v238_v53 = vld [vmem:[%s9026_s17 + $0x108] sm:$0xff]  ;;  %v241_v54 = vld [vmem:[%s9026_s17 + $0x120] sm:$0xff]  ;;  %v239_v59 = vld [vmem:[%s9026_s17 + $0x110] sm:$0xff]  ;;  %p8791_p13 = pnand %p8790_p6, %p8784_p4 }
  0x63   : > { %7781 = vmatprep.subr.bf16.mxu1 %v8857_v0  ;;  %7086 = vmatprep.mubr.msk.f32.mxu0 %vm8858_vm0, %v8859_v1  ;;  %v242_v55 = vld [vmem:[%s9026_s17 + $0x128] sm:$0xff]  ;;  %v7809_v56 = vpack.c.bf16 %v238_v53, %v237_v52  ;;  %v462_v57 = vld [vmem:[%s11139_s2] sm:$0xff]  ;;  %v240_v60 = vld [vmem:[%s9026_s17 + $0x118] sm:$0xff] }
  0x64   : > { %7097 = vmatprep.mubr.msk.f32.mxu1 %vm8858_vm0, %v8859_v1  ;;  %v7815_v58 = vpack.c.bf16 %v242_v55, %v241_v54  ;;  %v243_v61 = vld [vmem:[%s9026_s17 + $0x130] sm:$0xff]  ;;  %v244_v62 = vld [vmem:[%s9026_s17 + $0x138] sm:$0xff]  ;;  %465 = vperm.xlu0 %8209, %v462_v57   ;;  %v7812_v63 = vpack.c.bf16 %v240_v60, %v239_v59  ;;  %v245_v3 = vld [vmem:[%s9026_s17 + $0x140] sm:$0xff] }
  0x65   : > { %7777 = vmatpush3.bf16.msra.mxu0 %v7776_v26  ;;  %v7818_v2 = vpack.c.bf16 %v244_v62, %v243_v61  ;;  %v246_v4 = vld [vmem:[%s9026_s17 + $0x148] sm:$0xff]  ;;  %v249_v5 = vld [vmem:[%s9026_s17 + $0x160] sm:$0xff]  ;;  %v247_v9 = vld [vmem:[%s9026_s17 + $0x150] sm:$0xff] }
  0x66   : > { %7783 = vmatpush3.bf16.msra.mxu1 %v7782_v27  ;;  %7784 = vmatprep.subr.bf16.mxu0 %v8857_v0  ;;  %v250_v6 = vld [vmem:[%s9026_s17 + $0x168] sm:$0xff]  ;;  %v7821_v7 = vpack.c.bf16 %v246_v4, %v245_v3  ;;  %v248_v10 = vld [vmem:[%s9026_s17 + $0x158] sm:$0xff]  ;;  %v251_v11 = vld [vmem:[%s9026_s17 + $0x170] sm:$0xff] }
  0x67   : > { %7790 = vmatprep.subr.bf16.mxu1 %v8857_v0  ;;  %v7827_v8 = vpack.c.bf16 %v250_v6, %v249_v5  ;;  %v252_v12 = vld [vmem:[%s9026_s17 + $0x178] sm:$0xff]  ;;  %v7824_v13 = vpack.c.bf16 %v248_v10, %v247_v9  ;;  %v253_v15 = vld [vmem:[%s9026_s17 + $0x180] sm:$0xff]  ;;  %v254_v16 = vld [vmem:[%s9026_s17 + $0x188] sm:$0xff] }
  0x68   : > { %7087 = vmatmul.mubr.msk.f32.vlgmr.msra.gmra.mrb[2].mxu0 %vm468_vm1, %v9056_v19  ;;  %v7830_v14 = vpack.c.bf16 %v252_v12, %v251_v11  ;;  %v257_v17 = vld [vmem:[%s9026_s17 + $0x1a0] sm:$0xff]  ;;  %v258_v18 = vld [vmem:[%s9026_s17 + $0x1a8] sm:$0xff]  ;;  %v7833_v20 = vpack.c.bf16 %v254_v16, %v253_v15  ;;  %v255_v22 = vld [vmem:[%s9026_s17 + $0x190] sm:$0xff] }
  0x69   : > { %7098 = vmatmul.mubr.msk.f32.vlgmr.msra.gmra.mrb[2].mxu1 %vm468_vm1, %v9056_v19  ;;  %7786 = vmatpush3.bf16.msra.mxu0 %v7785_v32  ;;  %v7839_v21 = vpack.c.bf16 %v258_v18, %v257_v17  ;;  %v256_v23 = vld [vmem:[%s9026_s17 + $0x198] sm:$0xff]  ;;  %v259_v24 = vld [vmem:[%s9026_s17 + $0x1b0] sm:$0xff]  ;;  %v261_v28 = vld [vmem:[%s9026_s17 + $0x1c0] sm:$0xff] }
  0x6a   : > { %7792 = vmatpush3.bf16.msra.mxu1 %v7791_v33  ;;  %7787 = vmatprep.subr.bf16.mxu0 %v8857_v0  ;;  %v260_v25 = vld [vmem:[%s9026_s17 + $0x1b8] sm:$0xff]  ;;  %v7836_v26 = vpack.c.bf16 %v256_v23, %v255_v22  ;;  %v262_v29 = vld [vmem:[%s9026_s17 + $0x1c8] sm:$0xff]  ;;  %v265_v30 = vld [vmem:[%s9026_s17 + $0x1e0] sm:$0xff] }
  0x6b   : > { %7793 = vmatprep.subr.bf16.mxu1 %v8857_v0  ;;  %7108 = vmatprep.mubr.msk.f32.mxu0 %vm8858_vm0, %v8859_v1  ;;  %v7842_v27 = vpack.c.bf16 %v260_v25, %v259_v24  ;;  %v266_v31 = vld [vmem:[%s9026_s17 + $0x1e8] sm:$0xff]  ;;  %v7845_v32 = vpack.c.bf16 %v262_v29, %v261_v28  ;;  %v263_v34 = vld [vmem:[%s9026_s17 + $0x1d0] sm:$0xff]  ;;  %v264_v35 = vld [vmem:[%s9026_s17 + $0x1d8] sm:$0xff] }
  0x6c   : > { %7119 = vmatprep.mubr.msk.f32.mxu1 %vm8858_vm0, %v8859_v1  ;;  %v7851_v33 = vpack.c.bf16 %v266_v31, %v265_v30  ;;  %v267_v36 = vld [vmem:[%s9026_s17 + $0x1f0] sm:$0xff]  ;;  %v268_v37 = vld [vmem:[%s9026_s17 + $0x1f8] sm:$0xff]  ;;  %v269_v40 = vld [vmem:[%s9026_s17 + $0x200] sm:$0xff] }
  0x6d   : > { %7789 = vmatpush3.bf16.msra.mxu0 %v7788_v38  ;;  %v7848_v38 = vpack.c.bf16 %v264_v35, %v263_v34  ;;  %v270_v41 = vld [vmem:[%s9026_s17 + $0x208] sm:$0xff]  ;;  %v273_v42 = vld [vmem:[%s9026_s17 + $0x220] sm:$0xff]  ;;  %v271_v46 = vld [vmem:[%s9026_s17 + $0x210] sm:$0xff] }
  0x6e   : > { %7795 = vmatpush3.bf16.msra.mxu1 %v7794_v39  ;;  %7796 = vmatprep.subr.bf16.mxu0 %v8857_v0  ;;  %v7854_v39 = vpack.c.bf16 %v268_v37, %v267_v36  ;;  %v274_v43 = vld [vmem:[%s9026_s17 + $0x228] sm:$0xff]  ;;  %v272_v47 = vld [vmem:[%s9026_s17 + $0x218] sm:$0xff]  ;;  %v275_v48 = vld [vmem:[%s9026_s17 + $0x230] sm:$0xff] }
  0x6f   : > { %7802 = vmatprep.subr.bf16.mxu1 %v8857_v0  ;;  %v276_v49 = vld [vmem:[%s9026_s17 + $0x238] sm:$0xff]  ;;  %v277_v52 = vld [vmem:[%s9026_s17 + $0x240] sm:$0xff]  ;;  %v278_v53 = vld [vmem:[%s9026_s17 + $0x248] sm:$0xff] }
  0x70   : > { %7109 = vmatmul.mubr.msk.f32.vlgmr.msra.gmra.mrb[4].mxu0 %vm468_vm1, %v9056_v19  ;;  %v281_v54 = vld [vmem:[%s9026_s17 + $0x260] sm:$0xff]  ;;  %v282_v55 = vld [vmem:[%s9026_s17 + $0x268] sm:$0xff]  ;;  %v280_v59 = vld [vmem:[%s9026_s17 + $0x258] sm:$0xff] }
  0x71   : > { %7120 = vmatmul.mubr.msk.f32.vlgmr.msra.gmra.mrb[4].mxu1 %vm468_vm1, %v9056_v19  ;;  %7798 = vmatpush3.bf16.msra.mxu0 %v7797_v44  ;;  %v7857_v44 = vpack.c.bf16 %v270_v41, %v269_v40  ;;  %v7875_v57 = vpack.c.bf16 %v282_v55, %v281_v54  ;;  %v283_v60 = vld [vmem:[%s9026_s17 + $0x270] sm:$0xff]  ;;  %v284_v61 = vld [vmem:[%s9026_s17 + $0x278] sm:$0xff]  ;;  %v286_v3 = vld [vmem:[%s9026_s17 + $0x288] sm:$0xff] }
  0x72   : > { %7804 = vmatpush3.bf16.msra.mxu1 %v7803_v45  ;;  %7799 = vmatprep.subr.bf16.mxu0 %v8857_v0  ;;  %v7863_v45 = vpack.c.bf16 %v274_v43, %v273_v42  ;;  %v289_v4 = vld [vmem:[%s9026_s17 + $0x2a0] sm:$0xff]  ;;  %v290_v5 = vld [vmem:[%s9026_s17 + $0x2a8] sm:$0xff]  ;;  %v288_v9 = vld [vmem:[%s9026_s17 + $0x298] sm:$0xff] }
  0x73   : > { %7805 = vmatprep.subr.bf16.mxu1 %v8857_v0  ;;  %7130 = vmatprep.mubr.msk.f32.mxu0 %vm8858_vm0, %v8859_v1  ;;  %v291_v10 = vld [vmem:[%s9026_s17 + $0x2b0] sm:$0xff]  ;;  %v292_v11 = vld [vmem:[%s9026_s17 + $0x2b8] sm:$0xff]  ;;  %v294_v15 = vld [vmem:[%s9026_s17 + $0x2c8] sm:$0xff] }
  0x74   : > { %7141 = vmatprep.mubr.msk.f32.mxu1 %vm8858_vm0, %v8859_v1  ;;  %v297_v16 = vld [vmem:[%s9026_s17 + $0x2e0] sm:$0xff]  ;;  %v298_v17 = vld [vmem:[%s9026_s17 + $0x2e8] sm:$0xff]  ;;  %v296_v22 = vld [vmem:[%s9026_s17 + $0x2d8] sm:$0xff] }
  0x75   : > { %7801 = vmatpush3.bf16.msra.mxu0 %v7800_v50  ;;  %v7860_v50 = vpack.c.bf16 %v272_v47, %v271_v46  ;;  %v299_v23 = vld [vmem:[%s9026_s17 + $0x2f0] sm:$0xff]  ;;  %v300_v24 = vld [vmem:[%s9026_s17 + $0x2f8] sm:$0xff]  ;;  %v302_v28 = vld [vmem:[%s9026_s17 + $0x308] sm:$0xff] }
  0x76   : > { %7807 = vmatpush3.bf16.msra.mxu1 %v7806_v51  ;;  %7808 = vmatprep.subr.bf16.mxu0 %v8857_v0  ;;  %v7866_v51 = vpack.c.bf16 %v276_v49, %v275_v48  ;;  %v305_v29 = vld [vmem:[%s9026_s17 + $0x320] sm:$0xff]  ;;  %v306_v30 = vld [vmem:[%s9026_s17 + $0x328] sm:$0xff]  ;;  %v304_v34 = vld [vmem:[%s9026_s17 + $0x318] sm:$0xff] }
  0x77   : > { %7814 = vmatprep.subr.bf16.mxu1 %v8857_v0  ;;  %v307_v35 = vld [vmem:[%s9026_s17 + $0x330] sm:$0xff]  ;;  %v308_v36 = vld [vmem:[%s9026_s17 + $0x338] sm:$0xff]  ;;  %v310_v40 = vld [vmem:[%s9026_s17 + $0x348] sm:$0xff] }
  0x78   : > { %7131 = vmatmul.mubr.msk.f32.vlgmr.msra.gmra.mrb[6].mxu0 %vm468_vm1, %v9056_v19  ;;  %v313_v41 = vld [vmem:[%s9026_s17 + $0x360] sm:$0xff]  ;;  %v314_v42 = vld [vmem:[%s9026_s17 + $0x368] sm:$0xff]  ;;  %v312_v46 = vld [vmem:[%s9026_s17 + $0x358] sm:$0xff] }
  0x79   : > { %7142 = vmatmul.mubr.msk.f32.vlgmr.msra.gmra.mrb[6].mxu1 %vm468_vm1, %v9056_v19  ;;  %7810 = vmatpush3.bf16.msra.mxu0 %v7809_v56  ;;  %v7869_v56 = vpack.c.bf16 %v278_v53, %v277_v52  ;;  %v315_v47 = vld [vmem:[%s9026_s17 + $0x370] sm:$0xff]  ;;  %v316_v48 = vld [vmem:[%s9026_s17 + $0x378] sm:$0xff]  ;;  %v318_v52 = vld [vmem:[%s9026_s17 + $0x388] sm:$0xff] }
  0x7a   : > { %7816 = vmatpush3.bf16.msra.mxu1 %v7815_v58  ;;  %7811 = vmatprep.subr.bf16.mxu0 %v8857_v0  ;;  %v279_v58 = vld [vmem:[%s9026_s17 + $0x250] sm:$0xff]  ;;  %v321_v53 = vld [vmem:[%s9026_s17 + $0x3a0] sm:$0xff]  ;;  %v322_v54 = vld [vmem:[%s9026_s17 + $0x3a8] sm:$0xff] }
  0x7b   : > { %7817 = vmatprep.subr.bf16.mxu1 %v8857_v0  ;;  %7152 = vmatprep.mubr.msk.f32.mxu0 %vm8858_vm0, %v8859_v1  ;;  %v7872_v62 = vpack.c.bf16 %v280_v59, %v279_v58  ;;  %v320_v58 = vld [vmem:[%s9026_s17 + $0x398] sm:$0xff]  ;;  %v323_v59 = vld [vmem:[%s9026_s17 + $0x3b0] sm:$0xff] }
  0x7c   : > { %7163 = vmatprep.mubr.msk.f32.mxu1 %vm8858_vm0, %v8859_v1 }
  0x7d   : > { %7813 = vmatpush3.bf16.msra.mxu0 %v7812_v63  ;;  %v7878_v63 = vpack.c.bf16 %v284_v61, %v283_v60  ;;  %v324_v60 = vld [vmem:[%s9026_s17 + $0x3b8] sm:$0xff] }
  0x7e   : > { %7819 = vmatpush3.bf16.msra.mxu1 %v7818_v2  ;;  %7820 = vmatprep.subr.bf16.mxu0 %v8857_v0  ;;  %v285_v2 = vld [vmem:[%s9026_s17 + $0x280] sm:$0xff] }
  0x7f   : > { %7826 = vmatprep.subr.bf16.mxu1 %v8857_v0  ;;  %v7881_v6 = vpack.c.bf16 %v286_v3, %v285_v2  ;;  %v326_v2 = vld [vmem:[%s9026_s17 + $0x3c8] sm:$0xff]  ;;  %v329_v3 = vld [vmem:[%s9026_s17 + $0x3e0] sm:$0xff] }
  0x80   : > { %7153 = vmatmul.mubr.msk.f32.vlgmr.msra.gmra.mrb[8].mxu0 %vm468_vm1, %v9056_v19 }
  0x81   : > { %7164 = vmatmul.mubr.msk.f32.vlgmr.msra.gmra.mrb[8].mxu1 %vm468_vm1, %v9056_v19  ;;  %7822 = vmatpush3.bf16.msra.mxu0 %v7821_v7  ;;  %v7887_v7 = vpack.c.bf16 %v290_v5, %v289_v4  ;;  %v330_v4 = vld [vmem:[%s9026_s17 + $0x3e8] sm:$0xff] }
  0x82   : > { %7828 = vmatpush3.bf16.msra.mxu1 %v7827_v8  ;;  %7823 = vmatprep.subr.bf16.mxu0 %v8857_v0  ;;  %v287_v8 = vld [vmem:[%s9026_s17 + $0x290] sm:$0xff] }
  0x83   : > { %7829 = vmatprep.subr.bf16.mxu1 %v8857_v0  ;;  %7174 = vmatprep.mubr.msk.f32.mxu0 %vm8858_vm0, %v8859_v1  ;;  %v7884_v12 = vpack.c.bf16 %v288_v9, %v287_v8  ;;  %v328_v8 = vld [vmem:[%s9026_s17 + $0x3d8] sm:$0xff]  ;;  %v331_v9 = vld [vmem:[%s9026_s17 + $0x3f0] sm:$0xff] }
  0x84   : > { %7185 = vmatprep.mubr.msk.f32.mxu1 %vm8858_vm0, %v8859_v1 }
  0x85   : > { %7825 = vmatpush3.bf16.msra.mxu0 %v7824_v13  ;;  %v7890_v13 = vpack.c.bf16 %v292_v11, %v291_v10  ;;  %v332_v10 = vld [vmem:[%s9026_s17 + $0x3f8] sm:$0xff] }
  0x86   : > { %7831 = vmatpush3.bf16.msra.mxu1 %v7830_v14  ;;  %7832 = vmatprep.subr.bf16.mxu0 %v8857_v0  ;;  %v293_v14 = vld [vmem:[%s9026_s17 + $0x2c0] sm:$0xff] }
  0x87   : > { %7838 = vmatprep.subr.bf16.mxu1 %v8857_v0  ;;  %v7893_v18 = vpack.c.bf16 %v294_v15, %v293_v14  ;;  %v334_v14 = vld [vmem:[%s9026_s17 + $0x408] sm:$0xff]  ;;  %v337_v15 = vld [vmem:[%s9026_s17 + $0x420] sm:$0xff] }
  0x88   : > { %7175 = vmatmul.mubr.msk.f32.vlgmr.msra.gmra.mrb[10].mxu0 %vm468_vm1, %v9056_v19 }
  0x89   : > { %7186 = vmatmul.mubr.msk.f32.vlgmr.msra.gmra.mrb[10].mxu1 %vm468_vm1, %v9056_v19  ;;  %7834 = vmatpush3.bf16.msra.mxu0 %v7833_v20  ;;  %v7899_v20 = vpack.c.bf16 %v298_v17, %v297_v16  ;;  %v338_v16 = vld [vmem:[%s9026_s17 + $0x428] sm:$0xff] }
  0x8a   : > { %7840 = vmatpush3.bf16.msra.mxu1 %v7839_v21  ;;  %7835 = vmatprep.subr.bf16.mxu0 %v8857_v0  ;;  %v295_v21 = vld [vmem:[%s9026_s17 + $0x2d0] sm:$0xff] }
  0x8b   : > { %7841 = vmatprep.subr.bf16.mxu1 %v8857_v0  ;;  %7196 = vmatprep.mubr.msk.f32.mxu0 %vm8858_vm0, %v8859_v1  ;;  %v7896_v25 = vpack.c.bf16 %v296_v22, %v295_v21  ;;  %v336_v21 = vld [vmem:[%s9026_s17 + $0x418] sm:$0xff]  ;;  %v339_v22 = vld [vmem:[%s9026_s17 + $0x430] sm:$0xff] }
  0x8c   : > { %7207 = vmatprep.mubr.msk.f32.mxu1 %vm8858_vm0, %v8859_v1 }
  0x8d   : > { %7837 = vmatpush3.bf16.msra.mxu0 %v7836_v26  ;;  %v7902_v26 = vpack.c.bf16 %v300_v24, %v299_v23  ;;  %v340_v23 = vld [vmem:[%s9026_s17 + $0x438] sm:$0xff] }
  0x8e   : > { %7843 = vmatpush3.bf16.msra.mxu1 %v7842_v27  ;;  %7844 = vmatprep.subr.bf16.mxu0 %v8857_v0  ;;  %v301_v27 = vld [vmem:[%s9026_s17 + $0x300] sm:$0xff] }
  0x8f   : > { %7850 = vmatprep.subr.bf16.mxu1 %v8857_v0  ;;  %v7905_v31 = vpack.c.bf16 %v302_v28, %v301_v27  ;;  %v342_v27 = vld [vmem:[%s9026_s17 + $0x448] sm:$0xff]  ;;  %v345_v28 = vld [vmem:[%s9026_s17 + $0x460] sm:$0xff] }
  0x90   : > { %7197 = vmatmul.mubr.msk.f32.vlgmr.msra.gmra.mrb[12].mxu0 %vm468_vm1, %v9056_v19 }
  0x91   : > { %7208 = vmatmul.mubr.msk.f32.vlgmr.msra.gmra.mrb[12].mxu1 %vm468_vm1, %v9056_v19  ;;  %7846 = vmatpush3.bf16.msra.mxu0 %v7845_v32  ;;  %v7911_v32 = vpack.c.bf16 %v306_v30, %v305_v29  ;;  %v346_v29 = vld [vmem:[%s9026_s17 + $0x468] sm:$0xff] }
  0x92   : > { %7852 = vmatpush3.bf16.msra.mxu1 %v7851_v33  ;;  %7847 = vmatprep.subr.bf16.mxu0 %v8857_v0  ;;  %v303_v33 = vld [vmem:[%s9026_s17 + $0x310] sm:$0xff] }
  0x93   : > { %7853 = vmatprep.subr.bf16.mxu1 %v8857_v0  ;;  %7218 = vmatprep.mubr.msk.f32.mxu0 %vm8858_vm0, %v8859_v1  ;;  %v7908_v37 = vpack.c.bf16 %v304_v34, %v303_v33  ;;  %v344_v33 = vld [vmem:[%s9026_s17 + $0x458] sm:$0xff]  ;;  %v347_v34 = vld [vmem:[%s9026_s17 + $0x470] sm:$0xff] }
  0x94   : > { %7229 = vmatprep.mubr.msk.f32.mxu1 %vm8858_vm0, %v8859_v1 }
  0x95   : > { %7849 = vmatpush3.bf16.msra.mxu0 %v7848_v38  ;;  %v7914_v38 = vpack.c.bf16 %v308_v36, %v307_v35  ;;  %v348_v35 = vld [vmem:[%s9026_s17 + $0x478] sm:$0xff] }
  0x96   : > { %7855 = vmatpush3.bf16.msra.mxu1 %v7854_v39  ;;  %7856 = vmatprep.subr.bf16.mxu0 %v8857_v0  ;;  %v309_v39 = vld [vmem:[%s9026_s17 + $0x340] sm:$0xff] }
  0x97   : > { %7862 = vmatprep.subr.bf16.mxu1 %v8857_v0  ;;  %v7917_v43 = vpack.c.bf16 %v310_v40, %v309_v39  ;;  %v350_v39 = vld [vmem:[%s9026_s17 + $0x488] sm:$0xff]  ;;  %v353_v40 = vld [vmem:[%s9026_s17 + $0x4a0] sm:$0xff] }
  0x98   : > { %7219 = vmatmul.mubr.msk.f32.vlgmr.msra.gmra.mrb[14].mxu0 %vm468_vm1, %v9056_v19 }
  0x99   : > { %7230 = vmatmul.mubr.msk.f32.vlgmr.msra.gmra.mrb[14].mxu1 %vm468_vm1, %v9056_v19  ;;  %7858 = vmatpush3.bf16.msra.mxu0 %v7857_v44  ;;  %v7923_v44 = vpack.c.bf16 %v314_v42, %v313_v41  ;;  %v354_v41 = vld [vmem:[%s9026_s17 + $0x4a8] sm:$0xff] }
  0x9a   : > { %7864 = vmatpush3.bf16.msra.mxu1 %v7863_v45  ;;  %7859 = vmatprep.subr.bf16.mxu0 %v8857_v0  ;;  %v311_v45 = vld [vmem:[%s9026_s17 + $0x350] sm:$0xff] }
  0x9b   : > { %7865 = vmatprep.subr.bf16.mxu1 %v8857_v0  ;;  %7240 = vmatprep.mubr.msk.f32.mxu0 %vm8858_vm0, %v8859_v1  ;;  %v7920_v49 = vpack.c.bf16 %v312_v46, %v311_v45  ;;  %v352_v45 = vld [vmem:[%s9026_s17 + $0x498] sm:$0xff]  ;;  %v355_v46 = vld [vmem:[%s9026_s17 + $0x4b0] sm:$0xff] }
  0x9c   : > { %7251 = vmatprep.mubr.msk.f32.mxu1 %vm8858_vm0, %v8859_v1 }
  0x9d   : > { %7861 = vmatpush3.bf16.msra.mxu0 %v7860_v50  ;;  %v7926_v50 = vpack.c.bf16 %v316_v48, %v315_v47  ;;  %v356_v47 = vld [vmem:[%s9026_s17 + $0x4b8] sm:$0xff] }
  0x9e   : > { %7867 = vmatpush3.bf16.msra.mxu1 %v7866_v51  ;;  %7868 = vmatprep.subr.bf16.mxu0 %v8857_v0  ;;  %v317_v51 = vld [vmem:[%s9026_s17 + $0x380] sm:$0xff] }
  0x9f   : > { %7874 = vmatprep.subr.bf16.mxu1 %v8857_v0  ;;  %v7929_v55 = vpack.c.bf16 %v318_v52, %v317_v51  ;;  %v358_v51 = vld [vmem:[%s9026_s17 + $0x4c8] sm:$0xff]  ;;  %v361_v52 = vld [vmem:[%s9026_s17 + $0x4e0] sm:$0xff] }
  0xa0   : > { %7241 = vmatmul.mubr.msk.f32.vlgmr.msra.gmra.mrb[16].mxu0 %vm468_vm1, %v9056_v19 }
  0xa1   : > { %7252 = vmatmul.mubr.msk.f32.vlgmr.msra.gmra.mrb[16].mxu1 %vm468_vm1, %v9056_v19  ;;  %7870 = vmatpush3.bf16.msra.mxu0 %v7869_v56  ;;  %v7935_v56 = vpack.c.bf16 %v322_v54, %v321_v53  ;;  %v362_v53 = vld [vmem:[%s9026_s17 + $0x4e8] sm:$0xff] }
  0xa2   : > { %7876 = vmatpush3.bf16.msra.mxu1 %v7875_v57  ;;  %7871 = vmatprep.subr.bf16.mxu0 %v8857_v0  ;;  %v319_v57 = vld [vmem:[%s9026_s17 + $0x390] sm:$0xff] }
  0xa3   : > { %7877 = vmatprep.subr.bf16.mxu1 %v8857_v0  ;;  %7262 = vmatprep.mubr.msk.f32.mxu0 %vm8858_vm0, %v8859_v1  ;;  %v7932_v61 = vpack.c.bf16 %v320_v58, %v319_v57  ;;  %v360_v57 = vld [vmem:[%s9026_s17 + $0x4d8] sm:$0xff]  ;;  %v363_v58 = vld [vmem:[%s9026_s17 + $0x4f0] sm:$0xff] }
  0xa4   : > { %7273 = vmatprep.mubr.msk.f32.mxu1 %vm8858_vm0, %v8859_v1 }
  0xa5   : > { %7873 = vmatpush3.bf16.msra.mxu0 %v7872_v62  ;;  %v7938_v62 = vpack.c.bf16 %v324_v60, %v323_v59  ;;  %v364_v59 = vld [vmem:[%s9026_s17 + $0x4f8] sm:$0xff] }
  0xa6   : > { %7879 = vmatpush3.bf16.msra.mxu1 %v7878_v63  ;;  %7880 = vmatprep.subr.bf16.mxu0 %v8857_v0  ;;  %v325_v63 = vld [vmem:[%s9026_s17 + $0x3c0] sm:$0xff] }
  0xa7   : > { %7886 = vmatprep.subr.bf16.mxu1 %v8857_v0  ;;  %v7941_v5 = vpack.c.bf16 %v326_v2, %v325_v63  ;;  %v366_v63 = vld [vmem:[%s9026_s17 + $0x508] sm:$0xff]  ;;  %v369_v2 = vld [vmem:[%s9026_s17 + $0x520] sm:$0xff] }
  0xa8   : > { %7263 = vmatmul.mubr.msk.f32.vlgmr.msra.gmra.mrb[18].mxu0 %vm468_vm1, %v9056_v19 }
  0xa9   : > { %7274 = vmatmul.mubr.msk.f32.vlgmr.msra.gmra.mrb[18].mxu1 %vm468_vm1, %v9056_v19  ;;  %7882 = vmatpush3.bf16.msra.mxu0 %v7881_v6  ;;  %v7947_v6 = vpack.c.bf16 %v330_v4, %v329_v3  ;;  %v370_v3 = vld [vmem:[%s9026_s17 + $0x528] sm:$0xff] }
  0xaa   : > { %7888 = vmatpush3.bf16.msra.mxu1 %v7887_v7  ;;  %7883 = vmatprep.subr.bf16.mxu0 %v8857_v0  ;;  %v327_v7 = vld [vmem:[%s9026_s17 + $0x3d0] sm:$0xff] }
  0xab   : > { %7889 = vmatprep.subr.bf16.mxu1 %v8857_v0  ;;  %7284 = vmatprep.mubr.msk.f32.mxu0 %vm8858_vm0, %v8859_v1  ;;  %v7944_v11 = vpack.c.bf16 %v328_v8, %v327_v7  ;;  %v368_v7 = vld [vmem:[%s9026_s17 + $0x518] sm:$0xff]  ;;  %v371_v8 = vld [vmem:[%s9026_s17 + $0x530] sm:$0xff] }
  0xac   : > { %7295 = vmatprep.mubr.msk.f32.mxu1 %vm8858_vm0, %v8859_v1 }
  0xad   : > { %7885 = vmatpush3.bf16.msra.mxu0 %v7884_v12  ;;  %v7950_v12 = vpack.c.bf16 %v332_v10, %v331_v9  ;;  %v372_v9 = vld [vmem:[%s9026_s17 + $0x538] sm:$0xff] }
  0xae   : > { %7891 = vmatpush3.bf16.msra.mxu1 %v7890_v13  ;;  %7892 = vmatprep.subr.bf16.mxu0 %v8857_v0  ;;  %v333_v13 = vld [vmem:[%s9026_s17 + $0x400] sm:$0xff] }
  0xaf   : > { %7898 = vmatprep.subr.bf16.mxu1 %v8857_v0  ;;  %v7953_v17 = vpack.c.bf16 %v334_v14, %v333_v13  ;;  %v374_v13 = vld [vmem:[%s9026_s17 + $0x548] sm:$0xff]  ;;  %v377_v14 = vld [vmem:[%s9026_s17 + $0x560] sm:$0xff] }
  0xb0   : > { %7285 = vmatmul.mubr.msk.f32.vlgmr.msra.gmra.mrb[20].mxu0 %vm468_vm1, %v9056_v19 }
  0xb1   : > { %7296 = vmatmul.mubr.msk.f32.vlgmr.msra.gmra.mrb[20].mxu1 %vm468_vm1, %v9056_v19  ;;  %7894 = vmatpush3.bf16.msra.mxu0 %v7893_v18  ;;  %v7959_v18 = vpack.c.bf16 %v338_v16, %v337_v15  ;;  %v378_v15 = vld [vmem:[%s9026_s17 + $0x568] sm:$0xff] }
  0xb2   : > { %7900 = vmatpush3.bf16.msra.mxu1 %v7899_v20  ;;  %7895 = vmatprep.subr.bf16.mxu0 %v8857_v0  ;;  %v335_v20 = vld [vmem:[%s9026_s17 + $0x410] sm:$0xff] }
  0xb3   : > { %7901 = vmatprep.subr.bf16.mxu1 %v8857_v0  ;;  %7306 = vmatprep.mubr.msk.f32.mxu0 %vm8858_vm0, %v8859_v1  ;;  %v7956_v24 = vpack.c.bf16 %v336_v21, %v335_v20  ;;  %v376_v20 = vld [vmem:[%s9026_s17 + $0x558] sm:$0xff]  ;;  %v379_v21 = vld [vmem:[%s9026_s17 + $0x570] sm:$0xff] }
  0xb4   : > { %7317 = vmatprep.mubr.msk.f32.mxu1 %vm8858_vm0, %v8859_v1 }
  0xb5   : > { %7897 = vmatpush3.bf16.msra.mxu0 %v7896_v25  ;;  %v7962_v25 = vpack.c.bf16 %v340_v23, %v339_v22  ;;  %v380_v22 = vld [vmem:[%s9026_s17 + $0x578] sm:$0xff] }
  0xb6   : > { %7903 = vmatpush3.bf16.msra.mxu1 %v7902_v26  ;;  %7904 = vmatprep.subr.bf16.mxu0 %v8857_v0  ;;  %v341_v26 = vld [vmem:[%s9026_s17 + $0x440] sm:$0xff] }
  0xb7   : > { %7910 = vmatprep.subr.bf16.mxu1 %v8857_v0  ;;  %v7965_v30 = vpack.c.bf16 %v342_v27, %v341_v26  ;;  %v382_v26 = vld [vmem:[%s9026_s17 + $0x588] sm:$0xff]  ;;  %v385_v27 = vld [vmem:[%s9026_s17 + $0x5a0] sm:$0xff] }
  0xb8   : > { %7307 = vmatmul.mubr.msk.f32.vlgmr.msra.gmra.mrb[22].mxu0 %vm468_vm1, %v9056_v19 }
  0xb9   : > { %7318 = vmatmul.mubr.msk.f32.vlgmr.msra.gmra.mrb[22].mxu1 %vm468_vm1, %v9056_v19  ;;  %7906 = vmatpush3.bf16.msra.mxu0 %v7905_v31  ;;  %v7971_v31 = vpack.c.bf16 %v346_v29, %v345_v28  ;;  %v386_v28 = vld [vmem:[%s9026_s17 + $0x5a8] sm:$0xff] }
  0xba   : > { %7912 = vmatpush3.bf16.msra.mxu1 %v7911_v32  ;;  %7907 = vmatprep.subr.bf16.mxu0 %v8857_v0  ;;  %v343_v32 = vld [vmem:[%s9026_s17 + $0x450] sm:$0xff]  ;;  %v8031_v29 = vpack.c.bf16 %v386_v28, %v385_v27  ;;  %v426_v27 = vld [vmem:[%s9026_s17 + $0x6e8] sm:$0xff] }
  0xbb   : > { %7913 = vmatprep.subr.bf16.mxu1 %v8857_v0  ;;  %7328 = vmatprep.mubr.msk.f32.mxu0 %vm8858_vm0, %v8859_v1  ;;  %v7968_v36 = vpack.c.bf16 %v344_v33, %v343_v32  ;;  %v387_v32 = vld [vmem:[%s9026_s17 + $0x5b0] sm:$0xff]  ;;  %v388_v33 = vld [vmem:[%s9026_s17 + $0x5b8] sm:$0xff] }
  0xbc   : > { %7339 = vmatprep.mubr.msk.f32.mxu1 %vm8858_vm0, %v8859_v1 }
  0xbd   : > { %7909 = vmatpush3.bf16.msra.mxu0 %v7908_v37  ;;  %v7974_v37 = vpack.c.bf16 %v348_v35, %v347_v34  ;;  %v9487_v34 = vld [vmem:[#allocation5] sm:$0xff] }
  0xbe   : > { %7915 = vmatpush3.bf16.msra.mxu1 %v7914_v38  ;;  %7916 = vmatprep.subr.bf16.mxu0 %v8857_v0  ;;  %v349_v38 = vld [vmem:[%s9026_s17 + $0x480] sm:$0xff] }
  0xbf   : > { %7922 = vmatprep.subr.bf16.mxu1 %v8857_v0  ;;  %v7977_v42 = vpack.c.bf16 %v350_v39, %v349_v38  ;;  %v390_v38 = vld [vmem:[%s9026_s17 + $0x5c8] sm:$0xff]  ;;  %v393_v39 = vld [vmem:[%s9026_s17 + $0x5e0] sm:$0xff] }
  0xc0   : > { %7329 = vmatmul.mubr.msk.f32.vlgmr.msra.gmra.mrb[24].mxu0 %vm468_vm1, %v9056_v19 }
  0xc1   : > { %7340 = vmatmul.mubr.msk.f32.vlgmr.msra.gmra.mrb[24].mxu1 %vm468_vm1, %v9056_v19  ;;  %7918 = vmatpush3.bf16.msra.mxu0 %v7917_v43  ;;  %v7983_v43 = vpack.c.bf16 %v354_v41, %v353_v40  ;;  %v394_v40 = vld [vmem:[%s9026_s17 + $0x5e8] sm:$0xff] }
  0xc2   : > { %7924 = vmatpush3.bf16.msra.mxu1 %v7923_v44  ;;  %7919 = vmatprep.subr.bf16.mxu0 %v8857_v0  ;;  %v351_v44 = vld [vmem:[%s9026_s17 + $0x490] sm:$0xff] }
  0xc3   : > { %7925 = vmatprep.subr.bf16.mxu1 %v8857_v0  ;;  %7350 = vmatprep.mubr.msk.f32.mxu0 %vm8858_vm0, %v8859_v1  ;;  %v7980_v48 = vpack.c.bf16 %v352_v45, %v351_v44  ;;  %v392_v44 = vld [vmem:[%s9026_s17 + $0x5d8] sm:$0xff]  ;;  %v395_v45 = vld [vmem:[%s9026_s17 + $0x5f0] sm:$0xff] }
  0xc4   : > { %7361 = vmatprep.mubr.msk.f32.mxu1 %vm8858_vm0, %v8859_v1 }
  0xc5   : > { %7921 = vmatpush3.bf16.msra.mxu0 %v7920_v49  ;;  %v7986_v49 = vpack.c.bf16 %v356_v47, %v355_v46  ;;  %v396_v46 = vld [vmem:[%s9026_s17 + $0x5f8] sm:$0xff] }
  0xc6   : > { %7927 = vmatpush3.bf16.msra.mxu1 %v7926_v50  ;;  %7928 = vmatprep.subr.bf16.mxu0 %v8857_v0  ;;  %v357_v50 = vld [vmem:[%s9026_s17 + $0x4c0] sm:$0xff] }
  0xc7   : > { %7934 = vmatprep.subr.bf16.mxu1 %v8857_v0  ;;  %v7989_v54 = vpack.c.bf16 %v358_v51, %v357_v50  ;;  %v398_v50 = vld [vmem:[%s9026_s17 + $0x608] sm:$0xff]  ;;  %v401_v51 = vld [vmem:[%s9026_s17 + $0x620] sm:$0xff] }
  0xc8   : > { %7351 = vmatmul.mubr.msk.f32.vlgmr.msra.gmra.mrb[26].mxu0 %vm468_vm1, %v9056_v19 }
  0xc9   : > { %7362 = vmatmul.mubr.msk.f32.vlgmr.msra.gmra.mrb[26].mxu1 %vm468_vm1, %v9056_v19  ;;  %7930 = vmatpush3.bf16.msra.mxu0 %v7929_v55  ;;  %v7995_v55 = vpack.c.bf16 %v362_v53, %v361_v52  ;;  %v402_v52 = vld [vmem:[%s9026_s17 + $0x628] sm:$0xff] }
  0xca   : > { %7936 = vmatpush3.bf16.msra.mxu1 %v7935_v56  ;;  %7931 = vmatprep.subr.bf16.mxu0 %v8857_v0  ;;  %v359_v56 = vld [vmem:[%s9026_s17 + $0x4d0] sm:$0xff] }
  0xcb   : > { %7937 = vmatprep.subr.bf16.mxu1 %v8857_v0  ;;  %7372 = vmatprep.mubr.msk.f32.mxu0 %vm8858_vm0, %v8859_v1  ;;  %v7992_v60 = vpack.c.bf16 %v360_v57, %v359_v56  ;;  %v400_v56 = vld [vmem:[%s9026_s17 + $0x618] sm:$0xff]  ;;  %v403_v57 = vld [vmem:[%s9026_s17 + $0x630] sm:$0xff] }
  0xcc   : > { %7383 = vmatprep.mubr.msk.f32.mxu1 %vm8858_vm0, %v8859_v1 }
  0xcd   : > { %7933 = vmatpush3.bf16.msra.mxu0 %v7932_v61  ;;  %v7998_v61 = vpack.c.bf16 %v364_v59, %v363_v58  ;;  %v404_v58 = vld [vmem:[%s9026_s17 + $0x638] sm:$0xff] }
  0xce   : > { %7939 = vmatpush3.bf16.msra.mxu1 %v7938_v62  ;;  %7940 = vmatprep.subr.bf16.mxu0 %v8857_v0  ;;  %v365_v62 = vld [vmem:[%s9026_s17 + $0x500] sm:$0xff] }
  0xcf   : > { %7946 = vmatprep.subr.bf16.mxu1 %v8857_v0  ;;  %v8001_v4 = vpack.c.bf16 %v366_v63, %v365_v62  ;;  %v406_v62 = vld [vmem:[%s9026_s17 + $0x648] sm:$0xff]  ;;  %v409_v63 = vld [vmem:[%s9026_s17 + $0x660] sm:$0xff] }
  0xd0   : > { %7373 = vmatmul.mubr.msk.f32.vlgmr.msra.gmra.mrb[28].mxu0 %vm468_vm1, %v9056_v19 }
  0xd1   : > { %7384 = vmatmul.mubr.msk.f32.vlgmr.msra.gmra.mrb[28].mxu1 %vm468_vm1, %v9056_v19  ;;  %7942 = vmatpush3.bf16.msra.mxu0 %v7941_v5  ;;  %v8007_v5 = vpack.c.bf16 %v370_v3, %v369_v2  ;;  %v410_v2 = vld [vmem:[%s9026_s17 + $0x668] sm:$0xff] }
  0xd2   : > { %7948 = vmatpush3.bf16.msra.mxu1 %v7947_v6  ;;  %7943 = vmatprep.subr.bf16.mxu0 %v8857_v0  ;;  %v367_v6 = vld [vmem:[%s9026_s17 + $0x510] sm:$0xff] }
  0xd3   : > { %7949 = vmatprep.subr.bf16.mxu1 %v8857_v0  ;;  %7394 = vmatprep.mubr.msk.f32.mxu0 %vm8858_vm0, %v8859_v1  ;;  %v8004_v10 = vpack.c.bf16 %v368_v7, %v367_v6  ;;  %v408_v6 = vld [vmem:[%s9026_s17 + $0x658] sm:$0xff]  ;;  %v411_v7 = vld [vmem:[%s9026_s17 + $0x670] sm:$0xff] }
  0xd4   : > { %7405 = vmatprep.mubr.msk.f32.mxu1 %vm8858_vm0, %v8859_v1 }
  0xd5   : > { %7945 = vmatpush3.bf16.msra.mxu0 %v7944_v11  ;;  %v8010_v11 = vpack.c.bf16 %v372_v9, %v371_v8  ;;  %v412_v8 = vld [vmem:[%s9026_s17 + $0x678] sm:$0xff] }
  0xd6   : > { %7951 = vmatpush3.bf16.msra.mxu1 %v7950_v12  ;;  %7952 = vmatprep.subr.bf16.mxu0 %v8857_v0  ;;  %v373_v12 = vld [vmem:[%s9026_s17 + $0x540] sm:$0xff] }
  0xd7   : > { %7958 = vmatprep.subr.bf16.mxu1 %v8857_v0  ;;  %v8013_v16 = vpack.c.bf16 %v374_v13, %v373_v12  ;;  %v414_v12 = vld [vmem:[%s9026_s17 + $0x688] sm:$0xff]  ;;  %v417_v13 = vld [vmem:[%s9026_s17 + $0x6a0] sm:$0xff] }
  0xd8   : > { %7395 = vmatmul.mubr.msk.f32.vlgmr.msra.gmra.mrb[30].mxu0 %vm468_vm1, %v9056_v19 }
  0xd9   : > { %7406 = vmatmul.mubr.msk.f32.vlgmr.msra.gmra.mrb[30].mxu1 %vm468_vm1, %v9056_v19  ;;  %7954 = vmatpush3.bf16.msra.mxu0 %v7953_v17  ;;  %v8019_v17 = vpack.c.bf16 %v378_v15, %v377_v14  ;;  %v418_v14 = vld [vmem:[%s9026_s17 + $0x6a8] sm:$0xff] }
  0xda   : > { %7960 = vmatpush3.bf16.msra.mxu1 %v7959_v18  ;;  %7955 = vmatprep.subr.bf16.mxu0 %v8857_v0  ;;  %v375_v18 = vld [vmem:[%s9026_s17 + $0x550] sm:$0xff] }
  0xdb   : > { %7961 = vmatprep.subr.bf16.mxu1 %v8857_v0  ;;  %7416 = vmatprep.mubr.msk.f32.mxu0 %vm8858_vm0, %v8859_v1  ;;  %v8016_v23 = vpack.c.bf16 %v376_v20, %v375_v18  ;;  %v416_v18 = vld [vmem:[%s9026_s17 + $0x698] sm:$0xff]  ;;  %v419_v20 = vld [vmem:[%s9026_s17 + $0x6b0] sm:$0xff] }
  0xdc   : > { %7427 = vmatprep.mubr.msk.f32.mxu1 %vm8858_vm0, %v8859_v1 }
  0xdd   : > { %7957 = vmatpush3.bf16.msra.mxu0 %v7956_v24  ;;  %v8022_v24 = vpack.c.bf16 %v380_v22, %v379_v21  ;;  %v420_v21 = vld [vmem:[%s9026_s17 + $0x6b8] sm:$0xff] }
  0xde   : > { %7963 = vmatpush3.bf16.msra.mxu1 %v7962_v25  ;;  %7964 = vmatprep.subr.bf16.mxu0 %v8857_v0  ;;  %v381_v25 = vld [vmem:[%s9026_s17 + $0x580] sm:$0xff] }
  0xdf   : > { %7970 = vmatprep.subr.bf16.mxu1 %v8857_v0 }
  0xe0   : > { %7417 = vmatmul.mubr.msk.f32.vlgmr.msra.gmra.mrb[32].mxu0 %vm468_vm1, %v9056_v19 }
  0xe1   : > { %7428 = vmatmul.mubr.msk.f32.vlgmr.msra.gmra.mrb[32].mxu1 %vm468_vm1, %v9056_v19  ;;  %7966 = vmatpush3.bf16.msra.mxu0 %v7965_v30  ;;  %v383_v30 = vld [vmem:[%s9026_s17 + $0x590] sm:$0xff] }
  0xe2   : > { %7972 = vmatpush3.bf16.msra.mxu1 %v7971_v31  ;;  %7967 = vmatprep.subr.bf16.mxu0 %v8857_v0  ;;  %v384_v31 = vld [vmem:[%s9026_s17 + $0x598] sm:$0xff] }
  0xe3   : > { %7973 = vmatprep.subr.bf16.mxu1 %v8857_v0  ;;  %7438 = vmatprep.mubr.msk.f32.mxu0 %vm8858_vm0, %v8859_v1  ;;  %v8028_v35 = vpack.c.bf16 %v384_v31, %v383_v30  ;;  %v424_v30 = vld [vmem:[%s9026_s17 + $0x6d8] sm:$0xff]  ;;  %v427_v31 = vld [vmem:[%s9026_s17 + $0x6f0] sm:$0xff] }
  0xe4   : > { %7449 = vmatprep.mubr.msk.f32.mxu1 %vm8858_vm0, %v8859_v1 }
  0xe5   : > { %7969 = vmatpush3.bf16.msra.mxu0 %v7968_v36  ;;  %v8034_v36 = vpack.c.bf16 %v388_v33, %v387_v32  ;;  %v428_v32 = vld [vmem:[%s9026_s17 + $0x6f8] sm:$0xff]  ;;  %v9593_v33 = vpop.permute.xlu0 %465 }
  0xe6   : > { %7975 = vmatpush3.bf16.msra.mxu1 %v7974_v37  ;;  %7976 = vmatprep.subr.bf16.mxu0 %v8857_v0  ;;  %v389_v37 = vld [vmem:[%s9026_s17 + $0x5c0] sm:$0xff] }
  0xe7   : > { %7982 = vmatprep.subr.bf16.mxu1 %v8857_v0  ;;  %v8037_v41 = vpack.c.bf16 %v390_v38, %v389_v37  ;;  %v429_v37 = vld [vmem:[%s9026_s17 + $0x700] sm:$0xff]  ;;  %v430_v38 = vld [vmem:[%s9026_s17 + $0x708] sm:$0xff] }
  0xe8   : > { %7439 = vmatmul.mubr.msk.f32.vlgmr.msra.gmra.mrb[34].mxu0 %vm468_vm1, %v9056_v19 }
  0xe9   : > { %7450 = vmatmul.mubr.msk.f32.vlgmr.msra.gmra.mrb[34].mxu1 %vm468_vm1, %v9056_v19  ;;  %7978 = vmatpush3.bf16.msra.mxu0 %v7977_v42  ;;  %v8043_v42 = vpack.c.bf16 %v394_v40, %v393_v39  ;;  %v433_v40 = vld [vmem:[%s9026_s17 + $0x720] sm:$0xff] }
  0xea   : > { %7984 = vmatpush3.bf16.msra.mxu1 %v7983_v43  ;;  %7979 = vmatprep.subr.bf16.mxu0 %v8857_v0  ;;  %v391_v43 = vld [vmem:[%s9026_s17 + $0x5d0] sm:$0xff] }
  0xeb   : > { %7985 = vmatprep.subr.bf16.mxu1 %v8857_v0  ;;  %7460 = vmatprep.mubr.msk.f32.mxu0 %vm8858_vm0, %v8859_v1  ;;  %v8040_v47 = vpack.c.bf16 %v392_v44, %v391_v43 }
  0xec   : > { %7471 = vmatprep.mubr.msk.f32.mxu1 %vm8858_vm0, %v8859_v1 }
  0xed   : > { %7981 = vmatpush3.bf16.msra.mxu0 %v7980_v48  ;;  %v8046_v48 = vpack.c.bf16 %v396_v46, %v395_v45 }
  0xee   : > { %7987 = vmatpush3.bf16.msra.mxu1 %v7986_v49  ;;  %7988 = vmatprep.subr.bf16.mxu0 %v8857_v0  ;;  %v397_v49 = vld [vmem:[%s9026_s17 + $0x600] sm:$0xff] }
  0xef   : > { %7994 = vmatprep.subr.bf16.mxu1 %v8857_v0  ;;  %v8049_v53 = vpack.c.bf16 %v398_v50, %v397_v49  ;;  %v431_v50 = vld [vmem:[%s9026_s17 + $0x710] sm:$0xff] }
  0xf0   : > { %7461 = vmatmul.mubr.msk.f32.vlgmr.msra.gmra.mrb[36].mxu0 %vm468_vm1, %v9056_v19 }
  0xf1   : > { %7472 = vmatmul.mubr.msk.f32.vlgmr.msra.gmra.mrb[36].mxu1 %vm468_vm1, %v9056_v19  ;;  %7990 = vmatpush3.bf16.msra.mxu0 %v7989_v54  ;;  %v8055_v54 = vpack.c.bf16 %v402_v52, %v401_v51  ;;  %v432_v51 = vld [vmem:[%s9026_s17 + $0x718] sm:$0xff] }
  0xf2   : > { %7996 = vmatpush3.bf16.msra.mxu1 %v7995_v55  ;;  %7991 = vmatprep.subr.bf16.mxu0 %v8857_v0  ;;  %v399_v55 = vld [vmem:[%s9026_s17 + $0x610] sm:$0xff] }
  0xf3   : > { %7997 = vmatprep.subr.bf16.mxu1 %v8857_v0  ;;  %7482 = vmatprep.mubr.msk.f32.mxu0 %vm8858_vm0, %v8859_v1  ;;  %v8052_v59 = vpack.c.bf16 %v400_v56, %v399_v55 }
  0xf4   : > { %7493 = vmatprep.mubr.msk.f32.mxu1 %vm8858_vm0, %v8859_v1 }
  0xf5   : > { %7993 = vmatpush3.bf16.msra.mxu0 %v7992_v60  ;;  %v8058_v60 = vpack.c.bf16 %v404_v58, %v403_v57  ;;  %v8100_v57 = vpack.c.bf16 %v432_v51, %v431_v50  ;;  %v447_v51 = vld [vmem:[%s9026_s17 + $0x790] sm:$0xff] }
  0xf6   : > { %7999 = vmatpush3.bf16.msra.mxu1 %v7998_v61  ;;  %8000 = vmatprep.subr.bf16.mxu0 %v8857_v0  ;;  %v405_v61 = vld [vmem:[%s9026_s17 + $0x640] sm:$0xff] }
  0xf7   : > { %8006 = vmatprep.subr.bf16.mxu1 %v8857_v0  ;;  %v8061_v3 = vpack.c.bf16 %v406_v62, %v405_v61  ;;  %v438_v61 = vld [vmem:[%s9026_s17 + $0x748] sm:$0xff] }
  0xf8   : > { %7483 = vmatmul.mubr.msk.f32.vlgmr.msra.gmra.mrb[38].mxu0 %vm468_vm1, %v9056_v19 }
  0xf9   : > { %7494 = vmatmul.mubr.msk.f32.vlgmr.msra.gmra.mrb[38].mxu1 %vm468_vm1, %v9056_v19  ;;  %8002 = vmatpush3.bf16.msra.mxu0 %v8001_v4  ;;  %v8067_v4 = vpack.c.bf16 %v410_v2, %v409_v63  ;;  %v441_v2 = vld [vmem:[%s9026_s17 + $0x760] sm:$0xff] }
  0xfa   : > { %8008 = vmatpush3.bf16.msra.mxu1 %v8007_v5  ;;  %8003 = vmatprep.subr.bf16.mxu0 %v8857_v0  ;;  %v407_v5 = vld [vmem:[%s9026_s17 + $0x650] sm:$0xff] }
  0xfb   : > { %8009 = vmatprep.subr.bf16.mxu1 %v8857_v0  ;;  %7504 = vmatprep.mubr.msk.f32.mxu0 %vm8858_vm0, %v8859_v1  ;;  %v8064_v9 = vpack.c.bf16 %v408_v6, %v407_v5 }
  0xfc   : > { %7515 = vmatprep.mubr.msk.f32.mxu1 %vm8858_vm0, %v8859_v1 }
  0xfd   : > { %8005 = vmatpush3.bf16.msra.mxu0 %v8004_v10  ;;  %v8070_v10 = vpack.c.bf16 %v412_v8, %v411_v7 }
  0xfe   : > { %8011 = vmatpush3.bf16.msra.mxu1 %v8010_v11  ;;  %8012 = vmatprep.subr.bf16.mxu0 %v8857_v0  ;;  %v413_v11 = vld [vmem:[%s9026_s17 + $0x680] sm:$0xff] }
  0xff   : > { %8018 = vmatprep.subr.bf16.mxu1 %v8857_v0  ;;  %v8073_v15 = vpack.c.bf16 %v414_v12, %v413_v11 }
 0x100   : > { %7505 = vmatmul.mubr.msk.f32.vlgmr.msra.gmra.mrb[40].mxu0 %vm468_vm1, %v9056_v19 }
 0x101   : > { %7516 = vmatmul.mubr.msk.f32.vlgmr.msra.gmra.mrb[40].mxu1 %vm468_vm1, %v9056_v19  ;;  %8014 = vmatpush3.bf16.msra.mxu0 %v8013_v16  ;;  %v8025_v19 = vpack.c.bf16 %v382_v26, %v381_v25  ;;  %v8079_v16 = vpack.c.bf16 %v418_v14, %v417_v13  ;;  %v422_v25 = vld [vmem:[%s9026_s17 + $0x6c8] sm:$0xff]  ;;  %v425_v26 = vld [vmem:[%s9026_s17 + $0x6e0] sm:$0xff] }
 0x102   : > { %8020 = vmatpush3.bf16.msra.mxu1 %v8019_v17  ;;  %8015 = vmatprep.subr.bf16.mxu0 %v8857_v0  ;;  %v415_v17 = vld [vmem:[%s9026_s17 + $0x690] sm:$0xff] }
 0x103   : > { %8021 = vmatprep.subr.bf16.mxu1 %v8857_v0  ;;  %7526 = vmatprep.mubr.msk.f32.mxu0 %vm8858_vm0, %v8859_v1  ;;  %v8076_v22 = vpack.c.bf16 %v416_v18, %v415_v17 }
 0x104   : > { %7537 = vmatprep.mubr.msk.f32.mxu1 %vm8858_vm0, %v8859_v1 }
 0x105   : > { %8017 = vmatpush3.bf16.msra.mxu0 %v8016_v23  ;;  %v8082_v23 = vpack.c.bf16 %v420_v21, %v419_v20  ;;  %v443_v20 = vld [vmem:[%s9026_s17 + $0x770] sm:$0xff]  ;;  %v444_v21 = vld [vmem:[%s9026_s17 + $0x778] sm:$0xff] }
 0x106   : > { %8023 = vmatpush3.bf16.msra.mxu1 %v8022_v24  ;;  %8024 = vmatprep.subr.bf16.mxu0 %v8857_v0  ;;  %v421_v24 = vld [vmem:[%s9026_s17 + $0x6c0] sm:$0xff] }
 0x107   : > { %8030 = vmatprep.subr.bf16.mxu1 %v8857_v0  ;;  %v8085_v28 = vpack.c.bf16 %v422_v25, %v421_v24 }
 0x108   : > { %7527 = vmatmul.mubr.msk.f32.vlgmr.msra.gmra.mrb[42].mxu0 %vm468_vm1, %v9487_v34 }
 0x109   : > { %7538 = vmatmul.mubr.msk.f32.vlgmr.msra.gmra.mrb[42].mxu1 %vm468_vm1, %v9487_v34  ;;  %8026 = vmatpush3.bf16.msra.mxu0 %v8025_v19  ;;  %v8091_v19 = vpack.c.bf16 %v426_v27, %v425_v26 }
 0x10a   : > { %8032 = vmatpush3.bf16.msra.mxu1 %v8031_v29  ;;  %8027 = vmatprep.subr.bf16.mxu0 %v8857_v0  ;;  %v423_v29 = vld [vmem:[%s9026_s17 + $0x6d0] sm:$0xff] }
 0x10b   : > { %8033 = vmatprep.subr.bf16.mxu1 %v8857_v0  ;;  %7548 = vmatprep.mubr.msk.f32.mxu0 %vm8858_vm0, %v8859_v1 }
 0x10c   : > { %7559 = vmatprep.mubr.msk.f32.mxu1 %vm8858_vm0, %v8859_v1 }
 0x10d   : > { %8029 = vmatpush3.bf16.msra.mxu0 %v8028_v35  ;;  %v8088_v35 = vpack.c.bf16 %v424_v30, %v423_v29  ;;  %v445_v29 = vld [vmem:[%s9026_s17 + $0x780] sm:$0xff]  ;;  %v446_v30 = vld [vmem:[%s9026_s17 + $0x788] sm:$0xff] }
 0x10e   : > { %8035 = vmatpush3.bf16.msra.mxu1 %v8034_v36  ;;  %8036 = vmatprep.subr.bf16.mxu0 %v8857_v0  ;;  %v8094_v36 = vpack.c.bf16 %v428_v32, %v427_v31 }
 0x10f   : > { %8042 = vmatprep.subr.bf16.mxu1 %v8857_v0 }
 0x110   : > { %7549 = vmatmul.mubr.msk.f32.vlgmr.msra.gmra.mrb[44].mxu0 %vm468_vm1, %v9487_v34 }
 0x111   : > { %7560 = vmatmul.mubr.msk.f32.vlgmr.msra.gmra.mrb[44].mxu1 %vm468_vm1, %v9487_v34  ;;  %8038 = vmatpush3.bf16.msra.mxu0 %v8037_v41  ;;  %v434_v41 = vld [vmem:[%s9026_s17 + $0x728] sm:$0xff] }
 0x112   : > { %8044 = vmatpush3.bf16.msra.mxu1 %v8043_v42  ;;  %8039 = vmatprep.subr.bf16.mxu0 %v8857_v0  ;;  %v8103_v49 = vpack.c.bf16 %v434_v41, %v433_v40 }
 0x113   : > { %8045 = vmatprep.subr.bf16.mxu1 %v8857_v0  ;;  %7570 = vmatprep.mubr.msk.f32.mxu0 %vm8858_vm0, %v8859_v1 }
 0x114   : > { %7581 = vmatprep.mubr.msk.f32.mxu1 %vm8858_vm0, %v8859_v1 }
 0x115   : > { %8041 = vmatpush3.bf16.msra.mxu0 %v8040_v47  ;;  %v8097_v47 = vpack.c.bf16 %v430_v38, %v429_v37  ;;  %v450_v37 = vld [vmem:[%s9026_s17 + $0x7a8] sm:$0xff] }
 0x116   : > { %8047 = vmatpush3.bf16.msra.mxu1 %v8046_v48  ;;  %8048 = vmatprep.subr.bf16.mxu0 %v8857_v0 }
 0x117   : > { %8054 = vmatprep.subr.bf16.mxu1 %v8857_v0 }
 0x118   : > { %7571 = vmatmul.mubr.msk.f32.vlgmr.msra.gmra.mrb[46].mxu0 %vm468_vm1, %v9487_v34 }
 0x119   : > { %7582 = vmatmul.mubr.msk.f32.vlgmr.msra.gmra.mrb[46].mxu1 %vm468_vm1, %v9487_v34  ;;  %8050 = vmatpush3.bf16.msra.mxu0 %v8049_v53  ;;  %v435_v53 = vld [vmem:[%s9026_s17 + $0x730] sm:$0xff] }
 0x11a   : > { %8056 = vmatpush3.bf16.msra.mxu1 %v8055_v54  ;;  %8051 = vmatprep.subr.bf16.mxu0 %v8857_v0  ;;  %v436_v54 = vld [vmem:[%s9026_s17 + $0x738] sm:$0xff] }
 0x11b   : > { %8057 = vmatprep.subr.bf16.mxu1 %v8857_v0  ;;  %7592 = vmatprep.mubr.msk.f32.mxu0 %vm8858_vm0, %v8859_v1 }
 0x11c   : > { %7603 = vmatprep.mubr.msk.f32.mxu1 %vm8858_vm0, %v8859_v1 }
 0x11d   : > { %8053 = vmatpush3.bf16.msra.mxu0 %v8052_v59  ;;  %v8106_v59 = vpack.c.bf16 %v436_v54, %v435_v53 }
 0x11e   : > { %8059 = vmatpush3.bf16.msra.mxu1 %v8058_v60  ;;  %8060 = vmatprep.subr.bf16.mxu0 %v8857_v0  ;;  %v437_v60 = vld [vmem:[%s9026_s17 + $0x740] sm:$0xff] }
 0x11f   : > { %8066 = vmatprep.subr.bf16.mxu1 %v8857_v0  ;;  %v8109_v11 = vpack.c.bf16 %v438_v61, %v437_v60 }
 0x120   : > { %7593 = vmatmul.mubr.msk.f32.vlgmr.msra.gmra.mrb[48].mxu0 %vm468_vm1, %v9487_v34 }
 0x121   : > { %7604 = vmatmul.mubr.msk.f32.vlgmr.msra.gmra.mrb[48].mxu1 %vm468_vm1, %v9487_v34  ;;  %8062 = vmatpush3.bf16.msra.mxu0 %v8061_v3  ;;  %v442_v3 = vld [vmem:[%s9026_s17 + $0x768] sm:$0xff] }
 0x122   : > { %8068 = vmatpush3.bf16.msra.mxu1 %v8067_v4  ;;  %8063 = vmatprep.subr.bf16.mxu0 %v8857_v0  ;;  %v8115_v14 = vpack.c.bf16 %v442_v3, %v441_v2  ;;  %v453_v3 = vld [vmem:[%s9026_s17 + $0x7c0] sm:$0xff] }
 0x123   : > { %8069 = vmatprep.subr.bf16.mxu1 %v8857_v0  ;;  %7614 = vmatprep.mubr.msk.f32.mxu0 %vm8858_vm0, %v8859_v1 }
 0x124   : > { %7625 = vmatprep.mubr.msk.f32.mxu1 %vm8858_vm0, %v8859_v1 }
 0x125   : > { %8065 = vmatpush3.bf16.msra.mxu0 %v8064_v9 }
 0x126   : > { %8071 = vmatpush3.bf16.msra.mxu1 %v8070_v10  ;;  %8072 = vmatprep.subr.bf16.mxu0 %v8857_v0 }
 0x127   : > { %8078 = vmatprep.subr.bf16.mxu1 %v8857_v0 }
 0x128   : > { %7615 = vmatmul.mubr.msk.f32.vlgmr.msra.gmra.mrb[50].mxu0 %vm468_vm1, %v9487_v34 }
 0x129   : > { %7626 = vmatmul.mubr.msk.f32.vlgmr.msra.gmra.mrb[50].mxu1 %vm468_vm1, %v9487_v34  ;;  %8074 = vmatpush3.bf16.msra.mxu0 %v8073_v15  ;;  %v439_v15 = vld [vmem:[%s9026_s17 + $0x750] sm:$0xff] }
 0x12a   : > { %8080 = vmatpush3.bf16.msra.mxu1 %v8079_v16  ;;  %8075 = vmatprep.subr.bf16.mxu0 %v8857_v0  ;;  %v440_v16 = vld [vmem:[%s9026_s17 + $0x758] sm:$0xff] }
 0x12b   : > { %8081 = vmatprep.subr.bf16.mxu1 %v8857_v0  ;;  %7636 = vmatprep.mubr.msk.f32.mxu0 %vm8858_vm0, %v8859_v1  ;;  %v8112_v26 = vpack.c.bf16 %v440_v16, %v439_v15 }
 0x12c   : > { %7647 = vmatprep.mubr.msk.f32.mxu1 %vm8858_vm0, %v8859_v1 }
 0x12d   : > { %8077 = vmatpush3.bf16.msra.mxu0 %v8076_v22 }
 0x12e   : > { %8083 = vmatpush3.bf16.msra.mxu1 %v8082_v23  ;;  %8084 = vmatprep.subr.bf16.mxu0 %v8857_v0 }
 0x12f   : > { %8090 = vmatprep.subr.bf16.mxu1 %v8857_v0 }
 0x130   : > { %7637 = vmatmul.mubr.msk.f32.vlgmr.msra.gmra.mrb[52].mxu0 %vm468_vm1, %v9487_v34 }
 0x131   : > { %7648 = vmatmul.mubr.msk.f32.vlgmr.msra.gmra.mrb[52].mxu1 %vm468_vm1, %v9487_v34  ;;  %8086 = vmatpush3.bf16.msra.mxu0 %v8085_v28 }
 0x132   : > { %8092 = vmatpush3.bf16.msra.mxu1 %v8091_v19  ;;  %8087 = vmatprep.subr.bf16.mxu0 %v8857_v0  ;;  %v8118_v19 = vpack.c.bf16 %v444_v21, %v443_v20 }
 0x133   : > { %v538_v39 = vpop.f32.mrb[0].mxu0  ;;  %8093 = vmatprep.subr.bf16.mxu1 %v8857_v0  ;;  %7658 = vmatprep.mubr.msk.f32.mxu0 %vm8858_vm0, %v8859_v1 }
 0x134   : > { %v9604_v42 = vadd.f32 %v538_v39, %v9593_v33  ;;  %v608_v43 = vpop.f32.mrb[0].mxu1  ;;  %v7066_v44 = vpop.f32.mrb[1].mxu0  ;;  %7669 = vmatprep.mubr.msk.f32.mxu1 %vm8858_vm0, %v8859_v1 }
 0x135   : > { %v9609_v45 = vadd.f32 %v608_v43, %v9593_v33  ;;  %v7077_v46 = vpop.f32.mrb[1].mxu1  ;;  %8089 = vmatpush3.bf16.msra.mxu0 %v8088_v35 }
 0x136   : > { %v4952_v48 = vrot.slane %v9604_v42, 4  ;;  %8095 = vmatpush3.bf16.msra.mxu1 %v8094_v36  ;;  %8096 = vmatprep.subr.bf16.mxu0 %v8857_v0  ;;  %v449_v36 = vld [vmem:[%s9026_s17 + $0x7a0] sm:$0xff] }
 0x137   : > { %v4958_v52 = vrot.slane %v9609_v45, 4  ;;  %8102 = vmatprep.subr.bf16.mxu1 %v8857_v0  ;;  %v8127_v50 = vpack.c.bf16 %v450_v37, %v449_v36 }
 0x138   : > { %v4953_v55 = vmax.f32 %v9604_v42, %v4952_v48  ;;  %7659 = vmatmul.mubr.msk.f32.vlgmr.msra.gmra.mrb[54].mxu0 %vm468_vm1, %v9487_v34 }
 0x139   : > { %v4959_v56 = vmax.f32 %v9609_v45, %v4958_v52  ;;  %7670 = vmatmul.mubr.msk.f32.vlgmr.msra.gmra.mrb[54].mxu1 %vm468_vm1, %v9487_v34  ;;  %8098 = vmatpush3.bf16.msra.mxu0 %v8097_v47  ;;  %v8121_v47 = vpack.c.bf16 %v446_v30, %v445_v29  ;;  %v448_v52 = vld [vmem:[%s9026_s17 + $0x798] sm:$0xff] }
 0x13a   : > { %v4954_v58 = vrot.slane %v4953_v55, 2  ;;  %8104 = vmatpush3.bf16.msra.mxu1 %v8103_v49  ;;  %8099 = vmatprep.subr.bf16.mxu0 %v8857_v0  ;;  %v8124_v61 = vpack.c.bf16 %v448_v52, %v447_v51 }
 0x13b   : > { %v4960_v62 = vrot.slane %v4959_v56, 2  ;;  %v678_v63 = vpop.f32.mrb[2].mxu0  ;;  %8105 = vmatprep.subr.bf16.mxu1 %v8857_v0  ;;  %7680 = vmatprep.mubr.msk.f32.mxu0 %vm8858_vm0, %v8859_v1 }
 0x13c   : > { %v4955_v4 = vmax.f32 %v4953_v55, %v4954_v58  ;;  %v9634_v5 = vadd.f32 %v678_v63, %v9593_v33  ;;  %v748_v6 = vpop.f32.mrb[2].mxu1  ;;  %v7088_v7 = vpop.f32.mrb[3].mxu0  ;;  %7691 = vmatprep.mubr.msk.f32.mxu1 %vm8858_vm0, %v8859_v1  ;;  %v451_v55 = vld [vmem:[%s9026_s17 + $0x7b0] sm:$0xff] }
 0x13d   : > { %v4961_v8 = vmax.f32 %v4959_v56, %v4960_v62  ;;  %v9639_v9 = vadd.f32 %v748_v6, %v9593_v33  ;;  %v7099_v10 = vpop.f32.mrb[3].mxu1  ;;  %8101 = vmatpush3.bf16.msra.mxu0 %v8100_v57  ;;  %v452_v56 = vld [vmem:[%s9026_s17 + $0x7b8] sm:$0xff] }
 0x13e   : > { %v4956_v12 = vrot.slane %v4955_v4, 1  ;;  %v4964_v13 = vrot.slane %v9634_v5, 4  ;;  %8107 = vmatpush3.bf16.msra.mxu1 %v8106_v59  ;;  %8108 = vmatprep.subr.bf16.mxu0 %v8857_v0  ;;  %v8130_v2 = vpack.c.bf16 %v452_v56, %v451_v55  ;;  %v457_v10 = vld [vmem:[%s9026_s17 + $0x7e0] sm:$0xff] }
 0x13f   : > { %v4962_v17 = vrot.slane %v4961_v8, 1  ;;  %v4970_v18 = vrot.slane %v9639_v9, 4  ;;  %8114 = vmatprep.subr.bf16.mxu1 %v8857_v0 }
 0x140   : > { %v4957_v22 = vmax.f32 %v4955_v4, %v4956_v12  ;;  %v4965_v23 = vmax.f32 %v9634_v5, %v4964_v13  ;;  %7681 = vmatmul.mubr.msk.f32.vlgmr.msra.gmra.mrb[56].mxu0 %vm468_vm1, %v9487_v34  ;;  %v454_v4 = vld [vmem:[%s9026_s17 + $0x7c8] sm:$0xff] }
 0x141   : > { %v4963_v24 = vmax.f32 %v4961_v8, %v4962_v17  ;;  %v4971_v25 = vmax.f32 %v9639_v9, %v4970_v18  ;;  %7692 = vmatmul.mubr.msk.f32.vlgmr.msra.gmra.mrb[56].mxu1 %vm468_vm1, %v9487_v34  ;;  %8110 = vmatpush3.bf16.msra.mxu0 %v8109_v11  ;;  %v458_v11 = vld [vmem:[%s9026_s17 + $0x7e8] sm:$0xff]  ;;  %v8133_v20 = vpack.c.bf16 %v454_v4, %v453_v3 }
 0x142   : > { %v5336_v27 = vsub.f32 %v9604_v42, %v4957_v22  ;;  %v4966_v28 = vrot.slane %v4965_v23, 2  ;;  %8116 = vmatpush3.bf16.msra.mxu1 %v8115_v14  ;;  %8111 = vmatprep.subr.bf16.mxu0 %v8857_v0 }
 0x143   : > { %v5337_v31 = vsub.f32 %v9609_v45, %v4963_v24  ;;  %v4972_v32 = vrot.slane %v4971_v25, 2  ;;  %v818_v35 = vpop.f32.mrb[4].mxu0  ;;  %8117 = vmatprep.subr.bf16.mxu1 %v8857_v0  ;;  %7702 = vmatprep.mubr.msk.f32.mxu0 %vm8858_vm0, %v8859_v1  ;;  %v455_v24 = vld [vmem:[%s9026_s17 + $0x7d0] sm:$0xff] }
 0x144   : > { %v5400_v38 = vmul.f32 1.442695, %v5336_v27  ;;  %v4967_v39 = vmax.f32 %v4965_v23, %v4966_v28  ;;  %v9666_v40 = vadd.f32 %v818_v35, %v9593_v33  ;;  %v888_v41 = vpop.f32.mrb[4].mxu1  ;;  %v7110_v42 = vpop.f32.mrb[5].mxu0  ;;  %7713 = vmatprep.mubr.msk.f32.mxu1 %vm8858_vm0, %v8859_v1  ;;  %v8139_v23 = vpack.c.bf16 %v458_v11, %v457_v10  ;;  %v459_v28 = vld [vmem:[%s9026_s17 + $0x7f0] sm:$0xff] }
 0x145   : > { %v5402_v43 = vmul.f32 1.442695, %v5337_v31  ;;  %v4973_v44 = vmax.f32 %v4971_v25, %v4972_v32  ;;  %v9671_v45 = vadd.f32 %v888_v41, %v9593_v33  ;;  %v7121_v46 = vpop.f32.mrb[5].mxu1  ;;  %8113 = vmatpush3.bf16.msra.mxu0 %v8112_v26  ;;  %v456_v25 = vld [vmem:[%s9026_s17 + $0x7d8] sm:$0xff] }
 0x146   : > { %8210 = vpow2.f32 %v5400_v38  ;;  %v4968_v48 = vrot.slane %v4967_v39, 1  ;;  %v4976_v49 = vrot.slane %v9666_v40, 4  ;;  %8119 = vmatpush3.bf16.msra.mxu1 %v8118_v19  ;;  %8120 = vmatprep.subr.bf16.mxu0 %v8857_v0  ;;  %v460_v19 = vld [vmem:[%s9026_s17 + $0x7f8] sm:$0xff]  ;;  %v8136_v38 = vpack.c.bf16 %v456_v25, %v455_v24 }
 0x147   : > { %8212 = vpow2.f32 %v5402_v43  ;;  %v4974_v53 = vrot.slane %v4973_v44, 1  ;;  %v4982_v54 = vrot.slane %v9671_v45, 4  ;;  %8126 = vmatprep.subr.bf16.mxu1 %v8857_v0  ;;  %v8142_v43 = vpack.c.bf16 %v460_v19, %v459_v28 }
 0x148   : > { %v4969_v57 = vmax.f32 %v4967_v39, %v4968_v48  ;;  %v4977_v58 = vmax.f32 %v9666_v40, %v4976_v49  ;;  %7703 = vmatmul.mubr.msk.f32.vlgmr.msra.gmra.mrb[58].mxu0 %vm468_vm1, %v9487_v34 }
 0x149   : > { %v4975_v59 = vmax.f32 %v4973_v44, %v4974_v53  ;;  %v4983_v60 = vmax.f32 %v9671_v45, %v4982_v54  ;;  %7714 = vmatmul.mubr.msk.f32.vlgmr.msra.gmra.mrb[58].mxu1 %vm468_vm1, %v9487_v34  ;;  %8122 = vmatpush3.bf16.msra.mxu0 %v8121_v47 }
 0x14a   : > { %v5338_v62 = vsub.f32 %v9634_v5, %v4969_v57  ;;  %v4978_v63 = vrot.slane %v4977_v58, 2  ;;  %8128 = vmatpush3.bf16.msra.mxu1 %v8127_v50  ;;  %8123 = vmatprep.subr.bf16.mxu0 %v8857_v0 }
 0x14b   : > { %v5339_v6 = vsub.f32 %v9639_v9, %v4975_v59  ;;  %v4984_v7 = vrot.slane %v4983_v60, 2  ;;  %v958_v8 = vpop.f32.mrb[6].mxu0  ;;  %8129 = vmatprep.subr.bf16.mxu1 %v8857_v0  ;;  %7724 = vmatprep.mubr.msk.f32.mxu0 %vm8858_vm0, %v8859_v1 }
 0x14c   : > { %v5404_v12 = vmul.f32 1.442695, %v5338_v62  ;;  %v4979_v5 = vmax.f32 %v4977_v58, %v4978_v63  ;;  %v9698_v13 = vadd.f32 %v958_v8, %v9593_v33  ;;  %v1028_v14 = vpop.f32.mrb[6].mxu1  ;;  %v7132_v15 = vpop.f32.mrb[7].mxu0  ;;  %7735 = vmatprep.mubr.msk.f32.mxu1 %vm8858_vm0, %v8859_v1 }
 0x14d   : > { %v5406_v9 = vmul.f32 1.442695, %v5339_v6  ;;  %v4985_v16 = vmax.f32 %v4983_v60, %v4984_v7  ;;  %v9703_v17 = vadd.f32 %v1028_v14, %v9593_v33  ;;  %v7143_v18 = vpop.f32.mrb[7].mxu1  ;;  %8125 = vmatpush3.bf16.msra.mxu0 %v8124_v61 }
 0x14e   : > { %8214 = vpow2.f32 %v5404_v12  ;;  %v4980_v21 = vrot.slane %v4979_v5, 1  ;;  %v4988_v22 = vrot.slane %v9698_v13, 4  ;;  %8131 = vmatpush3.bf16.msra.mxu1 %v8130_v2  ;;  %8132 = vmatprep.subr.bf16.mxu0 %v8857_v0 }
 0x14f   : > { %8216 = vpow2.f32 %v5406_v9  ;;  %v4986_v26 = vrot.slane %v4985_v16, 1  ;;  %v4994_v27 = vrot.slane %v9703_v17, 4  ;;  %8138 = vmatprep.subr.bf16.mxu1 %v8857_v0 }
 0x150   : > { %v9713_v29 = vpop.eup %8210  ;;  %v4981_v30 = vmax.f32 %v4979_v5, %v4980_v21  ;;  %v4989_v31 = vmax.f32 %v9698_v13, %v4988_v22  ;;  %7725 = vmatmul.mubr.msk.f32.vlgmr.msra.gmra.mrb[60].mxu0 %vm468_vm1, %v9487_v34 }
 0x151   : > { %v9718_v32 = vpop.eup %8212  ;;  %v5528_v35 = vrot.slane %v9713_v29, 4  ;;  %v4987_v36 = vmax.f32 %v4985_v16, %v4986_v26  ;;  %v4995_v37 = vmax.f32 %v9703_v17, %v4994_v27  ;;  %7736 = vmatmul.mubr.msk.f32.vlgmr.msra.gmra.mrb[60].mxu1 %vm468_vm1, %v9487_v34  ;;  %8134 = vmatpush3.bf16.msra.mxu0 %v8133_v20 }
 0x152   : > { %v5534_v39 = vrot.slane %v9718_v32, 4  ;;  %v5340_v41 = vsub.f32 %v9666_v40, %v4981_v30  ;;  %v4990_v42 = vrot.slane %v4989_v31, 2  ;;  %8140 = vmatpush3.bf16.msra.mxu1 %v8139_v23  ;;  %8135 = vmatprep.subr.bf16.mxu0 %v8857_v0 }
 0x153   : > { %v5529_v44 = vadd.f32 %v9713_v29, %v5528_v35  ;;  %v5341_v46 = vsub.f32 %v9671_v45, %v4987_v36  ;;  %v4996_v47 = vrot.slane %v4995_v37, 2  ;;  %v1098_v48 = vpop.f32.mrb[8].mxu0  ;;  %8141 = vmatprep.subr.bf16.mxu1 %v8857_v0  ;;  %7746 = vmatprep.mubr.msk.f32.mxu0 %vm8858_vm0, %v8859_v1 }
 0x154   : > { %v5535_v49 = vadd.f32 %v9718_v32, %v5534_v39  ;;  %v5408_v50 = vmul.f32 1.442695, %v5340_v41  ;;  %v4991_v40 = vmax.f32 %v4989_v31, %v4990_v42  ;;  %v9734_v51 = vadd.f32 %v1098_v48, %v9593_v33  ;;  %v1168_v52 = vpop.f32.mrb[8].mxu1  ;;  %v7154_v53 = vpop.f32.mrb[9].mxu0  ;;  %7757 = vmatprep.mubr.msk.f32.mxu1 %vm8858_vm0, %v8859_v1 }
 0x155   : > { %v5530_v45 = vrot.slane %v5529_v44, 2  ;;  %v5410_v54 = vmul.f32 1.442695, %v5341_v46  ;;  %v4997_v55 = vmax.f32 %v4995_v37, %v4996_v47  ;;  %v9739_v0 = vadd.f32 %v1168_v52, %v9593_v33  ;;  %v7165_v56 = vpop.f32.mrb[9].mxu1  ;;  %8137 = vmatpush3.bf16.msra.mxu0 %v8136_v38 }
 0x156   : > { %v5536_v57 = vrot.slane %v5535_v49, 2  ;;  %8218 = vpow2.f32 %v5408_v50  ;;  %v4992_v58 = vrot.slane %v4991_v40, 1  ;;  %v5000_v59 = vrot.slane %v9734_v51, 4  ;;  %8143 = vmatpush3.bf16.msra.mxu1 %v8142_v43 }
 0x157   : > { %v5531_v60 = vadd.f32 %v5530_v45, %v5529_v44  ;;  %8220 = vpow2.f32 %v5410_v54  ;;  %v4998_v61 = vrot.slane %v4997_v55, 1  ;;  %v5006_v62 = vrot.slane %v9739_v0, 4 }
 0x158   : > { %v9743_v1 = vpop.eup %8214  ;;  %v5537_v63 = vadd.f32 %v5536_v57, %v5535_v49  ;;  %v4993_v2 = vmax.f32 %v4991_v40, %v4992_v58  ;;  %v5001_v3 = vmax.f32 %v9734_v51, %v5000_v59  ;;  %7747 = vmatmul.mubr.msk.f32.vlgmr.msra.gmra.mrb[62].mxu0 %vm468_vm1, %v9487_v34 }
 0x159   : > { %v9748_v4 = vpop.eup %8216  ;;  %v5532_v6 = vrot.slane %v5531_v60, 1  ;;  %v5540_v7 = vrot.slane %v9743_v1, 4  ;;  %v4999_v8 = vmax.f32 %v4997_v55, %v4998_v61  ;;  %v5007_v10 = vmax.f32 %v9739_v0, %v5006_v62  ;;  %7758 = vmatmul.mubr.msk.f32.vlgmr.msra.gmra.mrb[62].mxu1 %vm468_vm1, %v9487_v34 }
 0x15a   : > { %v5538_v11 = vrot.slane %v5537_v63, 1  ;;  %v5546_v12 = vrot.slane %v9748_v4, 4  ;;  %v5342_v5 = vsub.f32 %v9698_v13, %v4993_v2  ;;  %v5002_v14 = vrot.slane %v5001_v3, 2 }
 0x15b   : > { %v5533_v15 = vadd.f32 %v5532_v6, %v5531_v60  ;;  %v5541_v9 = vadd.f32 %v9743_v1, %v5540_v7  ;;  %v5343_v16 = vsub.f32 %v9703_v17, %v4999_v8  ;;  %v5008_v18 = vrot.slane %v5007_v10, 2  ;;  %v1238_v20 = vpop.f32.mrb[10].mxu0 }
 0x15c   : > { %v5539_v21 = vadd.f32 %v5538_v11, %v5537_v63  ;;  %v5547_v22 = vadd.f32 %v9748_v4, %v5546_v12  ;;  %v5412_v23 = vmul.f32 1.442695, %v5342_v5  ;;  %v5003_v24 = vmax.f32 %v5001_v3, %v5002_v14  ;;  %v1308_v25 = vpop.f32.mrb[10].mxu1  ;;  %v7176_v34 = vpop.f32.mrb[11].mxu0 }
 0x15d   : > { %8222 = vrcp.f32 %v5533_v15  ;;  %v5542_v26 = vrot.slane %v5541_v9, 2  ;;  %v5414_v27 = vmul.f32 1.442695, %v5343_v16  ;;  %v5009_v28 = vmax.f32 %v5007_v10, %v5008_v18  ;;  %v7187_v13 = vpop.f32.mrb[11].mxu1  ;;  %v8469_v34 = vld [vmem:[%s9026_s17 + $0x10] sm:$0xff] }
 0x15e   : > { %8224 = vrcp.f32 %v5539_v21  ;;  %v5548_v19 = vrot.slane %v5547_v22, 2  ;;  %v5004_v30 = vrot.slane %v5003_v24, 1  ;;  %v9760_v31 = vadd.f32 %v1238_v20, %v9593_v33  ;;  %v8471_v13 = vld [vmem:[%s9026_s17 + $0x20] sm:$0xff] }
 0x15f   : > { %v5543_v17 = vadd.f32 %v5542_v26, %v5541_v9  ;;  %8226 = vpow2.f32 %v5412_v23  ;;  %v5010_v35 = vrot.slane %v5009_v28, 1  ;;  %v9763_v36 = vadd.f32 %v1308_v25, %v9593_v33  ;;  %v8467_v23 = vld [vmem:[%s9026_s17] sm:$0xff] }
 0x160   : > { %v9765_v37 = vpop.eup %8218  ;;  %v5549_v38 = vadd.f32 %v5548_v19, %v5547_v22  ;;  %8228 = vpow2.f32 %v5414_v27  ;;  %v5005_v39 = vmax.f32 %v5003_v24, %v5004_v30  ;;  %v5012_v41 = vrot.slane %v9760_v31, 4  ;;  %v8468_v24 = vld [vmem:[%s9026_s17 + $0x8] sm:$0xff]  ;;  %v8470_v27 = vld [vmem:[%s9026_s17 + $0x18] sm:$0xff] }
 0x161   : > { %v9768_v42 = vpop.eup %8220  ;;  %v5544_v43 = vrot.slane %v5543_v17, 1  ;;  %v5552_v44 = vrot.slane %v9765_v37, 4  ;;  %v5011_v46 = vmax.f32 %v5009_v28, %v5010_v35  ;;  %v5018_v47 = vrot.slane %v9763_v36, 4 }
 0x162   : > { %v5550_v48 = vrot.slane %v5549_v38, 1  ;;  %v5558_v49 = vrot.slane %v9768_v42, 4  ;;  %v5344_v50 = vsub.f32 %v9734_v51, %v5005_v39  ;;  %v5013_v40 = vmax.f32 %v9760_v31, %v5012_v41 }
 0x163   : > { %v5545_v52 = vadd.f32 %v5544_v43, %v5543_v17  ;;  %v5553_v53 = vadd.f32 %v9765_v37, %v5552_v44  ;;  %v5345_v45 = vsub.f32 %v9739_v0, %v5011_v46  ;;  %v5019_v54 = vmax.f32 %v9763_v36, %v5018_v47  ;;  %v1378_v55 = vpop.f32.mrb[12].mxu0  ;;  %v8473_v17 = vld [vmem:[%s9026_s17 + $0x30] sm:$0xff] }
 0x164   : > { %v5551_v56 = vadd.f32 %v5550_v48, %v5549_v38  ;;  %v5559_v57 = vadd.f32 %v9768_v42, %v5558_v49  ;;  %v5416_v58 = vmul.f32 1.442695, %v5344_v50  ;;  %v5014_v59 = vrot.slane %v5013_v40, 2  ;;  %v1448_v60 = vpop.f32.mrb[12].mxu1  ;;  %v7198_v61 = vpop.f32.mrb[13].mxu0  ;;  %v8474_v38 = vld [vmem:[%s9026_s17 + $0x38] sm:$0xff] }
 0x165   : > { %8230 = vrcp.f32 %v5545_v52  ;;  %v5554_v62 = vrot.slane %v5553_v53, 2  ;;  %v5418_v51 = vmul.f32 1.442695, %v5345_v45  ;;  %v5020_v63 = vrot.slane %v5019_v54, 2  ;;  %v7209_v2 = vpop.f32.mrb[13].mxu1 }
 0x166   : > { %8232 = vrcp.f32 %v5551_v56  ;;  %v5560_v3 = vrot.slane %v5559_v57, 2  ;;  %v5015_v6 = vmax.f32 %v5013_v40, %v5014_v59  ;;  %v9780_v0 = vadd.f32 %v1378_v55, %v9593_v33 }
 0x167   : > { %v8223_v7 = vpop.eup %8222  ;;  %v5555_v8 = vadd.f32 %v5554_v62, %v5553_v53  ;;  %8234 = vpow2.f32 %v5416_v58  ;;  %v5021_v10 = vmax.f32 %v5019_v54, %v5020_v63  ;;  %v9783_v11 = vadd.f32 %v1448_v60, %v9593_v33 }
 0x168   : > { %v8225_v12 = vpop.eup %8224  ;;  %v5976_v5 = vmul.f32 %v8223_v7, %v9713_v29  ;;  %v5561_v14 = vadd.f32 %v5560_v3, %v5559_v57  ;;  %8236 = vpow2.f32 %v5418_v51  ;;  %v5016_v15 = vrot.slane %v5015_v6, 1 }
 0x169   : > { %v9786_v9 = vpop.eup %8226  ;;  %v5977_v16 = vmul.f32 %v8225_v12, %v9718_v32  ;;  %v5556_v18 = vrot.slane %v5555_v8, 1  ;;  %v5022_v20 = vrot.slane %v5021_v10, 1  ;;  %v5024_v21 = vrot.slane %v9780_v0, 4  ;;  %v8472_v32 = vld [vmem:[%s9026_s17 + $0x28] sm:$0xff] }
 0x16a   : > { %v9790_v22 = vpop.eup %8228  ;;  %v6040_v29 = vmul.f32 %v8467_v23, %v5976_v5  ;;  %v6041_v25 = vmul.f32 %v8468_v24, %v5976_v5  ;;  %v6042_v26 = vmul.f32 %v8469_v34, %v5976_v5  ;;  %v6043_v28 = vmul.f32 %v8470_v27, %v5976_v5 }
 0x16b   : > { %v6044_v19 = vmul.f32 %v8471_v13, %v5977_v16  ;;  %v6045_v30 = vmul.f32 %v8472_v32, %v5977_v16  ;;  %v6046_v35 = vmul.f32 %v8473_v17, %v5977_v16  ;;  %v6047_v39 = vmul.f32 %v8474_v38, %v5977_v16  ;;  %v9800_v41 = vpop.f32.mrb[14].mxu0  ;;  %v8478_v16 = vld [vmem:[%s9026_s17 + $0x58] sm:$0xff] }
 0x16c   : > { %6296 = vst [vmem:[%s9804_s4] sm:$0xff] %v6040_v29  ;;  %6297 = vst [vmem:[%s9804_s4 + $0x8] sm:$0xff] %v6041_v25  ;;  %v5557_v43 = vadd.f32 %v5556_v18, %v5555_v8  ;;  %v5562_v44 = vrot.slane %v5561_v14, 1  ;;  %v5564_v46 = vrot.slane %v9786_v9, 4  ;;  %v5570_v47 = vrot.slane %v9790_v22, 4  ;;  %v9812_v48 = vpop.f32.mrb[14].mxu1  ;;  %v7220_v49 = vpop.f32.mrb[15].mxu0 }
 0x16d   : > { %6298 = vst [vmem:[%s9804_s4 + $0x10] sm:$0xff] %v6042_v26  ;;  %6299 = vst [vmem:[%s9804_s4 + $0x18] sm:$0xff] %v6043_v28  ;;  %v5017_v50 = vmax.f32 %v5015_v6, %v5016_v15  ;;  %v5023_v40 = vmax.f32 %v5021_v10, %v5022_v20  ;;  %v5025_v52 = vmax.f32 %v9780_v0, %v5024_v21  ;;  %v5030_v53 = vrot.slane %v9783_v11, 4  ;;  %v7231_v45 = vpop.f32.mrb[15].mxu1  ;;  %v8475_v10 = vld [vmem:[%s9026_s17 + $0x40] sm:$0xff]  ;;  %v8480_v21 = vld [vmem:[%s9026_s17 + $0x68] sm:$0xff] }
 0x16e   : > { %6300 = vst [vmem:[%s9804_s4 + $0x20] sm:$0xff] %v6044_v19  ;;  %6301 = vst [vmem:[%s9804_s4 + $0x28] sm:$0xff] %v6045_v30  ;;  %8238 = vrcp.f32 %v5557_v43  ;;  %v5563_v54 = vadd.f32 %v5562_v44, %v5561_v14  ;;  %v5565_v55 = vadd.f32 %v9786_v9, %v5564_v46  ;;  %v5571_v56 = vadd.f32 %v9790_v22, %v5570_v47  ;;  %v8477_v14 = vld [vmem:[%s9026_s17 + $0x50] sm:$0xff]  ;;  %v8482_v25 = vld [vmem:[%s9026_s17 + $0x78] sm:$0xff] }
 0x16f   : > { %6302 = vst [vmem:[%s9804_s4 + $0x30] sm:$0xff] %v6046_v35  ;;  %6303 = vst [vmem:[%s9804_s4 + $0x38] sm:$0xff] %v6047_v39  ;;  %v8231_v57 = vpop.eup %8230  ;;  %v5346_v58 = vsub.f32 %v9760_v31, %v5017_v50  ;;  %v5347_v59 = vsub.f32 %v9763_v36, %v5023_v40  ;;  %v5026_v60 = vrot.slane %v5025_v52, 2  ;;  %v5031_v61 = vmax.f32 %v9783_v11, %v5030_v53  ;;  %v8481_v29 = vld [vmem:[%s9026_s17 + $0x70] sm:$0xff] }
 0x170   : > { %v8233_v62 = vpop.eup %8232  ;;  %v5978_v51 = vmul.f32 %v8231_v57, %v9743_v1  ;;  %8240 = vrcp.f32 %v5563_v54  ;;  %v5566_v63 = vrot.slane %v5565_v55, 2  ;;  %v5572_v2 = vrot.slane %v5571_v56, 2  ;;  %v8476_v1 = vld [vmem:[%s9026_s17 + $0x48] sm:$0xff] }
 0x171   : > { %v9826_v3 = vpop.eup %8234  ;;  %v5979_v31 = vmul.f32 %v8233_v62, %v9748_v4  ;;  %v5420_v6 = vmul.f32 1.442695, %v5346_v58  ;;  %v5422_v36 = vmul.f32 1.442695, %v5347_v59  ;;  %v5027_v7 = vmax.f32 %v5025_v52, %v5026_v60  ;;  %v8479_v4 = vld [vmem:[%s9026_s17 + $0x60] sm:$0xff] }
 0x172   : > { %v9829_v8 = vpop.eup %8236  ;;  %v6048_v12 = vmul.f32 %v8475_v10, %v5978_v51  ;;  %v6049_v5 = vmul.f32 %v8476_v1, %v5978_v51  ;;  %v6050_v15 = vmul.f32 %v8477_v14, %v5978_v51  ;;  %v6051_v18 = vmul.f32 %v8478_v16, %v5978_v51  ;;  %v8483_v51 = vld [vmem:[%s9026_s17 + $0x80] sm:$0xff] }
 0x173   : > { %v6052_v20 = vmul.f32 %v8479_v4, %v5979_v31  ;;  %v6053_v23 = vmul.f32 %v8480_v21, %v5979_v31  ;;  %v6054_v24 = vmul.f32 %v8481_v29, %v5979_v31  ;;  %v6055_v34 = vmul.f32 %v8482_v25, %v5979_v31  ;;  %v9839_v26 = vpop.f32.mrb[16].mxu0  ;;  %v8487_v4 = vld [vmem:[%s9026_s17 + $0xa0] sm:$0xff]  ;;  %v8488_v21 = vld [vmem:[%s9026_s17 + $0xa8] sm:$0xff]  ;;  %v8489_v29 = vld [vmem:[%s9026_s17 + $0xb0] sm:$0xff] }
 0x174   : > { %6304 = vst [vmem:[%s9804_s4 + $0x40] sm:$0xff] %v6048_v12  ;;  %6305 = vst [vmem:[%s9804_s4 + $0x48] sm:$0xff] %v6049_v5  ;;  %v5567_v27 = vadd.f32 %v5566_v63, %v5565_v55  ;;  %v5573_v28 = vadd.f32 %v5572_v2, %v5571_v56  ;;  %v5576_v13 = vrot.slane %v9826_v3, 4  ;;  %v5582_v19 = vrot.slane %v9829_v8, 4  ;;  %v9847_v32 = vpop.f32.mrb[16].mxu1  ;;  %v7242_v30 = vpop.f32.mrb[17].mxu0 }
 0x175   : > { %6306 = vst [vmem:[%s9804_s4 + $0x50] sm:$0xff] %v6050_v15  ;;  %6307 = vst [vmem:[%s9804_s4 + $0x58] sm:$0xff] %v6051_v18  ;;  %8242 = vpow2.f32 %v5420_v6  ;;  %v5028_v17 = vrot.slane %v5027_v7, 1  ;;  %v5032_v35 = vrot.slane %v5031_v61, 2  ;;  %v9855_v38 = vadd.f32 %v9800_v41, %v9593_v33  ;;  %v7253_v39 = vpop.f32.mrb[17].mxu1  ;;  %v8484_v2 = vld [vmem:[%s9026_s17 + $0x88] sm:$0xff] }
 0x176   : > { %6308 = vst [vmem:[%s9804_s4 + $0x60] sm:$0xff] %v6052_v20  ;;  %6309 = vst [vmem:[%s9804_s4 + $0x68] sm:$0xff] %v6053_v23  ;;  %v5568_v43 = vrot.slane %v5567_v27, 1  ;;  %v5574_v44 = vrot.slane %v5573_v28, 1  ;;  %v5577_v46 = vadd.f32 %v9826_v3, %v5576_v13  ;;  %v5583_v47 = vadd.f32 %v9829_v8, %v5582_v19  ;;  %v8486_v6 = vld [vmem:[%s9026_s17 + $0x98] sm:$0xff] }
 0x177   : > { %6310 = vst [vmem:[%s9804_s4 + $0x70] sm:$0xff] %v6054_v24  ;;  %6311 = vst [vmem:[%s9804_s4 + $0x78] sm:$0xff] %v6055_v34  ;;  %8244 = vpow2.f32 %v5422_v36  ;;  %v5029_v49 = vmax.f32 %v5027_v7, %v5028_v17  ;;  %v5033_v50 = vmax.f32 %v5031_v61, %v5032_v35  ;;  %v5036_v40 = vrot.slane %v9855_v38, 4  ;;  %v8490_v25 = vld [vmem:[%s9026_s17 + $0xb8] sm:$0xff] }
 0x178   : > { %v8239_v52 = vpop.eup %8238  ;;  %v5569_v53 = vadd.f32 %v5568_v43, %v5567_v27  ;;  %v5575_v45 = vadd.f32 %v5574_v44, %v5573_v28  ;;  %v5578_v41 = vrot.slane %v5577_v46, 2  ;;  %v5584_v54 = vrot.slane %v5583_v47, 2 }
 0x179   : > { %v5980_v55 = vmul.f32 %v8239_v52, %v9765_v37  ;;  %v5348_v56 = vsub.f32 %v9780_v0, %v5029_v49  ;;  %v5034_v57 = vrot.slane %v5033_v50, 1  ;;  %v5037_v58 = vmax.f32 %v9855_v38, %v5036_v40  ;;  %v8485_v0 = vld [vmem:[%s9026_s17 + $0x90] sm:$0xff] }
 0x17a   : > { %v8241_v59 = vpop.eup %8240  ;;  %8246 = vrcp.f32 %v5569_v53  ;;  %v5579_v60 = vadd.f32 %v5578_v41, %v5577_v46  ;;  %v5585_v61 = vadd.f32 %v5584_v54, %v5583_v47  ;;  %v9865_v62 = vadd.f32 %v9812_v48, %v9593_v33 }
 0x17b   : > { %v6056_v63 = vmul.f32 %v8483_v51, %v5980_v55  ;;  %v6057_v37 = vmul.f32 %v8484_v2, %v5980_v55  ;;  %v6058_v31 = vmul.f32 %v8485_v0, %v5980_v55  ;;  %v6059_v36 = vmul.f32 %v8486_v6, %v5980_v55  ;;  %v1798_v7 = vpop.f32.mrb[18].mxu0  ;;  %v8491_v6 = vld [vmem:[%s9026_s17 + $0xc0] sm:$0xff] }
 0x17c   : > { %v5981_v10 = vmul.f32 %v8241_v59, %v9768_v42  ;;  %8248 = vrcp.f32 %v5575_v45  ;;  %v5580_v48 = vrot.slane %v5579_v60, 1  ;;  %v5586_v12 = vrot.slane %v5585_v61, 1  ;;  %v9872_v1 = vpop.f32.mrb[18].mxu1  ;;  %v7264_v5 = vpop.f32.mrb[19].mxu0 }
 0x17d   : > { %6312 = vst [vmem:[%s9804_s4 + $0x80] sm:$0xff] %v6056_v63  ;;  %6313 = vst [vmem:[%s9804_s4 + $0x88] sm:$0xff] %v6057_v37  ;;  %v5424_v14 = vmul.f32 1.442695, %v5348_v56  ;;  %v5035_v15 = vmax.f32 %v5033_v50, %v5034_v57  ;;  %v5038_v16 = vrot.slane %v5037_v58, 2  ;;  %v5042_v18 = vrot.slane %v9865_v62, 4 }
 0x17e   : > { %6314 = vst [vmem:[%s9804_s4 + $0x90] sm:$0xff] %v6058_v31  ;;  %6315 = vst [vmem:[%s9804_s4 + $0x98] sm:$0xff] %v6059_v36  ;;  %v7275_v42 = vpop.f32.mrb[19].mxu1  ;;  %v6060_v20 = vmul.f32 %v8487_v4, %v5981_v10  ;;  %v6061_v23 = vmul.f32 %v8488_v21, %v5981_v10  ;;  %v6062_v24 = vmul.f32 %v8489_v29, %v5981_v10  ;;  %v8492_v36 = vld [vmem:[%s9026_s17 + $0xc8] sm:$0xff] }
 0x17f   : > { %v6063_v34 = vmul.f32 %v8490_v25, %v5981_v10  ;;  %v9883_v27 = vpop.eup %8242  ;;  %v5581_v28 = vadd.f32 %v5580_v48, %v5579_v60  ;;  %v5587_v13 = vadd.f32 %v5586_v12, %v5585_v61  ;;  %8250 = vpow2.f32 %v5424_v14  ;;  %v8493_v10 = vld [vmem:[%s9026_s17 + $0xd0] sm:$0xff]  ;;  %v8494_v12 = vld [vmem:[%s9026_s17 + $0xd8] sm:$0xff]  ;;  %v8496_v29 = vld [vmem:[%s9026_s17 + $0xe8] sm:$0xff] }
 0x180   : > { %v5349_v19 = vsub.f32 %v9783_v11, %v5035_v15  ;;  %6316 = vst [vmem:[%s9804_s4 + $0xa0] sm:$0xff] %v6060_v20  ;;  %6317 = vst [vmem:[%s9804_s4 + $0xa8] sm:$0xff] %v6061_v23  ;;  %v5588_v30 = vrot.slane %v9883_v27, 4  ;;  %v5039_v17 = vmax.f32 %v5037_v58, %v5038_v16  ;;  %v5043_v35 = vmax.f32 %v9865_v62, %v5042_v18  ;;  %v8495_v23 = vld [vmem:[%s9026_s17 + $0xe0] sm:$0xff]  ;;  %v8497_v25 = vld [vmem:[%s9026_s17 + $0xf0] sm:$0xff] }
 0x181   : > { %6318 = vst [vmem:[%s9804_s4 + $0xb0] sm:$0xff] %v6062_v24  ;;  %6319 = vst [vmem:[%s9804_s4 + $0xb8] sm:$0xff] %v6063_v34  ;;  %v9894_v39 = vadd.f32 %v9839_v26, %v9593_v33  ;;  %v9896_v43 = vpop.eup %8244  ;;  %8252 = vrcp.f32 %v5581_v28  ;;  %v9900_v11 = vadd.f32 %v9847_v32, %v9593_v33  ;;  %v9903_v46 = vadd.f32 %v1798_v7, %v9593_v33  ;;  %v8498_v28 = vld [vmem:[%s9026_s17 + $0xf8] sm:$0xff] }
 0x182   : > { %v5426_v44 = vmul.f32 1.442695, %v5349_v19  ;;  %8254 = vrcp.f32 %v5587_v13  ;;  %v5589_v47 = vadd.f32 %v9883_v27, %v5588_v30  ;;  %v5594_v49 = vrot.slane %v9896_v43, 4 }
 0x183   : > { %v5040_v50 = vrot.slane %v5039_v17, 1  ;;  %v5044_v26 = vrot.slane %v5043_v35, 2  ;;  %v5048_v40 = vrot.slane %v9894_v39, 4  ;;  %v5054_v52 = vrot.slane %v9900_v11, 4  ;;  %v9909_v53 = vpop.f32.mrb[20].mxu0 }
 0x184   : > { %8256 = vpow2.f32 %v5426_v44  ;;  %v8247_v45 = vpop.eup %8246  ;;  %v5590_v32 = vrot.slane %v5589_v47, 2  ;;  %v5595_v41 = vadd.f32 %v9896_v43, %v5594_v49  ;;  %v5060_v55 = vrot.slane %v9903_v46, 4  ;;  %v9913_v56 = vpop.f32.mrb[20].mxu1 }
 0x185   : > { %v5041_v54 = vmax.f32 %v5039_v17, %v5040_v50  ;;  %v7286_v57 = vpop.f32.mrb[21].mxu0  ;;  %v5982_v58 = vmul.f32 %v8247_v45, %v9786_v9  ;;  %v5045_v59 = vmax.f32 %v5043_v35, %v5044_v26  ;;  %v5049_v60 = vmax.f32 %v9894_v39, %v5048_v40  ;;  %v7297_v51 = vpop.f32.mrb[21].mxu1 }
 0x186   : > { %v5055_v61 = vmax.f32 %v9900_v11, %v5054_v52  ;;  %v8249_v63 = vpop.eup %8248  ;;  %v5591_v2 = vadd.f32 %v5590_v32, %v5589_v47  ;;  %v5596_v37 = vrot.slane %v5595_v41, 2  ;;  %v9920_v31 = vmax.f32 %v9903_v46, %v5060_v55  ;;  %v8499_v57 = vld [vmem:[%s9026_s17 + $0x100] sm:$0xff] }
 0x187   : > { %v5350_v0 = vsub.f32 %v9855_v38, %v5041_v54  ;;  %v6064_v9 = vmul.f32 %v8491_v6, %v5982_v58  ;;  %v6065_v7 = vmul.f32 %v8492_v36, %v5982_v58  ;;  %v6066_v48 = vmul.f32 %v8493_v10, %v5982_v58 }
 0x188   : > { %v6067_v5 = vmul.f32 %v8494_v12, %v5982_v58  ;;  %v5983_v14 = vmul.f32 %v8249_v63, %v9790_v22  ;;  %v5592_v15 = vrot.slane %v5591_v2, 1  ;;  %v5597_v38 = vadd.f32 %v5596_v37, %v5595_v41  ;;  %v8502_v63 = vld [vmem:[%s9026_s17 + $0x118] sm:$0xff] }
 0x189   : > { %v5428_v16 = vmul.f32 1.442695, %v5350_v0  ;;  %v9927_v18 = vpop.eup %8250  ;;  %6320 = vst [vmem:[%s9804_s4 + $0xc0] sm:$0xff] %v6064_v9  ;;  %6321 = vst [vmem:[%s9804_s4 + $0xc8] sm:$0xff] %v6065_v7  ;;  %v5046_v42 = vrot.slane %v5045_v59, 1  ;;  %v5050_v4 = vrot.slane %v5049_v60, 2 }
 0x18a   : > { %6322 = vst [vmem:[%s9804_s4 + $0xd0] sm:$0xff] %v6066_v48  ;;  %6323 = vst [vmem:[%s9804_s4 + $0xd8] sm:$0xff] %v6067_v5  ;;  %v5056_v20 = vrot.slane %v5055_v61, 2  ;;  %v5062_v21 = vrot.slane %v9920_v31, 2  ;;  %v6068_v22 = vmul.f32 %v8495_v23, %v5983_v14  ;;  %v6069_v24 = vmul.f32 %v8496_v29, %v5983_v14  ;;  %v8504_v0 = vld [vmem:[%s9026_s17 + $0x128] sm:$0xff]  ;;  %v8505_v9 = vld [vmem:[%s9026_s17 + $0x130] sm:$0xff] }
 0x18b   : > { %v6070_v34 = vmul.f32 %v8497_v25, %v5983_v14  ;;  %v6071_v13 = vmul.f32 %v8498_v28, %v5983_v14  ;;  %v8253_v19 = vpop.eup %8252  ;;  %v5593_v30 = vadd.f32 %v5592_v15, %v5591_v2  ;;  %v5598_v17 = vrot.slane %v5597_v38, 1  ;;  %v9939_v44 = vpop.f32.mrb[22].mxu0  ;;  %v8506_v7 = vld [vmem:[%s9026_s17 + $0x138] sm:$0xff] }
 0x18c   : > { %v5600_v35 = vrot.slane %v9927_v18, 4  ;;  %8258 = vpow2.f32 %v5428_v16  ;;  %v8255_v47 = vpop.eup %8254  ;;  %6324 = vst [vmem:[%s9804_s4 + $0xe0] sm:$0xff] %v6068_v22  ;;  %6325 = vst [vmem:[%s9804_s4 + $0xe8] sm:$0xff] %v6069_v24  ;;  %v5984_v49 = vmul.f32 %v8253_v19, %v9826_v3  ;;  %v5047_v50 = vmax.f32 %v5045_v59, %v5046_v42  ;;  %v9946_v52 = vpop.f32.mrb[22].mxu1  ;;  %v8500_v59 = vld [vmem:[%s9026_s17 + $0x108] sm:$0xff] }
 0x18d   : > { %6326 = vst [vmem:[%s9804_s4 + $0xf0] sm:$0xff] %v6070_v34  ;;  %6327 = vst [vmem:[%s9804_s4 + $0xf8] sm:$0xff] %v6071_v13  ;;  %v5051_v26 = vmax.f32 %v5049_v60, %v5050_v4  ;;  %v5057_v40 = vmax.f32 %v5055_v61, %v5056_v20  ;;  %v7308_v45 = vpop.f32.mrb[23].mxu0  ;;  %v5985_v41 = vmul.f32 %v8255_v47, %v9829_v8  ;;  %8260 = vrcp.f32 %v5593_v30  ;;  %v7319_v3 = vpop.f32.mrb[23].mxu1  ;;  %v8501_v61 = vld [vmem:[%s9026_s17 + $0x110] sm:$0xff]  ;;  %v8503_v8 = vld [vmem:[%s9026_s17 + $0x120] sm:$0xff] }
 0x18e   : > { %v9948_v32 = vpop.eup %8256  ;;  %v5599_v54 = vadd.f32 %v5598_v17, %v5597_v38  ;;  %v5601_v55 = vadd.f32 %v9927_v18, %v5600_v35  ;;  %v6072_v58 = vmul.f32 %v8499_v57, %v5984_v49  ;;  %v6073_v60 = vmul.f32 %v8500_v59, %v5984_v49 }
 0x18f   : > { %v6074_v51 = vmul.f32 %v8501_v61, %v5984_v49  ;;  %v6075_v2 = vmul.f32 %v8502_v63, %v5984_v49  ;;  %v6076_v37 = vmul.f32 %v8503_v8, %v5985_v41  ;;  %v6077_v6 = vmul.f32 %v8504_v0, %v5985_v41  ;;  %v8507_v61 = vld [vmem:[%s9026_s17 + $0x140] sm:$0xff] }
 0x190   : > { %v6078_v36 = vmul.f32 %v8505_v9, %v5985_v41  ;;  %v6079_v10 = vmul.f32 %v8506_v7, %v5985_v41  ;;  %6328 = vst [vmem:[%s9804_s4 + $0x100] sm:$0xff] %v6072_v58  ;;  %6329 = vst [vmem:[%s9804_s4 + $0x108] sm:$0xff] %v6073_v60  ;;  %8262 = vrcp.f32 %v5599_v54  ;;  %v5602_v48 = vrot.slane %v5601_v55, 2 }
 0x191   : > { %6330 = vst [vmem:[%s9804_s4 + $0x110] sm:$0xff] %v6074_v51  ;;  %6331 = vst [vmem:[%s9804_s4 + $0x118] sm:$0xff] %v6075_v2  ;;  %v5606_v12 = vrot.slane %v9948_v32, 4  ;;  %v5351_v5 = vsub.f32 %v9865_v62, %v5047_v50  ;;  %v5052_v14 = vrot.slane %v5051_v26, 1  ;;  %v5058_v15 = vrot.slane %v5057_v40, 1  ;;  %v8509_v2 = vld [vmem:[%s9026_s17 + $0x150] sm:$0xff] }
 0x192   : > { %6332 = vst [vmem:[%s9804_s4 + $0x120] sm:$0xff] %v6076_v37  ;;  %6333 = vst [vmem:[%s9804_s4 + $0x128] sm:$0xff] %v6077_v6  ;;  %v5063_v38 = vmax.f32 %v9920_v31, %v5062_v21  ;;  %v9973_v16 = vadd.f32 %v9872_v1, %v9593_v33  ;;  %v5603_v42 = vadd.f32 %v5602_v48, %v5601_v55 }
 0x193   : > { %6334 = vst [vmem:[%s9804_s4 + $0x130] sm:$0xff] %v6078_v36  ;;  %6335 = vst [vmem:[%s9804_s4 + $0x138] sm:$0xff] %v6079_v10  ;;  %v5607_v4 = vadd.f32 %v9948_v32, %v5606_v12  ;;  %v5430_v20 = vmul.f32 1.442695, %v5351_v5  ;;  %v9978_v23 = vadd.f32 %v9909_v53, %v9593_v33  ;;  %v5053_v62 = vmax.f32 %v5051_v26, %v5052_v14  ;;  %v9981_v25 = vpop.f32.mrb[24].mxu0  ;;  %v8511_v5 = vld [vmem:[%s9026_s17 + $0x160] sm:$0xff] }
 0x194   : > { %v5059_v22 = vmax.f32 %v5057_v40, %v5058_v15  ;;  %v5064_v29 = vrot.slane %v5063_v38, 1  ;;  %v5066_v24 = vrot.slane %v9973_v16, 4  ;;  %v5604_v31 = vrot.slane %v5603_v42, 1  ;;  %v9984_v34 = vpop.f32.mrb[24].mxu1  ;;  %v7330_v28 = vpop.f32.mrb[25].mxu0  ;;  %v8512_v15 = vld [vmem:[%s9026_s17 + $0x168] sm:$0xff] }
 0x195   : > { %v5608_v21 = vrot.slane %v5607_v4, 2  ;;  %8264 = vpow2.f32 %v5430_v20  ;;  %v5072_v1 = vrot.slane %v9978_v23, 4  ;;  %v5352_v53 = vsub.f32 %v9894_v39, %v5053_v62  ;;  %v7341_v35 = vpop.f32.mrb[25].mxu1  ;;  %v8514_v20 = vld [vmem:[%s9026_s17 + $0x178] sm:$0xff] }
 0x196   : > { %v9986_v13 = vpop.eup %8258  ;;  %v5353_v19 = vsub.f32 %v9900_v11, %v5059_v22  ;;  %v5065_v30 = vmax.f32 %v5063_v38, %v5064_v29  ;;  %v5067_v17 = vmax.f32 %v9973_v16, %v5066_v24  ;;  %v5605_v47 = vadd.f32 %v5604_v31, %v5603_v42  ;;  %v8513_v42 = vld [vmem:[%s9026_s17 + $0x170] sm:$0xff] }
 0x197   : > { %v5609_v49 = vadd.f32 %v5608_v21, %v5607_v4  ;;  %v5612_v50 = vrot.slane %v9986_v13, 4  ;;  %v5073_v26 = vmax.f32 %v9978_v23, %v5072_v1  ;;  %v8261_v40 = vpop.eup %8260  ;;  %v5432_v45 = vmul.f32 1.442695, %v5352_v53 }
 0x198   : > { %v5434_v41 = vmul.f32 1.442695, %v5353_v19  ;;  %v5354_v39 = vsub.f32 %v9903_v46, %v5065_v30  ;;  %v5068_v54 = vrot.slane %v5067_v17, 2  ;;  %v5986_v11 = vmul.f32 %v8261_v40, %v9883_v27  ;;  %v8508_v46 = vld [vmem:[%s9026_s17 + $0x148] sm:$0xff]  ;;  %v8510_v27 = vld [vmem:[%s9026_s17 + $0x158] sm:$0xff] }
 0x199   : > { %8266 = vrcp.f32 %v5605_v47  ;;  %v5610_v55 = vrot.slane %v5609_v49, 1  ;;  %v5613_v3 = vadd.f32 %v9986_v13, %v5612_v50  ;;  %v5074_v59 = vrot.slane %v5073_v26, 2 }
 0x19a   : > { %8268 = vpow2.f32 %v5432_v45  ;;  %v5436_v57 = vmul.f32 1.442695, %v5354_v39  ;;  %v5069_v58 = vmax.f32 %v5067_v17, %v5068_v54  ;;  %v8263_v60 = vpop.eup %8262  ;;  %v6080_v51 = vmul.f32 %v8507_v61, %v5986_v11 }
 0x19b   : > { %v6081_v63 = vmul.f32 %v8508_v46, %v5986_v11  ;;  %v6082_v8 = vmul.f32 %v8509_v2, %v5986_v11  ;;  %v6083_v37 = vmul.f32 %v8510_v27, %v5986_v11  ;;  %v5987_v0 = vmul.f32 %v8263_v60, %v9896_v43  ;;  %v10001_v36 = vpop.f32.mrb[26].mxu0 }
 0x19c   : > { %v5611_v6 = vadd.f32 %v5610_v55, %v5609_v49  ;;  %v5614_v9 = vrot.slane %v5613_v3, 2  ;;  %8270 = vpow2.f32 %v5434_v41  ;;  %6336 = vst [vmem:[%s9804_s4 + $0x140] sm:$0xff] %v6080_v51  ;;  %v5070_v7 = vrot.slane %v5069_v58, 1  ;;  %v10011_v43 = vpop.f32.mrb[26].mxu1  ;;  %v7352_v12 = vpop.f32.mrb[27].mxu0  ;;  %v8516_v51 = vld [vmem:[%s9026_s17 + $0x188] sm:$0xff] }
 0x19d   : > { %6337 = vst [vmem:[%s9804_s4 + $0x148] sm:$0xff] %v6081_v63  ;;  %6338 = vst [vmem:[%s9804_s4 + $0x150] sm:$0xff] %v6082_v8  ;;  %8272 = vpow2.f32 %v5436_v57  ;;  %v5075_v10 = vmax.f32 %v5073_v26, %v5074_v59  ;;  %v10009_v48 = vadd.f32 %v9913_v56, %v9593_v33  ;;  %v6084_v14 = vmul.f32 %v8511_v5, %v5987_v0  ;;  %v7363_v22 = vpop.f32.mrb[27].mxu1  ;;  %v8517_v63 = vld [vmem:[%s9026_s17 + $0x190] sm:$0xff]  ;;  %v8518_v8 = vld [vmem:[%s9026_s17 + $0x198] sm:$0xff] }
 0x19e   : > { %6339 = vst [vmem:[%s9804_s4 + $0x158] sm:$0xff] %v6083_v37  ;;  %v6085_v38 = vmul.f32 %v8512_v15, %v5987_v0  ;;  %v6086_v4 = vmul.f32 %v8513_v42, %v5987_v0  ;;  %v6087_v62 = vmul.f32 %v8514_v20, %v5987_v0  ;;  %8274 = vrcp.f32 %v5611_v6 }
 0x19f   : > { %v10017_v29 = vpop.eup %8264  ;;  %v5615_v56 = vadd.f32 %v5614_v9, %v5613_v3  ;;  %v5071_v24 = vmax.f32 %v5069_v58, %v5070_v7  ;;  %v5076_v31 = vrot.slane %v5075_v10, 1  ;;  %6340 = vst [vmem:[%s9804_s4 + $0x160] sm:$0xff] %v6084_v14  ;;  %v5078_v1 = vrot.slane %v10009_v48, 4 }
 0x1a0   : > { %6341 = vst [vmem:[%s9804_s4 + $0x168] sm:$0xff] %v6085_v38  ;;  %6342 = vst [vmem:[%s9804_s4 + $0x170] sm:$0xff] %v6086_v4  ;;  %v5618_v21 = vrot.slane %v10017_v29, 4  ;;  %v10027_v28 = vadd.f32 %v9939_v44, %v9593_v33  ;;  %v10031_v53 = vadd.f32 %v9946_v52, %v9593_v33  ;;  %v10036_v35 = vadd.f32 %v9981_v25, %v9593_v33 }
 0x1a1   : > { %6343 = vst [vmem:[%s9804_s4 + $0x178] sm:$0xff] %v6087_v62  ;;  %v5616_v19 = vrot.slane %v5615_v56, 1  ;;  %v5355_v30 = vsub.f32 %v9973_v16, %v5071_v24  ;;  %v5077_v17 = vmax.f32 %v5075_v10, %v5076_v31  ;;  %v5079_v49 = vmax.f32 %v10009_v48, %v5078_v1 }
 0x1a2   : > { %v5619_v47 = vadd.f32 %v10017_v29, %v5618_v21  ;;  %v5084_v50 = vrot.slane %v10027_v28, 4  ;;  %v5090_v44 = vrot.slane %v10031_v53, 4  ;;  %v5096_v16 = vrot.slane %v10036_v35, 4 }
 0x1a3   : > { %v8267_v26 = vpop.eup %8266  ;;  %v5617_v40 = vadd.f32 %v5616_v19, %v5615_v56  ;;  %v5438_v52 = vmul.f32 1.442695, %v5355_v30  ;;  %v5356_v45 = vsub.f32 %v9978_v23, %v5077_v17  ;;  %v5080_v54 = vrot.slane %v5079_v49, 2  ;;  %v10048_v55 = vpop.f32.mrb[28].mxu0  ;;  %v8519_v19 = vld [vmem:[%s9026_s17 + $0x1a0] sm:$0xff]  ;;  %v8520_v17 = vld [vmem:[%s9026_s17 + $0x1a8] sm:$0xff] }
 0x1a4   : > { %v10044_v41 = vpop.eup %8268  ;;  %v5988_v25 = vmul.f32 %v8267_v26, %v9927_v18  ;;  %v5620_v39 = vrot.slane %v5619_v47, 2  ;;  %v5085_v11 = vmax.f32 %v10027_v28, %v5084_v50  ;;  %v5091_v23 = vmax.f32 %v10031_v53, %v5090_v44  ;;  %v10052_v58 = vpop.f32.mrb[28].mxu1  ;;  %v8515_v18 = vld [vmem:[%s9026_s17 + $0x180] sm:$0xff]  ;;  %v8522_v44 = vld [vmem:[%s9026_s17 + $0x1b8] sm:$0xff] }
 0x1a5   : > { %8276 = vrcp.f32 %v5617_v40  ;;  %v5624_v3 = vrot.slane %v10044_v41, 4  ;;  %v5440_v57 = vmul.f32 1.442695, %v5356_v45  ;;  %v7374_v59 = vpop.f32.mrb[29].mxu0  ;;  %v7385_v37 = vpop.f32.mrb[29].mxu1  ;;  %v5081_v12 = vmax.f32 %v5079_v49, %v5080_v54  ;;  %v8521_v49 = vld [vmem:[%s9026_s17 + $0x1b0] sm:$0xff] }
 0x1a6   : > { %v10054_v60 = vpop.eup %8270  ;;  %v6088_v61 = vmul.f32 %v8515_v18, %v5988_v25  ;;  %v6089_v46 = vmul.f32 %v8516_v51, %v5988_v25  ;;  %v6090_v2 = vmul.f32 %v8517_v63, %v5988_v25  ;;  %v6091_v27 = vmul.f32 %v8518_v8, %v5988_v25 }
 0x1a7   : > { %v10060_v0 = vpop.eup %8272  ;;  %v5621_v6 = vadd.f32 %v5620_v39, %v5619_v47  ;;  %v5625_v9 = vadd.f32 %v10044_v41, %v5624_v3  ;;  %v5630_v7 = vrot.slane %v10054_v60, 4  ;;  %8278 = vpow2.f32 %v5438_v52 }
 0x1a8   : > { %6344 = vst [vmem:[%s9804_s4 + $0x180] sm:$0xff] %v6088_v61  ;;  %6345 = vst [vmem:[%s9804_s4 + $0x188] sm:$0xff] %v6089_v46  ;;  %v5636_v10 = vrot.slane %v10060_v0, 4  ;;  %8280 = vpow2.f32 %v5440_v57  ;;  %v5086_v5 = vrot.slane %v5085_v11, 2  ;;  %v8275_v14 = vpop.eup %8274  ;;  %v5092_v4 = vrot.slane %v5091_v23, 2 }
 0x1a9   : > { %6346 = vst [vmem:[%s9804_s4 + $0x190] sm:$0xff] %v6090_v2  ;;  %6347 = vst [vmem:[%s9804_s4 + $0x198] sm:$0xff] %v6091_v27  ;;  %v5622_v15 = vrot.slane %v5621_v6, 1  ;;  %v5626_v38 = vrot.slane %v5625_v9, 2  ;;  %v5631_v42 = vadd.f32 %v10054_v60, %v5630_v7  ;;  %v5989_v20 = vmul.f32 %v8275_v14, %v9948_v32  ;;  %v8526_v14 = vld [vmem:[%s9026_s17 + $0x1d8] sm:$0xff] }
 0x1aa   : > { %v5637_v62 = vadd.f32 %v10060_v0, %v5636_v10  ;;  %v5082_v22 = vrot.slane %v5081_v12, 1  ;;  %v5087_v56 = vmax.f32 %v5085_v11, %v5086_v5  ;;  %v5093_v1 = vmax.f32 %v5091_v23, %v5092_v4  ;;  %v8525_v5 = vld [vmem:[%s9026_s17 + $0x1d0] sm:$0xff] }
 0x1ab   : > { %v5623_v24 = vadd.f32 %v5622_v15, %v5621_v6  ;;  %v5627_v31 = vadd.f32 %v5626_v38, %v5625_v9  ;;  %v5632_v21 = vrot.slane %v5631_v42, 2  ;;  %v6092_v30 = vmul.f32 %v8519_v19, %v5989_v20  ;;  %v10076_v26 = vpop.f32.mrb[30].mxu0 }
 0x1ac   : > { %v6093_v47 = vmul.f32 %v8520_v17, %v5989_v20  ;;  %v6094_v50 = vmul.f32 %v8521_v49, %v5989_v20  ;;  %v6095_v32 = vmul.f32 %v8522_v44, %v5989_v20  ;;  %v5638_v45 = vrot.slane %v5637_v62, 2  ;;  %v10078_v25 = vpop.f32.mrb[30].mxu1  ;;  %v7396_v39 = vpop.f32.mrb[31].mxu0 }
 0x1ad   : > { %8282 = vrcp.f32 %v5623_v24  ;;  %v5628_v40 = vrot.slane %v5627_v31, 1  ;;  %v5633_v52 = vadd.f32 %v5632_v21, %v5631_v42  ;;  %6348 = vst [vmem:[%s9804_s4 + $0x1a0] sm:$0xff] %v6092_v30  ;;  %v5083_v54 = vmax.f32 %v5081_v12, %v5082_v22  ;;  %v7407_v23 = vpop.f32.mrb[31].mxu1 }
 0x1ae   : > { %6349 = vst [vmem:[%s9804_s4 + $0x1a8] sm:$0xff] %v6093_v47  ;;  %6350 = vst [vmem:[%s9804_s4 + $0x1b0] sm:$0xff] %v6094_v50  ;;  %v5088_v11 = vrot.slane %v5087_v56, 1  ;;  %v5094_v3 = vrot.slane %v5093_v1, 1  ;;  %v5097_v57 = vmax.f32 %v10036_v35, %v5096_v16  ;;  %v5639_v51 = vadd.f32 %v5638_v45, %v5637_v62 }
 0x1af   : > { %6351 = vst [vmem:[%s9804_s4 + $0x1b8] sm:$0xff] %v6095_v32  ;;  %v8277_v59 = vpop.eup %8276  ;;  %v5629_v18 = vadd.f32 %v5628_v40, %v5627_v31  ;;  %v5634_v61 = vrot.slane %v5633_v52, 1  ;;  %v10089_v46 = vadd.f32 %v9984_v34, %v9593_v33  ;;  %v5357_v2 = vsub.f32 %v10009_v48, %v5083_v54  ;;  %v8523_v34 = vld [vmem:[%s9026_s17 + $0x1c0] sm:$0xff] }
 0x1b0   : > { %v5990_v63 = vmul.f32 %v8277_v59, %v9986_v13  ;;  %v5089_v8 = vmax.f32 %v5087_v56, %v5088_v11  ;;  %v5095_v27 = vmax.f32 %v5093_v1, %v5094_v3  ;;  %v5640_v6 = vrot.slane %v5639_v51, 1  ;;  %v8524_v13 = vld [vmem:[%s9026_s17 + $0x1c8] sm:$0xff] }
 0x1b1   : > { %v10093_v16 = vpop.eup %8278  ;;  %8284 = vrcp.f32 %v5629_v18  ;;  %v5635_v37 = vadd.f32 %v5634_v61, %v5633_v52  ;;  %v5098_v9 = vrot.slane %v5097_v57, 2  ;;  %v5442_v20 = vmul.f32 1.442695, %v5357_v2  ;;  %v8529_v18 = vld [vmem:[%s9026_s17 + $0x1f0] sm:$0xff]  ;;  %v8530_v61 = vld [vmem:[%s9026_s17 + $0x1f8] sm:$0xff] }
 0x1b2   : > { %v10095_v7 = vpop.eup %8280  ;;  %v6096_v10 = vmul.f32 %v8523_v34, %v5990_v63  ;;  %v6097_v12 = vmul.f32 %v8524_v13, %v5990_v63  ;;  %v6098_v48 = vmul.f32 %v8525_v5, %v5990_v63  ;;  %v6099_v15 = vmul.f32 %v8526_v14, %v5990_v63 }
 0x1b3   : > { %8286 = vrcp.f32 %v5635_v37  ;;  %v5641_v38 = vadd.f32 %v5640_v6, %v5639_v51  ;;  %v5642_v42 = vrot.slane %v10093_v16, 4  ;;  %v5648_v4 = vrot.slane %v10095_v7, 4  ;;  %v10109_v24 = vpop.f32.mrb[32].mxu0 }
 0x1b4   : > { %6352 = vst [vmem:[%s9804_s4 + $0x1c0] sm:$0xff] %v6096_v10  ;;  %6353 = vst [vmem:[%s9804_s4 + $0x1c8] sm:$0xff] %v6097_v12  ;;  %v5358_v62 = vsub.f32 %v10027_v28, %v5089_v8  ;;  %v5359_v22 = vsub.f32 %v10031_v53, %v5095_v27  ;;  %v5099_v56 = vmax.f32 %v5097_v57, %v5098_v9  ;;  %v5102_v1 = vrot.slane %v10089_v46, 4  ;;  %v10114_v19 = vpop.f32.mrb[32].mxu1  ;;  %v7418_v30 = vpop.f32.mrb[33].mxu0  ;;  %v8527_v57 = vld [vmem:[%s9026_s17 + $0x1e0] sm:$0xff] }
 0x1b5   : > { %6354 = vst [vmem:[%s9804_s4 + $0x1d0] sm:$0xff] %v6098_v48  ;;  %6355 = vst [vmem:[%s9804_s4 + $0x1d8] sm:$0xff] %v6099_v15  ;;  %8288 = vrcp.f32 %v5641_v38  ;;  %v5643_v31 = vadd.f32 %v10093_v16, %v5642_v42  ;;  %v5649_v21 = vadd.f32 %v10095_v7, %v5648_v4  ;;  %v7429_v49 = vpop.f32.mrb[33].mxu1  ;;  %v10119_v40 = vadd.f32 %v10001_v36, %v9593_v33  ;;  %v8528_v36 = vld [vmem:[%s9026_s17 + $0x1e8] sm:$0xff]  ;;  %v8531_v15 = vld [vmem:[%s9026_s17 + $0x200] sm:$0xff] }
 0x1b6   : > { %8290 = vpow2.f32 %v5442_v20  ;;  %v5444_v17 = vmul.f32 1.442695, %v5358_v62  ;;  %v5446_v47 = vmul.f32 1.442695, %v5359_v22  ;;  %v5100_v28 = vrot.slane %v5099_v56, 1  ;;  %v8532_v42 = vld [vmem:[%s9026_s17 + $0x208] sm:$0xff] }
 0x1b7   : > { %v8283_v53 = vpop.eup %8282  ;;  %v5644_v50 = vrot.slane %v5643_v31, 2  ;;  %v5650_v44 = vrot.slane %v5649_v21, 2  ;;  %v5103_v32 = vmax.f32 %v10089_v46, %v5102_v1  ;;  %v10124_v39 = vadd.f32 %v10011_v43, %v9593_v33  ;;  %v8534_v62 = vld [vmem:[%s9026_s17 + $0x218] sm:$0xff]  ;;  %v8535_v49 = vld [vmem:[%s9026_s17 + $0x220] sm:$0xff] }
 0x1b8   : > { %v5991_v52 = vmul.f32 %v8283_v53, %v10017_v29  ;;  %8292 = vpow2.f32 %v5444_v17  ;;  %v5101_v45 = vmax.f32 %v5099_v56, %v5100_v28  ;;  %v5108_v6 = vrot.slane %v10119_v40, 4 }
 0x1b9   : > { %v5645_v54 = vadd.f32 %v5644_v50, %v5643_v31  ;;  %v5651_v11 = vadd.f32 %v5650_v44, %v5649_v21  ;;  %8294 = vpow2.f32 %v5446_v47  ;;  %v5104_v3 = vrot.slane %v5103_v32, 2  ;;  %v8536_v50 = vld [vmem:[%s9026_s17 + $0x228] sm:$0xff] }
 0x1ba   : > { %v6100_v23 = vmul.f32 %v8527_v57, %v5991_v52  ;;  %v6101_v59 = vmul.f32 %v8528_v36, %v5991_v52  ;;  %v6102_v29 = vmul.f32 %v8529_v18, %v5991_v52  ;;  %v6103_v51 = vmul.f32 %v8530_v61, %v5991_v52  ;;  %v8540_v57 = vld [vmem:[%s9026_s17 + $0x248] sm:$0xff]  ;;  %v8541_v36 = vld [vmem:[%s9026_s17 + $0x250] sm:$0xff]  ;;  %v8542_v18 = vld [vmem:[%s9026_s17 + $0x258] sm:$0xff] }
 0x1bb   : > { %v8285_v63 = vpop.eup %8284  ;;  %v5646_v2 = vrot.slane %v5645_v54, 1  ;;  %v5652_v43 = vrot.slane %v5651_v11, 1  ;;  %v5360_v8 = vsub.f32 %v10036_v35, %v5101_v45  ;;  %v5105_v27 = vmax.f32 %v5103_v32, %v5104_v3  ;;  %v10142_v35 = vpop.f32.mrb[34].mxu0  ;;  %v8537_v32 = vld [vmem:[%s9026_s17 + $0x230] sm:$0xff]  ;;  %v8538_v45 = vld [vmem:[%s9026_s17 + $0x238] sm:$0xff] }
 0x1bc   : > { %6356 = vst [vmem:[%s9804_s4 + $0x1e0] sm:$0xff] %v6100_v23  ;;  %6357 = vst [vmem:[%s9804_s4 + $0x1e8] sm:$0xff] %v6101_v59  ;;  %v5992_v37 = vmul.f32 %v8285_v63, %v10044_v41  ;;  %v5114_v9 = vrot.slane %v10124_v39, 4  ;;  %v10140_v34 = vadd.f32 %v10048_v55, %v9593_v33  ;;  %v10144_v14 = vpop.f32.mrb[34].mxu1  ;;  %v7440_v41 = vpop.f32.mrb[35].mxu0  ;;  %v8533_v55 = vld [vmem:[%s9026_s17 + $0x210] sm:$0xff]  ;;  %v5109_v30 = vmax.f32 %v10119_v40, %v5108_v6 }
 0x1bd   : > { %6358 = vst [vmem:[%s9804_s4 + $0x1f0] sm:$0xff] %v6102_v29  ;;  %6359 = vst [vmem:[%s9804_s4 + $0x1f8] sm:$0xff] %v6103_v51  ;;  %v8287_v10 = vpop.eup %8286  ;;  %v5647_v13 = vadd.f32 %v5646_v2, %v5645_v54  ;;  %v5653_v12 = vadd.f32 %v5652_v43, %v5651_v11  ;;  %v5448_v5 = vmul.f32 1.442695, %v5360_v8  ;;  %v5106_v48 = vrot.slane %v5105_v27, 1  ;;  %v7451_v56 = vpop.f32.mrb[35].mxu1 }
 0x1be   : > { %v6104_v38 = vmul.f32 %v8531_v15, %v5992_v37  ;;  %v6105_v4 = vmul.f32 %v8532_v42, %v5992_v37  ;;  %v6106_v20 = vmul.f32 %v8533_v55, %v5992_v37  ;;  %v6107_v22 = vmul.f32 %v8534_v62, %v5992_v37  ;;  %v8539_v11 = vld [vmem:[%s9026_s17 + $0x240] sm:$0xff] }
 0x1bf   : > { %v8289_v31 = vpop.eup %8288  ;;  %v5993_v21 = vmul.f32 %v8287_v10, %v10054_v60  ;;  %8296 = vrcp.f32 %v5647_v13  ;;  %v5107_v1 = vmax.f32 %v5105_v27, %v5106_v48  ;;  %v5115_v60 = vmax.f32 %v10124_v39, %v5114_v9 }
 0x1c0   : > { %v10152_v17 = vpop.eup %8290  ;;  %6360 = vst [vmem:[%s9804_s4 + $0x200] sm:$0xff] %v6104_v38  ;;  %6361 = vst [vmem:[%s9804_s4 + $0x208] sm:$0xff] %v6105_v4  ;;  %v5994_v47 = vmul.f32 %v8289_v31, %v10060_v0  ;;  %8298 = vrcp.f32 %v5653_v12  ;;  %v5120_v28 = vrot.slane %v10140_v34, 4  ;;  %v5110_v8 = vrot.slane %v5109_v30, 2 }
 0x1c1   : > { %6362 = vst [vmem:[%s9804_s4 + $0x210] sm:$0xff] %v6106_v20  ;;  %6363 = vst [vmem:[%s9804_s4 + $0x218] sm:$0xff] %v6107_v22  ;;  %v6108_v53 = vmul.f32 %v8535_v49, %v5993_v21  ;;  %v6109_v44 = vmul.f32 %v8536_v50, %v5993_v21  ;;  %v6110_v52 = vmul.f32 %v8537_v32, %v5993_v21  ;;  %v5654_v51 = vrot.slane %v10152_v17, 4 }
 0x1c2   : > { %v6111_v54 = vmul.f32 %v8538_v45, %v5993_v21  ;;  %v10165_v0 = vpop.eup %8292  ;;  %v6112_v3 = vmul.f32 %v8539_v11, %v5994_v47  ;;  %v6113_v23 = vmul.f32 %v8540_v57, %v5994_v47  ;;  %v6114_v59 = vmul.f32 %v8541_v36, %v5994_v47  ;;  %v8545_v57 = vld [vmem:[%s9026_s17 + $0x270] sm:$0xff] }
 0x1c3   : > { %v6115_v29 = vmul.f32 %v8542_v18, %v5994_v47  ;;  %v10171_v61 = vpop.eup %8294  ;;  %6364 = vst [vmem:[%s9804_s4 + $0x220] sm:$0xff] %v6108_v53  ;;  %6365 = vst [vmem:[%s9804_s4 + $0x228] sm:$0xff] %v6109_v44  ;;  %v5660_v63 = vrot.slane %v10165_v0, 4  ;;  %8300 = vpow2.f32 %v5448_v5  ;;  %v5361_v2 = vsub.f32 %v10089_v46, %v5107_v1  ;;  %v10186_v6 = vpop.f32.mrb[36].mxu0  ;;  %v8547_v18 = vld [vmem:[%s9026_s17 + $0x280] sm:$0xff] }
 0x1c4   : > { %6366 = vst [vmem:[%s9804_s4 + $0x230] sm:$0xff] %v6110_v52  ;;  %6367 = vst [vmem:[%s9804_s4 + $0x238] sm:$0xff] %v6111_v54  ;;  %v5666_v43 = vrot.slane %v10171_v61, 4  ;;  %v5116_v27 = vrot.slane %v5115_v60, 2  ;;  %v5121_v37 = vmax.f32 %v10140_v34, %v5120_v28  ;;  %v5655_v9 = vadd.f32 %v10152_v17, %v5654_v51  ;;  %v10194_v12 = vpop.f32.mrb[36].mxu1  ;;  %v7462_v5 = vpop.f32.mrb[37].mxu0 }
 0x1c5   : > { %6368 = vst [vmem:[%s9804_s4 + $0x240] sm:$0xff] %v6112_v3  ;;  %6369 = vst [vmem:[%s9804_s4 + $0x248] sm:$0xff] %v6113_v23  ;;  %v5661_v10 = vadd.f32 %v10165_v0, %v5660_v63  ;;  %v5450_v13 = vmul.f32 1.442695, %v5361_v2  ;;  %v10192_v46 = vadd.f32 %v10052_v58, %v9593_v33  ;;  %v5111_v41 = vmax.f32 %v5109_v30, %v5110_v8  ;;  %v7473_v42 = vpop.f32.mrb[37].mxu1  ;;  %v8543_v54 = vld [vmem:[%s9026_s17 + $0x260] sm:$0xff] }
 0x1c6   : > { %6370 = vst [vmem:[%s9804_s4 + $0x250] sm:$0xff] %v6114_v59  ;;  %6371 = vst [vmem:[%s9804_s4 + $0x258] sm:$0xff] %v6115_v29  ;;  %v5667_v48 = vadd.f32 %v10171_v61, %v5666_v43  ;;  %v5117_v15 = vmax.f32 %v5115_v60, %v5116_v27  ;;  %v5122_v38 = vrot.slane %v5121_v37, 2  ;;  %v5656_v4 = vrot.slane %v5655_v9, 2  ;;  %v8548_v51 = vld [vmem:[%s9026_s17 + $0x288] sm:$0xff]  ;;  %v8549_v2 = vld [vmem:[%s9026_s17 + $0x290] sm:$0xff] }
 0x1c7   : > { %v5662_v55 = vrot.slane %v5661_v10, 2  ;;  %8302 = vpow2.f32 %v5450_v13  ;;  %v5126_v20 = vrot.slane %v10192_v46, 4  ;;  %v5112_v22 = vrot.slane %v5111_v41, 1  ;;  %v8550_v8 = vld [vmem:[%s9026_s17 + $0x298] sm:$0xff] }
 0x1c8   : > { %v5668_v62 = vrot.slane %v5667_v48, 2  ;;  %v5118_v56 = vrot.slane %v5117_v15, 1  ;;  %v5123_v58 = vmax.f32 %v5121_v37, %v5122_v38  ;;  %v5657_v21 = vadd.f32 %v5656_v4, %v5655_v9 }
 0x1c9   : > { %v8297_v31 = vpop.eup %8296  ;;  %v5663_v1 = vadd.f32 %v5662_v55, %v5661_v10  ;;  %v5127_v30 = vmax.f32 %v10192_v46, %v5126_v20  ;;  %v10201_v47 = vadd.f32 %v10076_v26, %v9593_v33  ;;  %v5113_v53 = vmax.f32 %v5111_v41, %v5112_v22  ;;  %v8544_v26 = vld [vmem:[%s9026_s17 + $0x268] sm:$0xff] }
 0x1ca   : > { %v8299_v60 = vpop.eup %8298  ;;  %v5995_v28 = vmul.f32 %v8297_v31, %v10093_v16  ;;  %v5669_v49 = vadd.f32 %v5668_v62, %v5667_v48  ;;  %v5119_v50 = vmax.f32 %v5117_v15, %v5118_v56  ;;  %v5658_v32 = vrot.slane %v5657_v21, 1  ;;  %v8546_v16 = vld [vmem:[%s9026_s17 + $0x278] sm:$0xff] }
 0x1cb   : > { %v5996_v44 = vmul.f32 %v8299_v60, %v10095_v7  ;;  %v5664_v52 = vrot.slane %v5663_v1, 1  ;;  %v5124_v45 = vrot.slane %v5123_v58, 1  ;;  %v10209_v59 = vpop.f32.mrb[38].mxu0  ;;  %v5362_v15 = vsub.f32 %v10119_v40, %v5113_v53 }
 0x1cc   : > { %v6116_v11 = vmul.f32 %v8543_v54, %v5995_v28  ;;  %v6117_v3 = vmul.f32 %v8544_v26, %v5995_v28  ;;  %v6118_v23 = vmul.f32 %v8545_v57, %v5995_v28  ;;  %v6119_v36 = vmul.f32 %v8546_v16, %v5995_v28  ;;  %v10217_v37 = vpop.f32.mrb[38].mxu1  ;;  %v7484_v9 = vpop.f32.mrb[39].mxu0 }
 0x1cd   : > { %v10211_v7 = vpop.eup %8300  ;;  %v6120_v29 = vmul.f32 %v8547_v18, %v5996_v44  ;;  %v6121_v63 = vmul.f32 %v8548_v51, %v5996_v44  ;;  %v6122_v43 = vmul.f32 %v8549_v2, %v5996_v44  ;;  %v6123_v27 = vmul.f32 %v8550_v8, %v5996_v44  ;;  %v7495_v41 = vpop.f32.mrb[39].mxu1 }
 0x1ce   : > { %6372 = vst [vmem:[%s9804_s4 + $0x260] sm:$0xff] %v6116_v11  ;;  %6373 = vst [vmem:[%s9804_s4 + $0x268] sm:$0xff] %v6117_v3  ;;  %v5659_v10 = vadd.f32 %v5658_v32, %v5657_v21  ;;  %v5665_v13 = vadd.f32 %v5664_v52, %v5663_v1  ;;  %v5670_v5 = vrot.slane %v5669_v49, 1  ;;  %v5672_v48 = vrot.slane %v10211_v7, 4 }
 0x1cf   : > { %6374 = vst [vmem:[%s9804_s4 + $0x270] sm:$0xff] %v6118_v23  ;;  %6375 = vst [vmem:[%s9804_s4 + $0x278] sm:$0xff] %v6119_v36  ;;  %v5363_v38 = vsub.f32 %v10124_v39, %v5119_v50  ;;  %v5125_v42 = vmax.f32 %v5123_v58, %v5124_v45  ;;  %v5128_v4 = vrot.slane %v5127_v30, 2  ;;  %v5132_v62 = vrot.slane %v10201_v47, 4 }
 0x1d0   : > { %6376 = vst [vmem:[%s9804_s4 + $0x280] sm:$0xff] %v6120_v29  ;;  %6377 = vst [vmem:[%s9804_s4 + $0x288] sm:$0xff] %v6121_v63  ;;  %8304 = vrcp.f32 %v5659_v10  ;;  %v5671_v55 = vadd.f32 %v5670_v5, %v5669_v49  ;;  %v5673_v20 = vadd.f32 %v10211_v7, %v5672_v48  ;;  %v5452_v56 = vmul.f32 1.442695, %v5362_v15 }
 0x1d1   : > { %6378 = vst [vmem:[%s9804_s4 + $0x290] sm:$0xff] %v6122_v43  ;;  %6379 = vst [vmem:[%s9804_s4 + $0x298] sm:$0xff] %v6123_v27  ;;  %v10232_v22 = vpop.eup %8302  ;;  %8306 = vrcp.f32 %v5665_v13  ;;  %v5454_v31 = vmul.f32 1.442695, %v5363_v38  ;;  %v5364_v21 = vsub.f32 %v10140_v34, %v5125_v42  ;;  %v5129_v39 = vmax.f32 %v5127_v30, %v5128_v4 }
 0x1d2   : > { %8308 = vrcp.f32 %v5671_v55  ;;  %v5674_v1 = vrot.slane %v5673_v20, 2  ;;  %v5678_v40 = vrot.slane %v10232_v22, 4  ;;  %v5133_v60 = vmax.f32 %v10201_v47, %v5132_v62  ;;  %v8552_v62 = vld [vmem:[%s9026_s17 + $0x2a8] sm:$0xff] }
 0x1d3   : > { %8310 = vpow2.f32 %v5452_v56  ;;  %v5456_v58 = vmul.f32 1.442695, %v5364_v21  ;;  %v10239_v28 = vadd.f32 %v10078_v25, %v9593_v33  ;;  %v5130_v50 = vrot.slane %v5129_v39, 1  ;;  %v10242_v44 = vpop.f32.mrb[40].mxu0 }
 0x1d4   : > { %v5675_v49 = vadd.f32 %v5674_v1, %v5673_v20  ;;  %v5679_v53 = vadd.f32 %v10232_v22, %v5678_v40  ;;  %8312 = vpow2.f32 %v5454_v31  ;;  %v5134_v34 = vrot.slane %v5133_v60, 2  ;;  %v10249_v52 = vpop.f32.mrb[40].mxu1  ;;  %v7506_v45 = vpop.f32.mrb[41].mxu0  ;;  %v8551_v20 = vld [vmem:[%s9026_s17 + $0x2a0] sm:$0xff]  ;;  %v8553_v31 = vld [vmem:[%s9026_s17 + $0x2b0] sm:$0xff] }
 0x1d5   : > { %8314 = vpow2.f32 %v5456_v58  ;;  %v5138_v32 = vrot.slane %v10239_v28, 4  ;;  %v10247_v30 = vadd.f32 %v10109_v24, %v9593_v33  ;;  %v5131_v11 = vmax.f32 %v5129_v39, %v5130_v50  ;;  %v7517_v3 = vpop.f32.mrb[41].mxu1  ;;  %v8558_v45 = vld [vmem:[%s9026_s17 + $0x2d8] sm:$0xff] }
 0x1d6   : > { %v5676_v25 = vrot.slane %v5675_v49, 1  ;;  %v5680_v54 = vrot.slane %v5679_v53, 2  ;;  %v10253_v26 = vadd.f32 %v10114_v19, %v9593_v33  ;;  %v5135_v57 = vmax.f32 %v5133_v60, %v5134_v34  ;;  %v8555_v60 = vld [vmem:[%s9026_s17 + $0x2c0] sm:$0xff]  ;;  %v8557_v34 = vld [vmem:[%s9026_s17 + $0x2d0] sm:$0xff] }
 0x1d7   : > { %v5139_v23 = vmax.f32 %v10239_v28, %v5138_v32  ;;  %v5144_v16 = vrot.slane %v10247_v30, 4  ;;  %v10259_v24 = vadd.f32 %v10142_v35, %v9593_v33  ;;  %v5365_v29 = vsub.f32 %v10192_v46, %v5131_v11 }
 0x1d8   : > { %v5677_v36 = vadd.f32 %v5676_v25, %v5675_v49  ;;  %v5681_v18 = vadd.f32 %v5680_v54, %v5679_v53  ;;  %v5150_v51 = vrot.slane %v10253_v26, 4  ;;  %v5136_v63 = vrot.slane %v5135_v57, 1  ;;  %v8556_v53 = vld [vmem:[%s9026_s17 + $0x2c8] sm:$0xff] }
 0x1d9   : > { %v5140_v2 = vrot.slane %v5139_v23, 2  ;;  %v5145_v19 = vmax.f32 %v10247_v30, %v5144_v16  ;;  %v5156_v43 = vrot.slane %v10259_v24, 4  ;;  %v5458_v9 = vmul.f32 1.442695, %v5365_v29  ;;  %v8559_v29 = vld [vmem:[%s9026_s17 + $0x2e0] sm:$0xff] }
 0x1da   : > { %v8305_v8 = vpop.eup %8304  ;;  %8316 = vrcp.f32 %v5677_v36  ;;  %v5682_v27 = vrot.slane %v5681_v18, 1  ;;  %v10266_v35 = vmax.f32 %v10253_v26, %v5150_v51  ;;  %v5137_v13 = vmax.f32 %v5135_v57, %v5136_v63  ;;  %v8560_v63 = vld [vmem:[%s9026_s17 + $0x2e8] sm:$0xff] }
 0x1db   : > { %v8307_v10 = vpop.eup %8306  ;;  %v5997_v46 = vmul.f32 %v8305_v8, %v10152_v17  ;;  %v5141_v5 = vmax.f32 %v5139_v23, %v5140_v2  ;;  %v5146_v48 = vrot.slane %v5145_v19, 2  ;;  %8318 = vpow2.f32 %v5458_v9  ;;  %v10271_v4 = vpop.f32.mrb[42].mxu0  ;;  %v8561_v8 = vld [vmem:[%s9026_s17 + $0x2f0] sm:$0xff]  ;;  %v8562_v9 = vld [vmem:[%s9026_s17 + $0x2f8] sm:$0xff] }
 0x1dc   : > { %v8309_v41 = vpop.eup %8308  ;;  %v5998_v15 = vmul.f32 %v8307_v10, %v10165_v0  ;;  %v5683_v38 = vadd.f32 %v5682_v27, %v5681_v18  ;;  %v5152_v42 = vrot.slane %v10266_v35, 2  ;;  %v8554_v0 = vld [vmem:[%s9026_s17 + $0x2b8] sm:$0xff]  ;;  %v10279_v40 = vpop.f32.mrb[42].mxu1  ;;  %v5366_v36 = vsub.f32 %v10201_v47, %v5137_v13 }
 0x1dd   : > { %v10273_v55 = vpop.eup %8310  ;;  %v6124_v17 = vmul.f32 %v8551_v20, %v5997_v46  ;;  %v6125_v56 = vmul.f32 %v8552_v62, %v5997_v46  ;;  %v6126_v21 = vmul.f32 %v8553_v31, %v5997_v46  ;;  %v6127_v1 = vmul.f32 %v8554_v0, %v5997_v46  ;;  %v7528_v39 = vpop.f32.mrb[43].mxu0 }
 0x1de   : > { %v10281_v58 = vpop.eup %8312  ;;  %v6128_v49 = vmul.f32 %v8555_v60, %v5998_v15  ;;  %v6129_v50 = vmul.f32 %v8556_v53, %v5998_v15  ;;  %v6130_v32 = vmul.f32 %v8557_v34, %v5998_v15  ;;  %v6131_v25 = vmul.f32 %v8558_v45, %v5998_v15  ;;  %v7539_v54 = vpop.f32.mrb[43].mxu1  ;;  %v8565_v45 = vld [vmem:[%s9026_s17 + $0x310] sm:$0xff] }
 0x1df   : > { %v10287_v11 = vpop.eup %8314  ;;  %6380 = vst [vmem:[%s9804_s4 + $0x2a0] sm:$0xff] %v6124_v17  ;;  %6381 = vst [vmem:[%s9804_s4 + $0x2a8] sm:$0xff] %v6125_v56  ;;  %v5999_v3 = vmul.f32 %v8309_v41, %v10171_v61  ;;  %8320 = vrcp.f32 %v5683_v38  ;;  %v5684_v57 = vrot.slane %v10273_v55, 4  ;;  %v5690_v23 = vrot.slane %v10281_v58, 4  ;;  %v8566_v54 = vld [vmem:[%s9026_s17 + $0x318] sm:$0xff] }
 0x1e0   : > { %6382 = vst [vmem:[%s9804_s4 + $0x2b0] sm:$0xff] %v6126_v21  ;;  %6383 = vst [vmem:[%s9804_s4 + $0x2b8] sm:$0xff] %v6127_v1  ;;  %v5696_v16 = vrot.slane %v10287_v11, 4  ;;  %v5142_v18 = vrot.slane %v5141_v5, 1  ;;  %v5147_v61 = vmax.f32 %v5145_v19, %v5146_v48  ;;  %v5460_v47 = vmul.f32 1.442695, %v5366_v36 }
 0x1e1   : > { %6384 = vst [vmem:[%s9804_s4 + $0x2c0] sm:$0xff] %v6128_v49  ;;  %6385 = vst [vmem:[%s9804_s4 + $0x2c8] sm:$0xff] %v6129_v50  ;;  %v6132_v51 = vmul.f32 %v8559_v29, %v5999_v3  ;;  %v6133_v2 = vmul.f32 %v8560_v63, %v5999_v3  ;;  %v6134_v27 = vmul.f32 %v8561_v8, %v5999_v3 }
 0x1e2   : > { %6386 = vst [vmem:[%s9804_s4 + $0x2d0] sm:$0xff] %v6130_v32  ;;  %6387 = vst [vmem:[%s9804_s4 + $0x2d8] sm:$0xff] %v6131_v25  ;;  %v6135_v10 = vmul.f32 %v8562_v9, %v5999_v3  ;;  %v5685_v46 = vadd.f32 %v10273_v55, %v5684_v57  ;;  %v5691_v41 = vadd.f32 %v10281_v58, %v5690_v23  ;;  %v5148_v13 = vrot.slane %v5147_v61, 1 }
 0x1e3   : > { %v5697_v15 = vadd.f32 %v10287_v11, %v5696_v16  ;;  %6388 = vst [vmem:[%s9804_s4 + $0x2e0] sm:$0xff] %v6132_v51  ;;  %6389 = vst [vmem:[%s9804_s4 + $0x2e8] sm:$0xff] %v6133_v2  ;;  %v5143_v19 = vmax.f32 %v5141_v5, %v5142_v18  ;;  %v5153_v48 = vmax.f32 %v10266_v35, %v5152_v42  ;;  %8322 = vpow2.f32 %v5460_v47  ;;  %v10317_v31 = vpop.f32.mrb[44].mxu0 }
 0x1e4   : > { %6390 = vst [vmem:[%s9804_s4 + $0x2f0] sm:$0xff] %v6134_v27  ;;  %6391 = vst [vmem:[%s9804_s4 + $0x2f8] sm:$0xff] %v6135_v10  ;;  %v5157_v38 = vmax.f32 %v10259_v24, %v5156_v43  ;;  %v8317_v20 = vpop.eup %8316  ;;  %v5686_v17 = vrot.slane %v5685_v46, 2  ;;  %v5692_v62 = vrot.slane %v5691_v41, 2  ;;  %v5149_v0 = vmax.f32 %v5147_v61, %v5148_v13  ;;  %v10321_v42 = vpop.f32.mrb[44].mxu1  ;;  %v8569_v13 = vld [vmem:[%s9026_s17 + $0x330] sm:$0xff] }
 0x1e5   : > { %v5698_v56 = vrot.slane %v5697_v15, 2  ;;  %v6000_v21 = vmul.f32 %v8317_v20, %v10211_v7  ;;  %v5367_v5 = vsub.f32 %v10239_v28, %v5143_v19  ;;  %v5154_v35 = vrot.slane %v5153_v48, 1  ;;  %v7550_v43 = vpop.f32.mrb[45].mxu0  ;;  %v10323_v1 = vpop.eup %8318  ;;  %v8563_v7 = vld [vmem:[%s9026_s17 + $0x300] sm:$0xff]  ;;  %v8564_v28 = vld [vmem:[%s9026_s17 + $0x308] sm:$0xff] }
 0x1e6   : > { %v5687_v39 = vadd.f32 %v5686_v17, %v5685_v46  ;;  %v5693_v60 = vadd.f32 %v5692_v62, %v5691_v41  ;;  %v5158_v53 = vrot.slane %v5157_v38, 2  ;;  %v7561_v50 = vpop.f32.mrb[45].mxu1  ;;  %v5702_v36 = vrot.slane %v10323_v1, 4  ;;  %v8568_v19 = vld [vmem:[%s9026_s17 + $0x328] sm:$0xff] }
 0x1e7   : > { %v5699_v49 = vadd.f32 %v5698_v56, %v5697_v15  ;;  %v6136_v34 = vmul.f32 %v8563_v7, %v6000_v21  ;;  %v6137_v32 = vmul.f32 %v8564_v28, %v6000_v21  ;;  %v6138_v25 = vmul.f32 %v8565_v45, %v6000_v21  ;;  %v8567_v15 = vld [vmem:[%s9026_s17 + $0x320] sm:$0xff] }
 0x1e8   : > { %v6139_v3 = vmul.f32 %v8566_v54, %v6000_v21  ;;  %v5688_v57 = vrot.slane %v5687_v39, 1  ;;  %v5694_v23 = vrot.slane %v5693_v60, 1  ;;  %v5462_v61 = vmul.f32 1.442695, %v5367_v5 }
 0x1e9   : > { %v5700_v16 = vrot.slane %v5699_v49, 1  ;;  %v8321_v18 = vpop.eup %8320  ;;  %6392 = vst [vmem:[%s9804_s4 + $0x300] sm:$0xff] %v6136_v34  ;;  %6393 = vst [vmem:[%s9804_s4 + $0x308] sm:$0xff] %v6137_v32  ;;  %v5368_v29 = vsub.f32 %v10247_v30, %v5149_v0  ;;  %v5155_v51 = vmax.f32 %v5153_v48, %v5154_v35  ;;  %v5159_v63 = vmax.f32 %v5157_v38, %v5158_v53 }
 0x1ea   : > { %6394 = vst [vmem:[%s9804_s4 + $0x310] sm:$0xff] %v6138_v25  ;;  %6395 = vst [vmem:[%s9804_s4 + $0x318] sm:$0xff] %v6139_v3  ;;  %v6001_v2 = vmul.f32 %v8321_v18, %v10232_v22  ;;  %v5689_v8 = vadd.f32 %v5688_v57, %v5687_v39  ;;  %v5695_v27 = vadd.f32 %v5694_v23, %v5693_v60  ;;  %8324 = vpow2.f32 %v5462_v61  ;;  %v8570_v22 = vld [vmem:[%s9026_s17 + $0x338] sm:$0xff] }
 0x1eb   : > { %v5701_v9 = vadd.f32 %v5700_v16, %v5699_v49  ;;  %v5703_v10 = vadd.f32 %v10323_v1, %v5702_v36  ;;  %v5464_v46 = vmul.f32 1.442695, %v5368_v29  ;;  %v5369_v41 = vsub.f32 %v10253_v26, %v5155_v51  ;;  %v10342_v20 = vpop.f32.mrb[46].mxu0 }
 0x1ec   : > { %v6140_v47 = vmul.f32 %v8567_v15, %v6001_v2  ;;  %v6141_v30 = vmul.f32 %v8568_v19, %v6001_v2  ;;  %v6142_v48 = vmul.f32 %v8569_v13, %v6001_v2  ;;  %v6143_v38 = vmul.f32 %v8570_v22, %v6001_v2  ;;  %v10344_v21 = vpop.f32.mrb[46].mxu1  ;;  %v7572_v26 = vpop.f32.mrb[47].mxu0 }
 0x1ed   : > { %8326 = vrcp.f32 %v5689_v8  ;;  %v5704_v17 = vrot.slane %v5703_v10, 2  ;;  %v5466_v62 = vmul.f32 1.442695, %v5369_v41  ;;  %v5160_v56 = vrot.slane %v5159_v63, 1  ;;  %v10346_v5 = vpop.eup %8322  ;;  %v7583_v39 = vpop.f32.mrb[47].mxu1 }
 0x1ee   : > { %6396 = vst [vmem:[%s9804_s4 + $0x320] sm:$0xff] %v6140_v47  ;;  %6397 = vst [vmem:[%s9804_s4 + $0x328] sm:$0xff] %v6141_v30  ;;  %8328 = vrcp.f32 %v5695_v27  ;;  %v10354_v0 = vadd.f32 %v10144_v14, %v9593_v33  ;;  %v10358_v35 = vadd.f32 %v10186_v6, %v9593_v33  ;;  %v10362_v43 = vadd.f32 %v10194_v12, %v9593_v33 }
 0x1ef   : > { %6398 = vst [vmem:[%s9804_s4 + $0x330] sm:$0xff] %v6142_v48  ;;  %6399 = vst [vmem:[%s9804_s4 + $0x338] sm:$0xff] %v6143_v38  ;;  %8330 = vrcp.f32 %v5701_v9  ;;  %v5705_v60 = vadd.f32 %v5704_v17, %v5703_v10  ;;  %v5708_v49 = vrot.slane %v10346_v5, 4  ;;  %v5161_v53 = vmax.f32 %v5159_v63, %v5160_v56 }
 0x1f0   : > { %8332 = vpow2.f32 %v5464_v46  ;;  %v5162_v50 = vrot.slane %v10354_v0, 4  ;;  %v5168_v14 = vrot.slane %v10358_v35, 4  ;;  %v5174_v7 = vrot.slane %v10362_v43, 4 }
 0x1f1   : > { %v5706_v34 = vrot.slane %v5705_v60, 1  ;;  %v5709_v6 = vadd.f32 %v10346_v5, %v5708_v49  ;;  %8334 = vpow2.f32 %v5466_v62  ;;  %v5370_v12 = vsub.f32 %v10259_v24, %v5161_v53  ;;  %v8572_v49 = vld [vmem:[%s9026_s17 + $0x348] sm:$0xff] }
 0x1f2   : > { %v5163_v28 = vmax.f32 %v10354_v0, %v5162_v50  ;;  %v5169_v32 = vmax.f32 %v10358_v35, %v5168_v14  ;;  %v5175_v45 = vmax.f32 %v10362_v43, %v5174_v7  ;;  %v10375_v25 = vadd.f32 %v10209_v59, %v9593_v33  ;;  %v8573_v50 = vld [vmem:[%s9026_s17 + $0x350] sm:$0xff] }
 0x1f3   : > { %v5707_v54 = vadd.f32 %v5706_v34, %v5705_v60  ;;  %v5710_v3 = vrot.slane %v5709_v6, 2  ;;  %v5468_v57 = vmul.f32 1.442695, %v5370_v12  ;;  %v10379_v23 = vadd.f32 %v10217_v37, %v9593_v33  ;;  %v10382_v61 = vpop.f32.mrb[48].mxu0  ;;  %v8571_v60 = vld [vmem:[%s9026_s17 + $0x340] sm:$0xff] }
 0x1f4   : > { %v5164_v16 = vrot.slane %v5163_v28, 2  ;;  %v5170_v36 = vrot.slane %v5169_v32, 2  ;;  %v5176_v24 = vrot.slane %v5175_v45, 2  ;;  %v5180_v18 = vrot.slane %v10375_v25, 4  ;;  %v10384_v29 = vpop.eup %8324  ;;  %v10391_v2 = vpop.f32.mrb[48].mxu1 }
 0x1f5   : > { %8336 = vrcp.f32 %v5707_v54  ;;  %v5711_v51 = vadd.f32 %v5710_v3, %v5709_v6  ;;  %v5186_v59 = vrot.slane %v10379_v23, 4  ;;  %v10389_v63 = vadd.f32 %v10242_v44, %v9593_v33  ;;  %v7594_v37 = vpop.f32.mrb[49].mxu0  ;;  %v7605_v10 = vpop.f32.mrb[49].mxu1  ;;  %v8575_v6 = vld [vmem:[%s9026_s17 + $0x360] sm:$0xff]  ;;  %v8578_v3 = vld [vmem:[%s9026_s17 + $0x378] sm:$0xff] }
 0x1f6   : > { %v5714_v8 = vrot.slane %v10384_v29, 4  ;;  %8338 = vpow2.f32 %v5468_v57  ;;  %v5165_v27 = vmax.f32 %v5163_v28, %v5164_v16  ;;  %v5171_v9 = vmax.f32 %v5169_v32, %v5170_v36  ;;  %v8576_v28 = vld [vmem:[%s9026_s17 + $0x368] sm:$0xff] }
 0x1f7   : > { %v8327_v46 = vpop.eup %8326  ;;  %v5712_v41 = vrot.slane %v5711_v51, 1  ;;  %v5177_v15 = vmax.f32 %v5175_v45, %v5176_v24  ;;  %v10395_v47 = vmax.f32 %v10375_v25, %v5180_v18  ;;  %v10398_v44 = vmax.f32 %v10379_v23, %v5186_v59  ;;  %v8577_v45 = vld [vmem:[%s9026_s17 + $0x370] sm:$0xff] }
 0x1f8   : > { %v8329_v19 = vpop.eup %8328  ;;  %v6002_v30 = vmul.f32 %v8327_v46, %v10273_v55  ;;  %v5715_v13 = vadd.f32 %v10384_v29, %v5714_v8  ;;  %v5166_v48 = vrot.slane %v5165_v27, 1  ;;  %v5172_v22 = vrot.slane %v5171_v9, 1  ;;  %v8579_v46 = vld [vmem:[%s9026_s17 + $0x380] sm:$0xff] }
 0x1f9   : > { %v8331_v38 = vpop.eup %8330  ;;  %v6003_v17 = vmul.f32 %v8329_v19, %v10281_v58  ;;  %v5713_v62 = vadd.f32 %v5712_v41, %v5711_v51  ;;  %v5178_v56 = vrot.slane %v5177_v15, 1  ;;  %v5182_v26 = vrot.slane %v10395_v47, 2  ;;  %v8574_v58 = vld [vmem:[%s9026_s17 + $0x358] sm:$0xff]  ;;  %v8580_v19 = vld [vmem:[%s9026_s17 + $0x388] sm:$0xff] }
 0x1fa   : > { %v10404_v39 = vpop.eup %8332  ;;  %v6144_v55 = vmul.f32 %v8571_v60, %v6002_v30  ;;  %v6145_v53 = vmul.f32 %v8572_v49, %v6002_v30  ;;  %v6146_v14 = vmul.f32 %v8573_v50, %v6002_v30  ;;  %v6147_v7 = vmul.f32 %v8574_v58, %v6002_v30 }
 0x1fb   : > { %v10410_v34 = vpop.eup %8334  ;;  %v6148_v12 = vmul.f32 %v8575_v6, %v6003_v17  ;;  %v6149_v32 = vmul.f32 %v8576_v28, %v6003_v17  ;;  %v6150_v54 = vmul.f32 %v8577_v45, %v6003_v17  ;;  %v6151_v57 = vmul.f32 %v8578_v3, %v6003_v17  ;;  %v10422_v18 = vpop.f32.mrb[50].mxu0  ;;  %v8583_v6 = vld [vmem:[%s9026_s17 + $0x3a0] sm:$0xff]  ;;  %v8584_v28 = vld [vmem:[%s9026_s17 + $0x3a8] sm:$0xff] }
 0x1fc   : > { %6400 = vst [vmem:[%s9804_s4 + $0x340] sm:$0xff] %v6144_v55  ;;  %6401 = vst [vmem:[%s9804_s4 + $0x348] sm:$0xff] %v6145_v53  ;;  %v6004_v16 = vmul.f32 %v8331_v38, %v10287_v11  ;;  %8340 = vrcp.f32 %v5713_v62  ;;  %v5716_v36 = vrot.slane %v5715_v13, 2  ;;  %v5720_v24 = vrot.slane %v10404_v39, 4  ;;  %v10429_v10 = vpop.f32.mrb[50].mxu1  ;;  %v7616_v11 = vpop.f32.mrb[51].mxu0 }
 0x1fd   : > { %6402 = vst [vmem:[%s9804_s4 + $0x350] sm:$0xff] %v6146_v14  ;;  %6403 = vst [vmem:[%s9804_s4 + $0x358] sm:$0xff] %v6147_v7  ;;  %v5726_v51 = vrot.slane %v10410_v34, 4  ;;  %v5167_v59 = vmax.f32 %v5165_v27, %v5166_v48  ;;  %v5173_v37 = vmax.f32 %v5171_v9, %v5172_v22  ;;  %v5179_v8 = vmax.f32 %v5177_v15, %v5178_v56  ;;  %v8581_v38 = vld [vmem:[%s9026_s17 + $0x390] sm:$0xff]  ;;  %v8582_v62 = vld [vmem:[%s9026_s17 + $0x398] sm:$0xff]  ;;  %v7627_v55 = vpop.f32.mrb[51].mxu1 }
 0x1fe   : > { %6404 = vst [vmem:[%s9804_s4 + $0x360] sm:$0xff] %v6148_v12  ;;  %6405 = vst [vmem:[%s9804_s4 + $0x368] sm:$0xff] %v6149_v32  ;;  %v6152_v41 = vmul.f32 %v8579_v46, %v6004_v16  ;;  %v6153_v30 = vmul.f32 %v8580_v19, %v6004_v16  ;;  %v6154_v17 = vmul.f32 %v8581_v38, %v6004_v16  ;;  %v5188_v19 = vrot.slane %v10398_v44, 2 }
 0x1ff   : > { %6406 = vst [vmem:[%s9804_s4 + $0x370] sm:$0xff] %v6150_v54  ;;  %6407 = vst [vmem:[%s9804_s4 + $0x378] sm:$0xff] %v6151_v57  ;;  %v6155_v60 = vmul.f32 %v8582_v62, %v6004_v16  ;;  %v8337_v49 = vpop.eup %8336  ;;  %v5717_v27 = vadd.f32 %v5716_v36, %v5715_v13  ;;  %v5721_v9 = vadd.f32 %v10404_v39, %v5720_v24 }
 0x200   : > { %v5727_v15 = vadd.f32 %v10410_v34, %v5726_v51  ;;  %v5371_v48 = vsub.f32 %v10354_v0, %v5167_v59  ;;  %v10438_v22 = vpop.eup %8338  ;;  %6408 = vst [vmem:[%s9804_s4 + $0x380] sm:$0xff] %v6152_v41  ;;  %6409 = vst [vmem:[%s9804_s4 + $0x388] sm:$0xff] %v6153_v30  ;;  %v6005_v56 = vmul.f32 %v8337_v49, %v10323_v1  ;;  %v8585_v1 = vld [vmem:[%s9026_s17 + $0x3b0] sm:$0xff]  ;;  %v5192_v30 = vrot.slane %v10389_v63, 4 }
 0x201   : > { %6410 = vst [vmem:[%s9804_s4 + $0x390] sm:$0xff] %v6154_v17  ;;  %6411 = vst [vmem:[%s9804_s4 + $0x398] sm:$0xff] %v6155_v60  ;;  %v5372_v13 = vsub.f32 %v10358_v35, %v5173_v37  ;;  %v5373_v53 = vsub.f32 %v10362_v43, %v5179_v8  ;;  %v5183_v50 = vmax.f32 %v10395_v47, %v5182_v26  ;;  %v5718_v14 = vrot.slane %v5717_v27, 1  ;;  %v8586_v35 = vld [vmem:[%s9026_s17 + $0x3b8] sm:$0xff] }
 0x202   : > { %v5722_v0 = vrot.slane %v5721_v9, 2  ;;  %v5728_v58 = vrot.slane %v5727_v15, 2  ;;  %v5732_v7 = vrot.slane %v10438_v22, 4  ;;  %v6156_v12 = vmul.f32 %v8583_v6, %v6005_v56 }
 0x203   : > { %v6157_v32 = vmul.f32 %v8584_v28, %v6005_v56  ;;  %v6158_v45 = vmul.f32 %v8585_v1, %v6005_v56  ;;  %v6159_v54 = vmul.f32 %v8586_v35, %v6005_v56  ;;  %v5719_v43 = vadd.f32 %v5718_v14, %v5717_v27  ;;  %v10462_v8 = vpop.f32.mrb[52].mxu0  ;;  %v8588_v56 = vld [vmem:[%s9026_s17 + $0x3c8] sm:$0xff] }
 0x204   : > { %v5723_v3 = vadd.f32 %v5722_v0, %v5721_v9  ;;  %v5729_v47 = vadd.f32 %v5728_v58, %v5727_v15  ;;  %v5733_v26 = vadd.f32 %v10438_v22, %v5732_v7  ;;  %6412 = vst [vmem:[%s9804_s4 + $0x3a0] sm:$0xff] %v6156_v12  ;;  %v5470_v57 = vmul.f32 1.442695, %v5371_v48  ;;  %v10464_v11 = vpop.f32.mrb[52].mxu1  ;;  %v8587_v15 = vld [vmem:[%s9026_s17 + $0x3c0] sm:$0xff] }
 0x205   : > { %6413 = vst [vmem:[%s9804_s4 + $0x3a8] sm:$0xff] %v6157_v32  ;;  %6414 = vst [vmem:[%s9804_s4 + $0x3b0] sm:$0xff] %v6158_v45  ;;  %v5472_v16 = vmul.f32 1.442695, %v5372_v13  ;;  %v5474_v36 = vmul.f32 1.442695, %v5373_v53  ;;  %v10460_v24 = vadd.f32 %v10249_v52, %v9593_v33  ;;  %8342 = vrcp.f32 %v5719_v43 }
 0x206   : > { %6415 = vst [vmem:[%s9804_s4 + $0x3b8] sm:$0xff] %v6159_v54  ;;  %v5724_v51 = vrot.slane %v5723_v3, 1  ;;  %v5730_v59 = vrot.slane %v5729_v47, 1  ;;  %v5734_v37 = vrot.slane %v5733_v26, 2  ;;  %v8341_v46 = vpop.eup %8340  ;;  %8344 = vpow2.f32 %v5470_v57  ;;  %v7638_v52 = vpop.f32.mrb[53].mxu0  ;;  %v8589_v53 = vld [vmem:[%s9026_s17 + $0x3d0] sm:$0xff] }
 0x207   : > { %v5184_v41 = vrot.slane %v5183_v50, 1  ;;  %v7649_v38 = vpop.f32.mrb[53].mxu1  ;;  %v6006_v17 = vmul.f32 %v8341_v46, %v10346_v5  ;;  %8346 = vpow2.f32 %v5472_v16  ;;  %v5189_v27 = vmax.f32 %v10398_v44, %v5188_v19  ;;  %v8590_v5 = vld [vmem:[%s9026_s17 + $0x3d8] sm:$0xff] }
 0x208   : > { %v5725_v62 = vadd.f32 %v5724_v51, %v5723_v3  ;;  %v5731_v60 = vadd.f32 %v5730_v59, %v5729_v47  ;;  %v5735_v55 = vadd.f32 %v5734_v37, %v5733_v26  ;;  %v5193_v9 = vmax.f32 %v10389_v63, %v5192_v30 }
 0x209   : > { %v5185_v49 = vmax.f32 %v5183_v50, %v5184_v41  ;;  %v6160_v48 = vmul.f32 %v8587_v15, %v6006_v17  ;;  %v6161_v13 = vmul.f32 %v8588_v56, %v6006_v17  ;;  %v6162_v14 = vmul.f32 %v8589_v53, %v6006_v17 }
 0x20a   : > { %v6163_v0 = vmul.f32 %v8590_v5, %v6006_v17  ;;  %8348 = vrcp.f32 %v5725_v62  ;;  %v5736_v58 = vrot.slane %v5735_v55, 1  ;;  %v5190_v50 = vrot.slane %v5189_v27, 1  ;;  %v8591_v17 = vld [vmem:[%s9026_s17 + $0x3e0] sm:$0xff] }
 0x20b   : > { %v5374_v7 = vsub.f32 %v10375_v25, %v5185_v49  ;;  %6416 = vst [vmem:[%s9804_s4 + $0x3c0] sm:$0xff] %v6160_v48  ;;  %6417 = vst [vmem:[%s9804_s4 + $0x3c8] sm:$0xff] %v6161_v13  ;;  %8350 = vrcp.f32 %v5731_v60  ;;  %v5194_v44 = vrot.slane %v5193_v9, 2  ;;  %v5198_v6 = vrot.slane %v10460_v24, 4  ;;  %v10485_v45 = vpop.f32.mrb[54].mxu0  ;;  %v8592_v60 = vld [vmem:[%s9026_s17 + $0x3e8] sm:$0xff] }
 0x20c   : > { %6418 = vst [vmem:[%s9804_s4 + $0x3d0] sm:$0xff] %v6162_v14  ;;  %6419 = vst [vmem:[%s9804_s4 + $0x3d8] sm:$0xff] %v6163_v0  ;;  %v10483_v12 = vadd.f32 %v10271_v4, %v9593_v33  ;;  %v5737_v28 = vadd.f32 %v5736_v58, %v5735_v55  ;;  %8352 = vpow2.f32 %v5474_v36  ;;  %v5191_v1 = vmax.f32 %v5189_v27, %v5190_v50  ;;  %v10493_v3 = vpop.f32.mrb[54].mxu1  ;;  %v7660_v47 = vpop.f32.mrb[55].mxu0  ;;  %v8593_v55 = vld [vmem:[%s9026_s17 + $0x3f0] sm:$0xff]  ;;  %v8594_v27 = vld [vmem:[%s9026_s17 + $0x3f8] sm:$0xff] }
 0x20d   : > { %v5476_v32 = vmul.f32 1.442695, %v5374_v7  ;;  %v5195_v25 = vmax.f32 %v5193_v9, %v5194_v44  ;;  %v5199_v35 = vmax.f32 %v10460_v24, %v5198_v6  ;;  %v10491_v43 = vadd.f32 %v10279_v40, %v9593_v33  ;;  %v7671_v16 = vpop.f32.mrb[55].mxu1 }
 0x20e   : > { %v5204_v54 = vrot.slane %v10483_v12, 4  ;;  %8354 = vrcp.f32 %v5737_v28  ;;  %v5375_v4 = vsub.f32 %v10379_v23, %v5191_v1  ;;  %v10498_v26 = vadd.f32 %v10317_v31, %v9593_v33 }
 0x20f   : > { %v10502_v57 = vadd.f32 %v10321_v42, %v9593_v33  ;;  %v8343_v36 = vpop.eup %8342  ;;  %8356 = vpow2.f32 %v5476_v32  ;;  %v5196_v40 = vrot.slane %v5195_v25, 1  ;;  %v5200_v51 = vrot.slane %v5199_v35, 2 }
 0x210   : > { %v5205_v59 = vmax.f32 %v10483_v12, %v5204_v54  ;;  %v10505_v37 = vpop.eup %8344  ;;  %v6007_v31 = vmul.f32 %v8343_v36, %v10384_v29  ;;  %v5478_v23 = vmul.f32 1.442695, %v5375_v4  ;;  %v5210_v46 = vrot.slane %v10491_v43, 4  ;;  %v8595_v4 = vld [vmem:[%s9026_s17 + $0x400] sm:$0xff]  ;;  %v8596_v36 = vld [vmem:[%s9026_s17 + $0x408] sm:$0xff] }
 0x211   : > { %v5216_v42 = vrot.slane %v10498_v26, 4  ;;  %v5738_v41 = vrot.slane %v10505_v37, 4  ;;  %v5197_v19 = vmax.f32 %v5195_v25, %v5196_v40  ;;  %v5201_v30 = vmax.f32 %v5199_v35, %v5200_v51  ;;  %v10511_v38 = vpop.eup %8346  ;;  %v8597_v51 = vld [vmem:[%s9026_s17 + $0x410] sm:$0xff] }
 0x212   : > { %v5206_v52 = vrot.slane %v5205_v59, 2  ;;  %v6164_v62 = vmul.f32 %v8591_v17, %v6007_v31  ;;  %v6165_v29 = vmul.f32 %v8592_v60, %v6007_v31  ;;  %v6166_v49 = vmul.f32 %v8593_v55, %v6007_v31  ;;  %v8602_v17 = vld [vmem:[%s9026_s17 + $0x438] sm:$0xff] }
 0x213   : > { %v6167_v9 = vmul.f32 %v8594_v27, %v6007_v31  ;;  %v5739_v15 = vadd.f32 %v10505_v37, %v5738_v41  ;;  %v5744_v48 = vrot.slane %v10511_v38, 4  ;;  %8358 = vpow2.f32 %v5478_v23  ;;  %v10530_v58 = vpop.f32.mrb[56].mxu0  ;;  %v8598_v31 = vld [vmem:[%s9026_s17 + $0x418] sm:$0xff]  ;;  %v8600_v41 = vld [vmem:[%s9026_s17 + $0x428] sm:$0xff] }
 0x214   : > { %v5376_v56 = vsub.f32 %v10389_v63, %v5197_v19  ;;  %v8349_v13 = vpop.eup %8348  ;;  %6420 = vst [vmem:[%s9804_s4 + $0x3e0] sm:$0xff] %v6164_v62  ;;  %6421 = vst [vmem:[%s9804_s4 + $0x3e8] sm:$0xff] %v6165_v29  ;;  %v5202_v53 = vrot.slane %v5201_v30, 1  ;;  %v5207_v14 = vmax.f32 %v5205_v59, %v5206_v52  ;;  %v10525_v5 = vmax.f32 %v10491_v43, %v5210_v46  ;;  %v10534_v28 = vpop.f32.mrb[56].mxu1  ;;  %v8599_v46 = vld [vmem:[%s9026_s17 + $0x420] sm:$0xff] }
 0x215   : > { %6422 = vst [vmem:[%s9804_s4 + $0x3f0] sm:$0xff] %v6166_v49  ;;  %6423 = vst [vmem:[%s9804_s4 + $0x3f8] sm:$0xff] %v6167_v9  ;;  %v10528_v0 = vmax.f32 %v10498_v26, %v5216_v42  ;;  %v8351_v7 = vpop.eup %8350  ;;  %v6008_v63 = vmul.f32 %v8349_v13, %v10404_v39  ;;  %v5740_v50 = vrot.slane %v5739_v15, 2  ;;  %v5745_v44 = vadd.f32 %v10511_v38, %v5744_v48  ;;  %v7682_v32 = vpop.f32.mrb[57].mxu0  ;;  %v8603_v13 = vld [vmem:[%s9026_s17 + $0x440] sm:$0xff] }
 0x216   : > { %v5480_v6 = vmul.f32 1.442695, %v5376_v56  ;;  %v10536_v1 = vpop.eup %8352  ;;  %v6009_v25 = vmul.f32 %v8351_v7, %v10410_v34  ;;  %v5203_v35 = vmax.f32 %v5201_v30, %v5202_v53  ;;  %v5208_v54 = vrot.slane %v5207_v14, 1  ;;  %v7693_v47 = vpop.f32.mrb[57].mxu1  ;;  %v8601_v30 = vld [vmem:[%s9026_s17 + $0x430] sm:$0xff] }
 0x217   : > { %v5212_v39 = vrot.slane %v10525_v5, 2  ;;  %v6168_v16 = vmul.f32 %v8595_v4, %v6008_v63  ;;  %v6169_v40 = vmul.f32 %v8596_v36, %v6008_v63  ;;  %v6170_v59 = vmul.f32 %v8597_v51, %v6008_v63  ;;  %v8605_v7 = vld [vmem:[%s9026_s17 + $0x450] sm:$0xff] }
 0x218   : > { %v6171_v34 = vmul.f32 %v8598_v31, %v6008_v63  ;;  %v8355_v23 = vpop.eup %8354  ;;  %v6172_v42 = vmul.f32 %v8599_v46, %v6009_v25  ;;  %v6173_v19 = vmul.f32 %v8600_v41, %v6009_v25  ;;  %v6174_v52 = vmul.f32 %v8601_v30, %v6009_v25 }
 0x219   : > { %v6175_v62 = vmul.f32 %v8602_v17, %v6009_v25  ;;  %v10548_v60 = vpop.eup %8356  ;;  %6424 = vst [vmem:[%s9804_s4 + $0x400] sm:$0xff] %v6168_v16  ;;  %6425 = vst [vmem:[%s9804_s4 + $0x408] sm:$0xff] %v6169_v40  ;;  %v6010_v29 = vmul.f32 %v8355_v23, %v10438_v22  ;;  %v5741_v55 = vadd.f32 %v5740_v50, %v5739_v15  ;;  %v5746_v49 = vrot.slane %v5745_v44, 2  ;;  %v8604_v15 = vld [vmem:[%s9026_s17 + $0x448] sm:$0xff]  ;;  %v8606_v50 = vld [vmem:[%s9026_s17 + $0x458] sm:$0xff] }
 0x21a   : > { %6426 = vst [vmem:[%s9804_s4 + $0x410] sm:$0xff] %v6170_v59  ;;  %6427 = vst [vmem:[%s9804_s4 + $0x418] sm:$0xff] %v6171_v34  ;;  %v5750_v27 = vrot.slane %v10536_v1, 4  ;;  %v5756_v9 = vrot.slane %v10548_v60, 4  ;;  %8360 = vpow2.f32 %v5480_v6  ;;  %v5377_v48 = vsub.f32 %v10460_v24, %v5203_v35 }
 0x21b   : > { %6428 = vst [vmem:[%s9804_s4 + $0x420] sm:$0xff] %v6172_v42  ;;  %6429 = vst [vmem:[%s9804_s4 + $0x428] sm:$0xff] %v6173_v19  ;;  %v5209_v56 = vmax.f32 %v5207_v14, %v5208_v54  ;;  %v6176_v22 = vmul.f32 %v8603_v13, %v6010_v29  ;;  %v6177_v53 = vmul.f32 %v8604_v15, %v6010_v29  ;;  %v5742_v25 = vrot.slane %v5741_v55, 1  ;;  %v10568_v24 = vpop.f32.mrb[58].mxu0 }
 0x21c   : > { %6430 = vst [vmem:[%s9804_s4 + $0x430] sm:$0xff] %v6174_v52  ;;  %6431 = vst [vmem:[%s9804_s4 + $0x438] sm:$0xff] %v6175_v62  ;;  %v6178_v63 = vmul.f32 %v8605_v7, %v6010_v29  ;;  %v6179_v32 = vmul.f32 %v8606_v50, %v6010_v29  ;;  %v5747_v47 = vadd.f32 %v5746_v49, %v5745_v44  ;;  %v5482_v35 = vmul.f32 1.442695, %v5377_v48  ;;  %v10579_v44 = vpop.f32.mrb[58].mxu1  ;;  %v7704_v40 = vpop.f32.mrb[59].mxu0 }
 0x21d   : > { %v5751_v4 = vadd.f32 %v10536_v1, %v5750_v27  ;;  %v5757_v6 = vadd.f32 %v10548_v60, %v5756_v9  ;;  %v10570_v14 = vpop.eup %8358  ;;  %6432 = vst [vmem:[%s9804_s4 + $0x440] sm:$0xff] %v6176_v22  ;;  %6433 = vst [vmem:[%s9804_s4 + $0x448] sm:$0xff] %v6177_v53  ;;  %v5378_v54 = vsub.f32 %v10483_v12, %v5209_v56  ;;  %v5218_v36 = vrot.slane %v10528_v0, 2  ;;  %v7715_v23 = vpop.f32.mrb[59].mxu1 }
 0x21e   : > { %6434 = vst [vmem:[%s9804_s4 + $0x450] sm:$0xff] %v6178_v63  ;;  %6435 = vst [vmem:[%s9804_s4 + $0x458] sm:$0xff] %v6179_v32  ;;  %v5213_v16 = vmax.f32 %v10525_v5, %v5212_v39  ;;  %v5743_v51 = vadd.f32 %v5742_v25, %v5741_v55  ;;  %v5748_v59 = vrot.slane %v5747_v47, 1  ;;  %v5762_v46 = vrot.slane %v10570_v14, 4 }
 0x21f   : > { %v5752_v31 = vrot.slane %v5751_v4, 2  ;;  %v5758_v34 = vrot.slane %v5757_v6, 2  ;;  %8362 = vpow2.f32 %v5482_v35  ;;  %v5484_v42 = vmul.f32 1.442695, %v5378_v54 }
 0x220   : > { %v5214_v41 = vrot.slane %v5213_v16, 1  ;;  %8364 = vrcp.f32 %v5743_v51  ;;  %v5749_v19 = vadd.f32 %v5748_v59, %v5747_v47  ;;  %v5763_v5 = vadd.f32 %v10570_v14, %v5762_v46 }
 0x221   : > { %v5753_v12 = vadd.f32 %v5752_v31, %v5751_v4  ;;  %v5759_v30 = vadd.f32 %v5758_v34, %v5757_v6  ;;  %8366 = vpow2.f32 %v5484_v42  ;;  %v5219_v52 = vmax.f32 %v10528_v0, %v5218_v36 }
 0x222   : > { %v5215_v39 = vmax.f32 %v5213_v16, %v5214_v41  ;;  %8368 = vrcp.f32 %v5749_v19  ;;  %v5222_v29 = vrot.slane %v10502_v57, 4  ;;  %v5764_v55 = vrot.slane %v5763_v5, 2 }
 0x223   : > { %v5754_v17 = vrot.slane %v5753_v12, 1  ;;  %v5760_v62 = vrot.slane %v5759_v30, 1  ;;  %v5220_v27 = vrot.slane %v5219_v52, 1  ;;  %v10588_v9 = vadd.f32 %v10342_v20, %v9593_v33  ;;  %v10597_v15 = vpop.f32.mrb[60].mxu0 }
 0x224   : > { %v5379_v49 = vsub.f32 %v10491_v43, %v5215_v39  ;;  %v10590_v48 = vpop.eup %8360  ;;  %v5223_v22 = vmax.f32 %v10502_v57, %v5222_v29  ;;  %v10595_v0 = vadd.f32 %v10344_v21, %v9593_v33  ;;  %v5765_v53 = vadd.f32 %v5764_v55, %v5763_v5  ;;  %v10600_v50 = vpop.f32.mrb[60].mxu1  ;;  %v8607_v29 = vld [vmem:[%s9026_s17 + $0x460] sm:$0xff] }
 0x225   : > { %v5755_v56 = vadd.f32 %v5754_v17, %v5753_v12  ;;  %v5761_v13 = vadd.f32 %v5760_v62, %v5759_v30  ;;  %v5768_v43 = vrot.slane %v10590_v48, 4  ;;  %v5221_v63 = vmax.f32 %v5219_v52, %v5220_v27  ;;  %v7726_v20 = vpop.f32.mrb[61].mxu0  ;;  %v7737_v4 = vpop.f32.mrb[61].mxu1  ;;  %v8609_v27 = vld [vmem:[%s9026_s17 + $0x470] sm:$0xff] }
 0x226   : > { %v5486_v7 = vmul.f32 1.442695, %v5379_v49  ;;  %v5224_v32 = vrot.slane %v5223_v22, 2  ;;  %v5228_v25 = vrot.slane %v10588_v9, 4  ;;  %v5234_v47 = vrot.slane %v10595_v0, 4 }
 0x227   : > { %8370 = vrcp.f32 %v5755_v56  ;;  %v5766_v21 = vrot.slane %v5765_v53, 1  ;;  %v5769_v6 = vadd.f32 %v10590_v48, %v5768_v43  ;;  %v5380_v35 = vsub.f32 %v10498_v26, %v5221_v63 }
 0x228   : > { %8372 = vrcp.f32 %v5761_v13  ;;  %v5225_v54 = vmax.f32 %v5223_v22, %v5224_v32  ;;  %v5229_v16 = vmax.f32 %v10588_v9, %v5228_v25  ;;  %v5235_v36 = vmax.f32 %v10595_v0, %v5234_v47  ;;  %v8610_v13 = vld [vmem:[%s9026_s17 + $0x478] sm:$0xff] }
 0x229   : > { %8374 = vpow2.f32 %v5486_v7  ;;  %v10608_v40 = vpop.eup %8362  ;;  %v5767_v51 = vadd.f32 %v5766_v21, %v5765_v53  ;;  %v5770_v59 = vrot.slane %v5769_v6, 2  ;;  %v5488_v31 = vmul.f32 1.442695, %v5380_v35  ;;  %v8611_v35 = vld [vmem:[%s9026_s17 + $0x480] sm:$0xff] }
 0x22a   : > { %v10612_v34 = vadd.f32 %v10382_v61, %v9593_v33  ;;  %v8365_v23 = vpop.eup %8364  ;;  %v5774_v46 = vrot.slane %v10608_v40, 4  ;;  %v5226_v26 = vrot.slane %v5225_v54, 1  ;;  %v5230_v42 = vrot.slane %v5229_v16, 2 }
 0x22b   : > { %v5236_v41 = vrot.slane %v5235_v36, 2  ;;  %v10615_v19 = vpop.eup %8366  ;;  %v6011_v12 = vmul.f32 %v8365_v23, %v10505_v37  ;;  %8376 = vrcp.f32 %v5767_v51  ;;  %v5771_v30 = vadd.f32 %v5770_v59, %v5769_v6  ;;  %v10621_v62 = vpop.f32.mrb[62].mxu0  ;;  %v8608_v37 = vld [vmem:[%s9026_s17 + $0x468] sm:$0xff] }
 0x22c   : > { %v5240_v5 = vrot.slane %v10612_v34, 4  ;;  %v8369_v61 = vpop.eup %8368  ;;  %v5775_v39 = vadd.f32 %v10608_v40, %v5774_v46  ;;  %v5780_v52 = vrot.slane %v10615_v19, 4  ;;  %8378 = vpow2.f32 %v5488_v31  ;;  %v10627_v53 = vpop.f32.mrb[62].mxu1  ;;  %v8612_v51 = vld [vmem:[%s9026_s17 + $0x488] sm:$0xff]  ;;  %v8613_v31 = vld [vmem:[%s9026_s17 + $0x490] sm:$0xff]  ;;  %v8614_v46 = vld [vmem:[%s9026_s17 + $0x498] sm:$0xff] }
 0x22d   : > { %v5227_v17 = vmax.f32 %v5225_v54, %v5226_v26  ;;  %v6180_v55 = vmul.f32 %v8607_v29, %v6011_v12  ;;  %v6181_v49 = vmul.f32 %v8608_v37, %v6011_v12  ;;  %v6182_v56 = vmul.f32 %v8609_v27, %v6011_v12  ;;  %v7748_v43 = vpop.f32.mrb[63].mxu0  ;;  %v7759_v25 = vpop.f32.mrb[63].mxu1 }
 0x22e   : > { %v6183_v22 = vmul.f32 %v8610_v13, %v6011_v12  ;;  %v6012_v7 = vmul.f32 %v8369_v61, %v10511_v38  ;;  %v5772_v63 = vrot.slane %v5771_v30, 1  ;;  %v5776_v20 = vrot.slane %v5775_v39, 2  ;;  %v8621_v43 = vld [vmem:[%s9026_s17 + $0x4d0] sm:$0xff] }
 0x22f   : > { %v5781_v32 = vadd.f32 %v10615_v19, %v5780_v52  ;;  %6436 = vst [vmem:[%s9804_s4 + $0x460] sm:$0xff] %v6180_v55  ;;  %6437 = vst [vmem:[%s9804_s4 + $0x468] sm:$0xff] %v6181_v49  ;;  %v5381_v47 = vsub.f32 %v10502_v57, %v5227_v17  ;;  %v5231_v4 = vmax.f32 %v5229_v16, %v5230_v42  ;;  %v8617_v55 = vld [vmem:[%s9026_s17 + $0x4b0] sm:$0xff]  ;;  %v8618_v49 = vld [vmem:[%s9026_s17 + $0x4b8] sm:$0xff] }
 0x230   : > { %6438 = vst [vmem:[%s9804_s4 + $0x470] sm:$0xff] %v6182_v56  ;;  %6439 = vst [vmem:[%s9804_s4 + $0x478] sm:$0xff] %v6183_v22  ;;  %v5237_v21 = vmax.f32 %v5235_v36, %v5236_v41  ;;  %v10637_v6 = vmax.f32 %v10612_v34, %v5240_v5  ;;  %v6184_v54 = vmul.f32 %v8611_v35, %v6012_v7  ;;  %v8619_v56 = vld [vmem:[%s9026_s17 + $0x4c0] sm:$0xff] }
 0x231   : > { %v8371_v38 = vpop.eup %8370  ;;  %v6185_v59 = vmul.f32 %v8612_v51, %v6012_v7  ;;  %v6186_v23 = vmul.f32 %v8613_v31, %v6012_v7  ;;  %v6187_v26 = vmul.f32 %v8614_v46, %v6012_v7  ;;  %v5773_v36 = vadd.f32 %v5772_v63, %v5771_v30  ;;  %v8615_v30 = vld [vmem:[%s9026_s17 + $0x4a0] sm:$0xff]  ;;  %v8622_v63 = vld [vmem:[%s9026_s17 + $0x4d8] sm:$0xff] }
 0x232   : > { %v8373_v57 = vpop.eup %8372  ;;  %v6013_v16 = vmul.f32 %v8371_v38, %v10536_v1  ;;  %v5777_v42 = vadd.f32 %v5776_v20, %v5775_v39  ;;  %v5782_v41 = vrot.slane %v5781_v32, 2  ;;  %6440 = vst [vmem:[%s9804_s4 + $0x480] sm:$0xff] %v6184_v54  ;;  %v5490_v61 = vmul.f32 1.442695, %v5381_v47  ;;  %v8616_v39 = vld [vmem:[%s9026_s17 + $0x4a8] sm:$0xff] }
 0x233   : > { %v10644_v12 = vpop.eup %8374  ;;  %6441 = vst [vmem:[%s9804_s4 + $0x488] sm:$0xff] %v6185_v59  ;;  %6442 = vst [vmem:[%s9804_s4 + $0x490] sm:$0xff] %v6186_v23  ;;  %v6014_v5 = vmul.f32 %v8373_v57, %v10548_v60  ;;  %v5232_v52 = vrot.slane %v5231_v4, 1  ;;  %v5238_v1 = vrot.slane %v5237_v21, 1  ;;  %v8620_v60 = vld [vmem:[%s9026_s17 + $0x4c8] sm:$0xff]  ;;  %8380 = vrcp.f32 %v5773_v36  ;;  %v8623_v57 = vld [vmem:[%s9026_s17 + $0x4e0] sm:$0xff] }
 0x234   : > { %6443 = vst [vmem:[%s9804_s4 + $0x498] sm:$0xff] %v6187_v26  ;;  %v6188_v17 = vmul.f32 %v8615_v30, %v6013_v16  ;;  %v6189_v29 = vmul.f32 %v8616_v39, %v6013_v16  ;;  %v6190_v37 = vmul.f32 %v8617_v55, %v6013_v16  ;;  %v6191_v27 = vmul.f32 %v8618_v49, %v6013_v16  ;;  %v8624_v36 = vld [vmem:[%s9026_s17 + $0x4e8] sm:$0xff] }
 0x235   : > { %v6192_v13 = vmul.f32 %v8619_v56, %v6014_v5  ;;  %v6193_v22 = vmul.f32 %v8620_v60, %v6014_v5  ;;  %v6194_v7 = vmul.f32 %v8621_v43, %v6014_v5  ;;  %v6195_v20 = vmul.f32 %v8622_v63, %v6014_v5  ;;  %v8377_v25 = vpop.eup %8376  ;;  %v8625_v5 = vld [vmem:[%s9026_s17 + $0x4f0] sm:$0xff] }
 0x236   : > { %6444 = vst [vmem:[%s9804_s4 + $0x4a0] sm:$0xff] %v6188_v17  ;;  %6445 = vst [vmem:[%s9804_s4 + $0x4a8] sm:$0xff] %v6189_v29  ;;  %v5778_v47 = vrot.slane %v5777_v42, 1  ;;  %v5783_v38 = vadd.f32 %v5782_v41, %v5781_v32  ;;  %v5786_v35 = vrot.slane %v10644_v12, 4  ;;  %v10664_v54 = vpop.eup %8378  ;;  %v6015_v51 = vmul.f32 %v8377_v25, %v10570_v14  ;;  %v8626_v14 = vld [vmem:[%s9026_s17 + $0x4f8] sm:$0xff] }
 0x237   : > { %6446 = vst [vmem:[%s9804_s4 + $0x4b0] sm:$0xff] %v6190_v37  ;;  %6447 = vst [vmem:[%s9804_s4 + $0x4b8] sm:$0xff] %v6191_v27  ;;  %8382 = vpow2.f32 %v5490_v61  ;;  %v5233_v59 = vmax.f32 %v5231_v4, %v5232_v52  ;;  %v5239_v31 = vmax.f32 %v5237_v21, %v5238_v1  ;;  %v5792_v26 = vrot.slane %v10664_v54, 4 }
 0x238   : > { %6448 = vst [vmem:[%s9804_s4 + $0x4c0] sm:$0xff] %v6192_v13  ;;  %6449 = vst [vmem:[%s9804_s4 + $0x4c8] sm:$0xff] %v6193_v22  ;;  %v5779_v23 = vadd.f32 %v5778_v47, %v5777_v42  ;;  %v5784_v46 = vrot.slane %v5783_v38, 1  ;;  %v5787_v32 = vadd.f32 %v10644_v12, %v5786_v35  ;;  %v6196_v16 = vmul.f32 %v8623_v57, %v6015_v51 }
 0x239   : > { %6450 = vst [vmem:[%s9804_s4 + $0x4d0] sm:$0xff] %v6194_v7  ;;  %6451 = vst [vmem:[%s9804_s4 + $0x4d8] sm:$0xff] %v6195_v20  ;;  %v6197_v41 = vmul.f32 %v8624_v36, %v6015_v51  ;;  %v6198_v30 = vmul.f32 %v8625_v5, %v6015_v51  ;;  %v6199_v61 = vmul.f32 %v8626_v14, %v6015_v51  ;;  %v5242_v17 = vrot.slane %v10637_v6, 2 }
 0x23a   : > { %8384 = vrcp.f32 %v5779_v23  ;;  %v5785_v4 = vadd.f32 %v5784_v46, %v5783_v38  ;;  %v5788_v21 = vrot.slane %v5787_v32, 2  ;;  %v5793_v42 = vadd.f32 %v10664_v54, %v5792_v26  ;;  %6452 = vst [vmem:[%s9804_s4 + $0x4e0] sm:$0xff] %v6196_v16  ;;  %v8628_v46 = vld [vmem:[%s9026_s17 + $0x508] sm:$0xff]  ;;  %v8629_v26 = vld [vmem:[%s9026_s17 + $0x510] sm:$0xff] }
 0x23b   : > { %6453 = vst [vmem:[%s9804_s4 + $0x4e8] sm:$0xff] %v6197_v41  ;;  %6454 = vst [vmem:[%s9804_s4 + $0x4f0] sm:$0xff] %v6198_v30  ;;  %v5382_v52 = vsub.f32 %v10588_v9, %v5233_v59  ;;  %v5383_v1 = vsub.f32 %v10595_v0, %v5239_v31  ;;  %v10687_v39 = vadd.f32 %v10391_v2, %v9593_v33  ;;  %v8627_v31 = vld [vmem:[%s9026_s17 + $0x500] sm:$0xff] }
 0x23c   : > { %6455 = vst [vmem:[%s9804_s4 + $0x4f8] sm:$0xff] %v6199_v61  ;;  %8386 = vrcp.f32 %v5785_v4  ;;  %v5789_v29 = vadd.f32 %v5788_v21, %v5787_v32  ;;  %v5794_v55 = vrot.slane %v5793_v42, 2  ;;  %v10691_v37 = vadd.f32 %v10422_v18, %v9593_v33 }
 0x23d   : > { %v5492_v49 = vmul.f32 1.442695, %v5382_v52  ;;  %v5494_v27 = vmul.f32 1.442695, %v5383_v1  ;;  %v5243_v56 = vmax.f32 %v10637_v6, %v5242_v17  ;;  %v5246_v9 = vrot.slane %v10687_v39, 4  ;;  %v8381_v6 = vpop.eup %8380 }
 0x23e   : > { %v5790_v0 = vrot.slane %v5789_v29, 1  ;;  %v5795_v13 = vadd.f32 %v5794_v55, %v5793_v42  ;;  %v5252_v60 = vrot.slane %v10691_v37, 4  ;;  %v10698_v2 = vadd.f32 %v10429_v10, %v9593_v33 }
 0x23f   : > { %8388 = vpow2.f32 %v5492_v49  ;;  %v5244_v22 = vrot.slane %v5243_v56, 1  ;;  %v5247_v43 = vmax.f32 %v10687_v39, %v5246_v9  ;;  %v10703_v18 = vadd.f32 %v10462_v8, %v9593_v33  ;;  %v8634_v9 = vld [vmem:[%s9026_s17 + $0x538] sm:$0xff] }
 0x240   : > { %v5791_v7 = vadd.f32 %v5790_v0, %v5789_v29  ;;  %v5796_v63 = vrot.slane %v5795_v13, 1  ;;  %8390 = vpow2.f32 %v5494_v27  ;;  %v5253_v20 = vmax.f32 %v10691_v37, %v5252_v60  ;;  %v8631_v29 = vld [vmem:[%s9026_s17 + $0x520] sm:$0xff]  ;;  %v8633_v27 = vld [vmem:[%s9026_s17 + $0x530] sm:$0xff] }
 0x241   : > { %v10706_v10 = vpop.eup %8382  ;;  %v6016_v25 = vmul.f32 %v8381_v6, %v10590_v48  ;;  %v5245_v47 = vmax.f32 %v5243_v56, %v5244_v22  ;;  %v5248_v38 = vrot.slane %v5247_v43, 2  ;;  %v5258_v35 = vrot.slane %v10698_v2, 4  ;;  %v8630_v48 = vld [vmem:[%s9026_s17 + $0x518] sm:$0xff] }
 0x242   : > { %8392 = vrcp.f32 %v5791_v7  ;;  %v5797_v8 = vadd.f32 %v5796_v63, %v5795_v13  ;;  %v5798_v51 = vrot.slane %v10706_v10, 4  ;;  %v5254_v59 = vrot.slane %v5253_v20, 2 }
 0x243   : > { %v6200_v23 = vmul.f32 %v8627_v31, %v6016_v25  ;;  %v6201_v32 = vmul.f32 %v8628_v46, %v6016_v25  ;;  %v6202_v57 = vmul.f32 %v8629_v26, %v6016_v25  ;;  %v6203_v16 = vmul.f32 %v8630_v48, %v6016_v25 }
 0x244   : > { %v8385_v36 = vpop.eup %8384  ;;  %8394 = vrcp.f32 %v5797_v8  ;;  %v5799_v41 = vadd.f32 %v10706_v10, %v5798_v51  ;;  %v5384_v5 = vsub.f32 %v10612_v34, %v5245_v47  ;;  %v5249_v30 = vmax.f32 %v5247_v43, %v5248_v38  ;;  %v8636_v47 = vld [vmem:[%s9026_s17 + $0x548] sm:$0xff]  ;;  %v8638_v51 = vld [vmem:[%s9026_s17 + $0x558] sm:$0xff] }
 0x245   : > { %6456 = vst [vmem:[%s9804_s4 + $0x500] sm:$0xff] %v6200_v23  ;;  %6457 = vst [vmem:[%s9804_s4 + $0x508] sm:$0xff] %v6201_v32  ;;  %v6017_v14 = vmul.f32 %v8385_v36, %v10608_v40  ;;  %v5255_v61 = vmax.f32 %v5253_v20, %v5254_v59  ;;  %v5259_v4 = vmax.f32 %v10698_v2, %v5258_v35  ;;  %v5264_v21 = vrot.slane %v10703_v18, 4  ;;  %v8632_v40 = vld [vmem:[%s9026_s17 + $0x528] sm:$0xff]  ;;  %v8635_v20 = vld [vmem:[%s9026_s17 + $0x540] sm:$0xff] }
 0x246   : > { %6458 = vst [vmem:[%s9804_s4 + $0x510] sm:$0xff] %v6202_v57  ;;  %6459 = vst [vmem:[%s9804_s4 + $0x518] sm:$0xff] %v6203_v16  ;;  %v8387_v42 = vpop.eup %8386  ;;  %v5800_v52 = vrot.slane %v5799_v41, 2  ;;  %v5496_v1 = vmul.f32 1.442695, %v5384_v5  ;;  %v5250_v34 = vrot.slane %v5249_v30, 1  ;;  %v10726_v17 = vadd.f32 %v10464_v11, %v9593_v33 }
 0x247   : > { %v6204_v55 = vmul.f32 %v8631_v29, %v6017_v14  ;;  %v6205_v49 = vmul.f32 %v8632_v40, %v6017_v14  ;;  %v6206_v56 = vmul.f32 %v8633_v27, %v6017_v14  ;;  %v6207_v0 = vmul.f32 %v8634_v9, %v6017_v14  ;;  %v8637_v35 = vld [vmem:[%s9026_s17 + $0x550] sm:$0xff]  ;;  %v8642_v40 = vld [vmem:[%s9026_s17 + $0x578] sm:$0xff] }
 0x248   : > { %v6018_v13 = vmul.f32 %v8387_v42, %v10615_v19  ;;  %v5801_v60 = vadd.f32 %v5800_v52, %v5799_v41  ;;  %8396 = vpow2.f32 %v5496_v1  ;;  %v5251_v22 = vmax.f32 %v5249_v30, %v5250_v34  ;;  %v8639_v52 = vld [vmem:[%s9026_s17 + $0x560] sm:$0xff]  ;;  %v8640_v34 = vld [vmem:[%s9026_s17 + $0x568] sm:$0xff] }
 0x249   : > { %v10733_v11 = vpop.eup %8388  ;;  %6460 = vst [vmem:[%s9804_s4 + $0x520] sm:$0xff] %v6204_v55  ;;  %6461 = vst [vmem:[%s9804_s4 + $0x528] sm:$0xff] %v6205_v49  ;;  %v5256_v43 = vrot.slane %v5255_v61, 1  ;;  %v5260_v6 = vrot.slane %v5259_v4, 2  ;;  %v5265_v7 = vmax.f32 %v10703_v18, %v5264_v21  ;;  %v5270_v63 = vrot.slane %v10726_v17, 4 }
 0x24a   : > { %6462 = vst [vmem:[%s9804_s4 + $0x530] sm:$0xff] %v6206_v56  ;;  %6463 = vst [vmem:[%s9804_s4 + $0x538] sm:$0xff] %v6207_v0  ;;  %v10741_v19 = vpop.eup %8390  ;;  %v6208_v25 = vmul.f32 %v8635_v20, %v6018_v13  ;;  %v6209_v38 = vmul.f32 %v8636_v47, %v6018_v13  ;;  %v6210_v8 = vmul.f32 %v8637_v35, %v6018_v13  ;;  %v5802_v31 = vrot.slane %v5801_v60, 1  ;;  %v8646_v20 = vld [vmem:[%s9026_s17 + $0x598] sm:$0xff] }
 0x24b   : > { %v6211_v59 = vmul.f32 %v8638_v51, %v6018_v13  ;;  %v5804_v23 = vrot.slane %v10733_v11, 4  ;;  %v5810_v46 = vrot.slane %v10741_v19, 4  ;;  %v5385_v32 = vsub.f32 %v10687_v39, %v5251_v22 }
 0x24c   : > { %v8393_v26 = vpop.eup %8392  ;;  %6464 = vst [vmem:[%s9804_s4 + $0x540] sm:$0xff] %v6208_v25  ;;  %6465 = vst [vmem:[%s9804_s4 + $0x548] sm:$0xff] %v6209_v38  ;;  %v5257_v57 = vmax.f32 %v5255_v61, %v5256_v43  ;;  %v5261_v48 = vmax.f32 %v5259_v4, %v5260_v6  ;;  %v5266_v16 = vrot.slane %v5265_v7, 2  ;;  %v5271_v36 = vmax.f32 %v10726_v17, %v5270_v63  ;;  %v8644_v43 = vld [vmem:[%s9026_s17 + $0x588] sm:$0xff] }
 0x24d   : > { %6466 = vst [vmem:[%s9804_s4 + $0x550] sm:$0xff] %v6210_v8  ;;  %6467 = vst [vmem:[%s9804_s4 + $0x558] sm:$0xff] %v6211_v59  ;;  %v6019_v41 = vmul.f32 %v8393_v26, %v10644_v12  ;;  %v5803_v5 = vadd.f32 %v5802_v31, %v5801_v60  ;;  %v5805_v30 = vadd.f32 %v10733_v11, %v5804_v23  ;;  %v5498_v21 = vmul.f32 1.442695, %v5385_v32  ;;  %v8641_v12 = vld [vmem:[%s9026_s17 + $0x570] sm:$0xff] }
 0x24e   : > { %v5811_v39 = vadd.f32 %v10741_v19, %v5810_v46  ;;  %v8395_v14 = vpop.eup %8394  ;;  %v5386_v42 = vsub.f32 %v10691_v37, %v5257_v57  ;;  %v5262_v61 = vrot.slane %v5261_v48, 1  ;;  %v5267_v4 = vmax.f32 %v5265_v7, %v5266_v16  ;;  %v8645_v7 = vld [vmem:[%s9026_s17 + $0x590] sm:$0xff] }
 0x24f   : > { %v6212_v1 = vmul.f32 %v8639_v52, %v6019_v41  ;;  %v6213_v29 = vmul.f32 %v8640_v34, %v6019_v41  ;;  %v6214_v55 = vmul.f32 %v8641_v12, %v6019_v41  ;;  %v6215_v49 = vmul.f32 %v8642_v40, %v6019_v41 }
 0x250   : > { %v6020_v27 = vmul.f32 %v8395_v14, %v10664_v54  ;;  %8398 = vrcp.f32 %v5803_v5  ;;  %v5806_v37 = vrot.slane %v5805_v30, 2  ;;  %v5812_v56 = vrot.slane %v5811_v39, 2  ;;  %v8643_v54 = vld [vmem:[%s9026_s17 + $0x580] sm:$0xff] }
 0x251   : > { %6468 = vst [vmem:[%s9804_s4 + $0x560] sm:$0xff] %v6212_v1  ;;  %6469 = vst [vmem:[%s9804_s4 + $0x568] sm:$0xff] %v6213_v29  ;;  %8400 = vpow2.f32 %v5498_v21  ;;  %v5500_v9 = vmul.f32 1.442695, %v5386_v42  ;;  %v5263_v0 = vmax.f32 %v5261_v48, %v5262_v61  ;;  %v5268_v13 = vrot.slane %v5267_v4, 1 }
 0x252   : > { %6470 = vst [vmem:[%s9804_s4 + $0x570] sm:$0xff] %v6214_v55  ;;  %6471 = vst [vmem:[%s9804_s4 + $0x578] sm:$0xff] %v6215_v49  ;;  %v10768_v60 = vpop.eup %8396  ;;  %v6216_v22 = vmul.f32 %v8643_v54, %v6020_v27  ;;  %v6217_v6 = vmul.f32 %v8644_v43, %v6020_v27  ;;  %v6218_v63 = vmul.f32 %v8645_v7, %v6020_v27  ;;  %v5272_v59 = vrot.slane %v5271_v36, 2 }
 0x253   : > { %v6219_v25 = vmul.f32 %v8646_v20, %v6020_v27  ;;  %v5807_v47 = vadd.f32 %v5806_v37, %v5805_v30  ;;  %v5813_v38 = vadd.f32 %v5812_v56, %v5811_v39  ;;  %v5816_v35 = vrot.slane %v10768_v60, 4  ;;  %v8647_v27 = vld [vmem:[%s9026_s17 + $0x5a0] sm:$0xff]  ;;  %v8648_v56 = vld [vmem:[%s9026_s17 + $0x5a8] sm:$0xff] }
 0x254   : > { %8402 = vpow2.f32 %v5500_v9  ;;  %6472 = vst [vmem:[%s9804_s4 + $0x580] sm:$0xff] %v6216_v22  ;;  %6473 = vst [vmem:[%s9804_s4 + $0x588] sm:$0xff] %v6217_v6  ;;  %v5387_v8 = vsub.f32 %v10698_v2, %v5263_v0  ;;  %v5269_v51 = vmax.f32 %v5267_v4, %v5268_v13  ;;  %v10782_v31 = vadd.f32 %v10485_v45, %v9593_v33  ;;  %v8649_v9 = vld [vmem:[%s9026_s17 + $0x5b0] sm:$0xff]  ;;  %v8650_v13 = vld [vmem:[%s9026_s17 + $0x5b8] sm:$0xff] }
 0x255   : > { %6474 = vst [vmem:[%s9804_s4 + $0x590] sm:$0xff] %v6218_v63  ;;  %6475 = vst [vmem:[%s9804_s4 + $0x598] sm:$0xff] %v6219_v25  ;;  %v5808_v23 = vrot.slane %v5807_v47, 1  ;;  %v5814_v46 = vrot.slane %v5813_v38, 1  ;;  %v5817_v32 = vadd.f32 %v10768_v60, %v5816_v35  ;;  %v10787_v26 = vadd.f32 %v10493_v3, %v9593_v33 }
 0x256   : > { %v5502_v57 = vmul.f32 1.442695, %v5387_v8  ;;  %v5388_v48 = vsub.f32 %v10703_v18, %v5269_v51  ;;  %v5273_v16 = vmax.f32 %v5271_v36, %v5272_v59  ;;  %v5276_v2 = vrot.slane %v10782_v31, 4 }
 0x257   : > { %v5809_v41 = vadd.f32 %v5808_v23, %v5807_v47  ;;  %v5815_v5 = vadd.f32 %v5814_v46, %v5813_v38  ;;  %v5818_v30 = vrot.slane %v5817_v32, 2  ;;  %v5282_v45 = vrot.slane %v10787_v26, 4 }
 0x258   : > { %8404 = vpow2.f32 %v5502_v57  ;;  %v5504_v39 = vmul.f32 1.442695, %v5388_v48  ;;  %v5274_v14 = vrot.slane %v5273_v16, 1  ;;  %v5277_v21 = vmax.f32 %v10782_v31, %v5276_v2 }
 0x259   : > { %8406 = vrcp.f32 %v5809_v41  ;;  %v5819_v42 = vadd.f32 %v5818_v30, %v5817_v32  ;;  %v5283_v3 = vmax.f32 %v10787_v26, %v5282_v45  ;;  %v10796_v18 = vadd.f32 %v10530_v58, %v9593_v33 }
 0x25a   : > { %v8399_v36 = vpop.eup %8398  ;;  %8408 = vrcp.f32 %v5815_v5  ;;  %v5275_v61 = vmax.f32 %v5273_v16, %v5274_v14  ;;  %v5278_v4 = vrot.slane %v5277_v21, 2  ;;  %v10800_v52 = vadd.f32 %v10534_v28, %v9593_v33 }
 0x25b   : > { %v10802_v1 = vpop.eup %8400  ;;  %v6021_v34 = vmul.f32 %v8399_v36, %v10706_v10  ;;  %v5820_v29 = vrot.slane %v5819_v42, 1  ;;  %8410 = vpow2.f32 %v5504_v39  ;;  %v5284_v58 = vrot.slane %v5283_v3, 2 }
 0x25c   : > { %v5822_v12 = vrot.slane %v10802_v1, 4  ;;  %v5389_v55 = vsub.f32 %v10726_v17, %v5275_v61  ;;  %v5279_v40 = vmax.f32 %v5277_v21, %v5278_v4  ;;  %v5288_v49 = vrot.slane %v10796_v18, 4  ;;  %v8651_v4 = vld [vmem:[%s9026_s17 + $0x5c0] sm:$0xff] }
 0x25d   : > { %v6220_v37 = vmul.f32 %v8647_v27, %v6021_v34  ;;  %v6221_v10 = vmul.f32 %v8648_v56, %v6021_v34  ;;  %v6222_v0 = vmul.f32 %v8649_v9, %v6021_v34  ;;  %v6223_v54 = vmul.f32 %v8650_v13, %v6021_v34  ;;  %v8656_v27 = vld [vmem:[%s9026_s17 + $0x5e8] sm:$0xff] }
 0x25e   : > { %v10808_v28 = vpop.eup %8402  ;;  %v5821_v22 = vadd.f32 %v5820_v29, %v5819_v42  ;;  %v5823_v17 = vadd.f32 %v10802_v1, %v5822_v12  ;;  %v5506_v6 = vmul.f32 1.442695, %v5389_v55  ;;  %v5280_v7 = vrot.slane %v5279_v40, 1  ;;  %v8654_v55 = vld [vmem:[%s9026_s17 + $0x5d8] sm:$0xff] }
 0x25f   : > { %v5828_v43 = vrot.slane %v10808_v28, 4  ;;  %6476 = vst [vmem:[%s9804_s4 + $0x5a0] sm:$0xff] %v6220_v37  ;;  %6477 = vst [vmem:[%s9804_s4 + $0x5a8] sm:$0xff] %v6221_v10  ;;  %v5285_v63 = vmax.f32 %v5283_v3, %v5284_v58  ;;  %v5289_v20 = vmax.f32 %v10796_v18, %v5288_v49  ;;  %v5294_v25 = vrot.slane %v10800_v52, 4  ;;  %v8653_v58 = vld [vmem:[%s9026_s17 + $0x5d0] sm:$0xff]  ;;  %v8658_v10 = vld [vmem:[%s9026_s17 + $0x5f8] sm:$0xff] }
 0x260   : > { %6478 = vst [vmem:[%s9804_s4 + $0x5b0] sm:$0xff] %v6222_v0  ;;  %6479 = vst [vmem:[%s9804_s4 + $0x5b8] sm:$0xff] %v6223_v54  ;;  %8412 = vrcp.f32 %v5821_v22  ;;  %v5824_v47 = vrot.slane %v5823_v17, 2  ;;  %v10825_v35 = vadd.f32 %v10568_v24, %v9593_v33  ;;  %v5281_v8 = vmax.f32 %v5279_v40, %v5280_v7 }
 0x261   : > { %v5829_v38 = vadd.f32 %v10808_v28, %v5828_v43  ;;  %8414 = vpow2.f32 %v5506_v6  ;;  %v5286_v51 = vrot.slane %v5285_v63, 1  ;;  %v5290_v59 = vrot.slane %v5289_v20, 2 }
 0x262   : > { %v10827_v23 = vpop.eup %8404  ;;  %v5825_v46 = vadd.f32 %v5824_v47, %v5823_v17  ;;  %v5295_v57 = vmax.f32 %v10800_v52, %v5294_v25  ;;  %v5300_v48 = vrot.slane %v10825_v35, 4  ;;  %v5390_v24 = vsub.f32 %v10782_v31, %v5281_v8 }
 0x263   : > { %v5830_v32 = vrot.slane %v5829_v38, 2  ;;  %v8407_v16 = vpop.eup %8406  ;;  %v5834_v2 = vrot.slane %v10827_v23, 4  ;;  %v5287_v41 = vmax.f32 %v5285_v63, %v5286_v51  ;;  %v5291_v5 = vmax.f32 %v5289_v20, %v5290_v59 }
 0x264   : > { %v8409_v30 = vpop.eup %8408  ;;  %v6022_v45 = vmul.f32 %v8407_v16, %v10733_v11  ;;  %v5826_v39 = vrot.slane %v5825_v46, 1  ;;  %v5296_v21 = vrot.slane %v5295_v57, 2  ;;  %v5508_v31 = vmul.f32 1.442695, %v5390_v24  ;;  %v8652_v11 = vld [vmem:[%s9026_s17 + $0x5c8] sm:$0xff] }
 0x265   : > { %v5831_v14 = vadd.f32 %v5830_v32, %v5829_v38  ;;  %v10834_v42 = vpop.eup %8410  ;;  %v6023_v3 = vmul.f32 %v8409_v30, %v10741_v19  ;;  %v5835_v36 = vadd.f32 %v10827_v23, %v5834_v2  ;;  %v5391_v61 = vsub.f32 %v10787_v26, %v5287_v41  ;;  %v8655_v19 = vld [vmem:[%s9026_s17 + $0x5e0] sm:$0xff]  ;;  %v8657_v26 = vld [vmem:[%s9026_s17 + $0x5f0] sm:$0xff]  ;;  %v8660_v2 = vld [vmem:[%s9026_s17 + $0x608] sm:$0xff] }
 0x266   : > { %v6224_v34 = vmul.f32 %v8651_v4, %v6022_v45  ;;  %v6225_v29 = vmul.f32 %v8652_v11, %v6022_v45  ;;  %v6226_v12 = vmul.f32 %v8653_v58, %v6022_v45  ;;  %v6227_v40 = vmul.f32 %v8654_v55, %v6022_v45  ;;  %v8661_v41 = vld [vmem:[%s9026_s17 + $0x610] sm:$0xff]  ;;  %v8662_v45 = vld [vmem:[%s9026_s17 + $0x618] sm:$0xff] }
 0x267   : > { %v6228_v49 = vmul.f32 %v8655_v19, %v6023_v3  ;;  %v6229_v37 = vmul.f32 %v8656_v27, %v6023_v3  ;;  %v6230_v56 = vmul.f32 %v8657_v26, %v6023_v3  ;;  %v6231_v9 = vmul.f32 %v8658_v10, %v6023_v3 }
 0x268   : > { %6480 = vst [vmem:[%s9804_s4 + $0x5c0] sm:$0xff] %v6224_v34  ;;  %6481 = vst [vmem:[%s9804_s4 + $0x5c8] sm:$0xff] %v6225_v29  ;;  %v5827_v0 = vadd.f32 %v5826_v39, %v5825_v46  ;;  %v5832_v13 = vrot.slane %v5831_v14, 1  ;;  %v5836_v54 = vrot.slane %v5835_v36, 2  ;;  %v5840_v22 = vrot.slane %v10834_v42, 4 }
 0x269   : > { %6482 = vst [vmem:[%s9804_s4 + $0x5d0] sm:$0xff] %v6226_v12  ;;  %6483 = vst [vmem:[%s9804_s4 + $0x5d8] sm:$0xff] %v6227_v40  ;;  %8416 = vpow2.f32 %v5508_v31  ;;  %v5510_v17 = vmul.f32 1.442695, %v5391_v61  ;;  %v5292_v43 = vrot.slane %v5291_v5, 1  ;;  %v5297_v6 = vmax.f32 %v5295_v57, %v5296_v21  ;;  %v8659_v57 = vld [vmem:[%s9026_s17 + $0x600] sm:$0xff] }
 0x26a   : > { %6484 = vst [vmem:[%s9804_s4 + $0x5e0] sm:$0xff] %v6228_v49  ;;  %6485 = vst [vmem:[%s9804_s4 + $0x5e8] sm:$0xff] %v6229_v37  ;;  %v8413_v7 = vpop.eup %8412  ;;  %8418 = vrcp.f32 %v5827_v0  ;;  %v5833_v63 = vadd.f32 %v5832_v13, %v5831_v14  ;;  %v5837_v20 = vadd.f32 %v5836_v54, %v5835_v36  ;;  %v5841_v25 = vadd.f32 %v10834_v42, %v5840_v22 }
 0x26b   : > { %6486 = vst [vmem:[%s9804_s4 + $0x5f0] sm:$0xff] %v6230_v56  ;;  %6487 = vst [vmem:[%s9804_s4 + $0x5f8] sm:$0xff] %v6231_v9  ;;  %v10857_v47 = vpop.eup %8414  ;;  %v6024_v38 = vmul.f32 %v8413_v7, %v10768_v60  ;;  %8420 = vpow2.f32 %v5510_v17  ;;  %v5293_v8 = vmax.f32 %v5291_v5, %v5292_v43  ;;  %v5298_v51 = vrot.slane %v5297_v6, 1 }
 0x26c   : > { %8422 = vrcp.f32 %v5833_v63  ;;  %v5838_v59 = vrot.slane %v5837_v20, 1  ;;  %v5842_v46 = vrot.slane %v5841_v25, 2  ;;  %v5846_v32 = vrot.slane %v10857_v47, 4  ;;  %v8664_v63 = vld [vmem:[%s9026_s17 + $0x628] sm:$0xff] }
 0x26d   : > { %v6232_v16 = vmul.f32 %v8659_v57, %v6024_v38  ;;  %v6233_v24 = vmul.f32 %v8660_v2, %v6024_v38  ;;  %v6234_v30 = vmul.f32 %v8661_v41, %v6024_v38  ;;  %v6235_v60 = vmul.f32 %v8662_v45, %v6024_v38  ;;  %v8666_v38 = vld [vmem:[%s9026_s17 + $0x638] sm:$0xff] }
 0x26e   : > { %v5839_v39 = vadd.f32 %v5838_v59, %v5837_v20  ;;  %v5843_v5 = vadd.f32 %v5842_v46, %v5841_v25  ;;  %v5847_v14 = vadd.f32 %v10857_v47, %v5846_v32  ;;  %v5392_v21 = vsub.f32 %v10796_v18, %v5293_v8  ;;  %v8665_v25 = vld [vmem:[%s9026_s17 + $0x630] sm:$0xff] }
 0x26f   : > { %6488 = vst [vmem:[%s9804_s4 + $0x600] sm:$0xff] %v6232_v16  ;;  %6489 = vst [vmem:[%s9804_s4 + $0x608] sm:$0xff] %v6233_v24  ;;  %v5299_v3 = vmax.f32 %v5297_v6, %v5298_v51  ;;  %v5301_v36 = vmax.f32 %v10825_v35, %v5300_v48  ;;  %v10876_v31 = vadd.f32 %v10579_v44, %v9593_v33  ;;  %v8663_v6 = vld [vmem:[%s9026_s17 + $0x620] sm:$0xff] }
 0x270   : > { %6490 = vst [vmem:[%s9804_s4 + $0x610] sm:$0xff] %v6234_v30  ;;  %6491 = vst [vmem:[%s9804_s4 + $0x618] sm:$0xff] %v6235_v60  ;;  %v10880_v61 = vadd.f32 %v10597_v15, %v9593_v33  ;;  %8424 = vrcp.f32 %v5839_v39  ;;  %v5844_v4 = vrot.slane %v5843_v5, 1  ;;  %v5848_v18 = vrot.slane %v5847_v14, 2  ;;  %v8668_v30 = vld [vmem:[%s9026_s17 + $0x648] sm:$0xff]  ;;  %v8669_v60 = vld [vmem:[%s9026_s17 + $0x650] sm:$0xff] }
 0x271   : > { %v5512_v34 = vmul.f32 1.442695, %v5392_v21  ;;  %v5393_v11 = vsub.f32 %v10800_v52, %v5299_v3  ;;  %v5302_v29 = vrot.slane %v5301_v36, 2  ;;  %v5306_v58 = vrot.slane %v10876_v31, 4 }
 0x272   : > { %v5312_v12 = vrot.slane %v10880_v61, 4  ;;  %v5845_v48 = vadd.f32 %v5844_v4, %v5843_v5  ;;  %v5849_v55 = vadd.f32 %v5848_v18, %v5847_v14  ;;  %v10887_v44 = vadd.f32 %v10600_v50, %v9593_v33  ;;  %v8670_v5 = vld [vmem:[%s9026_s17 + $0x658] sm:$0xff] }
 0x273   : > { %8426 = vpow2.f32 %v5512_v34  ;;  %v10889_v15 = vpop.eup %8416  ;;  %v5514_v40 = vmul.f32 1.442695, %v5393_v11  ;;  %v5303_v19 = vmax.f32 %v5301_v36, %v5302_v29  ;;  %v5307_v49 = vmax.f32 %v10876_v31, %v5306_v58 }
 0x274   : > { %v5313_v52 = vmax.f32 %v10880_v61, %v5312_v12  ;;  %v8419_v27 = vpop.eup %8418  ;;  %8428 = vrcp.f32 %v5845_v48  ;;  %v5850_v37 = vrot.slane %v5849_v55, 1  ;;  %v5852_v26 = vrot.slane %v10889_v15, 4 }
 0x275   : > { %v5318_v56 = vrot.slane %v10887_v44, 4  ;;  %v10895_v50 = vpop.eup %8420  ;;  %v6025_v10 = vmul.f32 %v8419_v27, %v10802_v1  ;;  %8430 = vpow2.f32 %v5514_v40  ;;  %v5304_v9 = vrot.slane %v5303_v19, 1 }
 0x276   : > { %v5308_v0 = vrot.slane %v5307_v49, 2  ;;  %v8423_v13 = vpop.eup %8422  ;;  %v5851_v54 = vadd.f32 %v5850_v37, %v5849_v55  ;;  %v5853_v22 = vadd.f32 %v10889_v15, %v5852_v26  ;;  %v5858_v17 = vrot.slane %v10895_v50, 4  ;;  %v8673_v55 = vld [vmem:[%s9026_s17 + $0x670] sm:$0xff] }
 0x277   : > { %v5314_v43 = vrot.slane %v5313_v52, 2  ;;  %v6236_v7 = vmul.f32 %v8663_v6, %v6025_v10  ;;  %v6237_v20 = vmul.f32 %v8664_v63, %v6025_v10  ;;  %v6238_v1 = vmul.f32 %v8665_v25, %v6025_v10  ;;  %v8675_v6 = vld [vmem:[%s9026_s17 + $0x680] sm:$0xff]  ;;  %v8676_v63 = vld [vmem:[%s9026_s17 + $0x688] sm:$0xff]  ;;  %v8677_v25 = vld [vmem:[%s9026_s17 + $0x690] sm:$0xff] }
 0x278   : > { %v6239_v8 = vmul.f32 %v8666_v38, %v6025_v10  ;;  %v6026_v51 = vmul.f32 %v8423_v13, %v10808_v28  ;;  %8432 = vrcp.f32 %v5851_v54  ;;  %v5854_v59 = vrot.slane %v5853_v22, 2  ;;  %v8667_v28 = vld [vmem:[%s9026_s17 + $0x640] sm:$0xff] }
 0x279   : > { %v5859_v46 = vadd.f32 %v10895_v50, %v5858_v17  ;;  %6492 = vst [vmem:[%s9804_s4 + $0x620] sm:$0xff] %v6236_v7  ;;  %6493 = vst [vmem:[%s9804_s4 + $0x628] sm:$0xff] %v6237_v20  ;;  %v5305_v32 = vmax.f32 %v5303_v19, %v5304_v9  ;;  %v5309_v57 = vmax.f32 %v5307_v49, %v5308_v0  ;;  %v8674_v19 = vld [vmem:[%s9026_s17 + $0x678] sm:$0xff] }
 0x27a   : > { %6494 = vst [vmem:[%s9804_s4 + $0x630] sm:$0xff] %v6238_v1  ;;  %6495 = vst [vmem:[%s9804_s4 + $0x638] sm:$0xff] %v6239_v8  ;;  %v5315_v16 = vmax.f32 %v5313_v52, %v5314_v43  ;;  %v5319_v2 = vmax.f32 %v10887_v44, %v5318_v56  ;;  %v8425_v24 = vpop.eup %8424  ;;  %v6240_v41 = vmul.f32 %v8667_v28, %v6026_v51 }
 0x27b   : > { %v6241_v45 = vmul.f32 %v8668_v30, %v6026_v51  ;;  %v6242_v39 = vmul.f32 %v8669_v60, %v6026_v51  ;;  %v6243_v14 = vmul.f32 %v8670_v5, %v6026_v51  ;;  %v6027_v21 = vmul.f32 %v8425_v24, %v10827_v23  ;;  %v8671_v23 = vld [vmem:[%s9026_s17 + $0x660] sm:$0xff] }
 0x27c   : > { %v5855_v3 = vadd.f32 %v5854_v59, %v5853_v22  ;;  %v5860_v36 = vrot.slane %v5859_v46, 2  ;;  %v5394_v4 = vsub.f32 %v10825_v35, %v5305_v32  ;;  %6496 = vst [vmem:[%s9804_s4 + $0x640] sm:$0xff] %v6240_v41  ;;  %v5310_v34 = vrot.slane %v5309_v57, 1  ;;  %v8672_v35 = vld [vmem:[%s9026_s17 + $0x668] sm:$0xff]  ;;  %v8679_v41 = vld [vmem:[%s9026_s17 + $0x6a0] sm:$0xff] }
 0x27d   : > { %v10917_v18 = vpop.eup %8426  ;;  %6497 = vst [vmem:[%s9804_s4 + $0x648] sm:$0xff] %v6241_v45  ;;  %6498 = vst [vmem:[%s9804_s4 + $0x650] sm:$0xff] %v6242_v39  ;;  %v5316_v11 = vrot.slane %v5315_v16, 1  ;;  %v5320_v29 = vrot.slane %v5319_v2, 2  ;;  %v10925_v58 = vadd.f32 %v10621_v62, %v9593_v33  ;;  %v6244_v12 = vmul.f32 %v8671_v23, %v6027_v21  ;;  %v8680_v45 = vld [vmem:[%s9026_s17 + $0x6a8] sm:$0xff]  ;;  %v8681_v39 = vld [vmem:[%s9026_s17 + $0x6b0] sm:$0xff] }
 0x27e   : > { %6499 = vst [vmem:[%s9804_s4 + $0x658] sm:$0xff] %v6243_v14  ;;  %v6245_v48 = vmul.f32 %v8672_v35, %v6027_v21  ;;  %v6246_v40 = vmul.f32 %v8673_v55, %v6027_v21  ;;  %v6247_v49 = vmul.f32 %v8674_v19, %v6027_v21  ;;  %v8429_v52 = vpop.eup %8428  ;;  %v5856_v27 = vrot.slane %v5855_v3, 1 }
 0x27f   : > { %v5861_v37 = vadd.f32 %v5860_v36, %v5859_v46  ;;  %v5864_v26 = vrot.slane %v10917_v18, 4  ;;  %v5516_v56 = vmul.f32 1.442695, %v5394_v4  ;;  %v10932_v62 = vpop.eup %8430  ;;  %6500 = vst [vmem:[%s9804_s4 + $0x660] sm:$0xff] %v6244_v12  ;;  %v6028_v10 = vmul.f32 %v8429_v52, %v10834_v42  ;;  %v8678_v42 = vld [vmem:[%s9026_s17 + $0x698] sm:$0xff] }
 0x280   : > { %6501 = vst [vmem:[%s9804_s4 + $0x668] sm:$0xff] %v6245_v48  ;;  %6502 = vst [vmem:[%s9804_s4 + $0x670] sm:$0xff] %v6246_v40  ;;  %v5311_v9 = vmax.f32 %v5309_v57, %v5310_v34  ;;  %v5317_v0 = vmax.f32 %v5315_v16, %v5316_v11  ;;  %v5321_v13 = vmax.f32 %v5319_v2, %v5320_v29  ;;  %v5870_v43 = vrot.slane %v10932_v62, 4 }
 0x281   : > { %6503 = vst [vmem:[%s9804_s4 + $0x678] sm:$0xff] %v6247_v49  ;;  %v5857_v54 = vadd.f32 %v5856_v27, %v5855_v3  ;;  %v5862_v22 = vrot.slane %v5861_v37, 1  ;;  %v5865_v17 = vadd.f32 %v10917_v18, %v5864_v26  ;;  %v6248_v7 = vmul.f32 %v8675_v6, %v6028_v10  ;;  %v8683_v26 = vld [vmem:[%s9026_s17 + $0x6c0] sm:$0xff] }
 0x282   : > { %v6249_v20 = vmul.f32 %v8676_v63, %v6028_v10  ;;  %v6250_v1 = vmul.f32 %v8677_v25, %v6028_v10  ;;  %v6251_v38 = vmul.f32 %v8678_v42, %v6028_v10  ;;  %v8433_v8 = vpop.eup %8432  ;;  %v5871_v46 = vadd.f32 %v10932_v62, %v5870_v43  ;;  %v8684_v10 = vld [vmem:[%s9026_s17 + $0x6c8] sm:$0xff]  ;;  %v8687_v63 = vld [vmem:[%s9026_s17 + $0x6e0] sm:$0xff]  ;;  %v8689_v42 = vld [vmem:[%s9026_s17 + $0x6f0] sm:$0xff] }
 0x283   : > { %8434 = vrcp.f32 %v5857_v54  ;;  %v5863_v51 = vadd.f32 %v5862_v22, %v5861_v37  ;;  %v5866_v59 = vrot.slane %v5865_v17, 2  ;;  %6504 = vst [vmem:[%s9804_s4 + $0x680] sm:$0xff] %v6248_v7  ;;  %v6029_v32 = vmul.f32 %v8433_v8, %v10857_v47  ;;  %v8682_v47 = vld [vmem:[%s9026_s17 + $0x6b8] sm:$0xff]  ;;  %v8688_v25 = vld [vmem:[%s9026_s17 + $0x6e8] sm:$0xff] }
 0x284   : > { %6505 = vst [vmem:[%s9804_s4 + $0x688] sm:$0xff] %v6249_v20  ;;  %6506 = vst [vmem:[%s9804_s4 + $0x690] sm:$0xff] %v6250_v1  ;;  %8436 = vpow2.f32 %v5516_v56  ;;  %v5395_v57 = vsub.f32 %v10876_v31, %v5311_v9  ;;  %v5396_v16 = vsub.f32 %v10880_v61, %v5317_v0  ;;  %v5872_v24 = vrot.slane %v5871_v46, 2  ;;  %v8685_v0 = vld [vmem:[%s9026_s17 + $0x6d0] sm:$0xff] }
 0x285   : > { %6507 = vst [vmem:[%s9804_s4 + $0x698] sm:$0xff] %v6251_v38  ;;  %8438 = vrcp.f32 %v5863_v51  ;;  %v5867_v2 = vadd.f32 %v5866_v59, %v5865_v17  ;;  %v5322_v28 = vrot.slane %v5321_v13, 1  ;;  %v6252_v30 = vmul.f32 %v8679_v41, %v6029_v32  ;;  %v8690_v38 = vld [vmem:[%s9026_s17 + $0x6f8] sm:$0xff] }
 0x286   : > { %v6253_v60 = vmul.f32 %v8680_v45, %v6029_v32  ;;  %v6254_v5 = vmul.f32 %v8681_v39, %v6029_v32  ;;  %v6255_v14 = vmul.f32 %v8682_v47, %v6029_v32  ;;  %v5873_v31 = vadd.f32 %v5872_v24, %v5871_v46  ;;  %v8691_v47 = vld [vmem:[%s9026_s17 + $0x700] sm:$0xff] }
 0x287   : > { %v5868_v21 = vrot.slane %v5867_v2, 1  ;;  %v5518_v3 = vmul.f32 1.442695, %v5395_v57  ;;  %v5520_v61 = vmul.f32 1.442695, %v5396_v16  ;;  %6508 = vst [vmem:[%s9804_s4 + $0x6a0] sm:$0xff] %v6252_v30  ;;  %v5323_v36 = vmax.f32 %v5321_v13, %v5322_v28 }
 0x288   : > { %6509 = vst [vmem:[%s9804_s4 + $0x6a8] sm:$0xff] %v6253_v60  ;;  %6510 = vst [vmem:[%s9804_s4 + $0x6b0] sm:$0xff] %v6254_v5  ;;  %v5324_v4 = vrot.slane %v10925_v58, 4  ;;  %v10964_v34 = vadd.f32 %v10627_v53, %v9593_v33  ;;  %v5874_v29 = vrot.slane %v5873_v31, 1 }
 0x289   : > { %6511 = vst [vmem:[%s9804_s4 + $0x6b8] sm:$0xff] %v6255_v14  ;;  %v5869_v11 = vadd.f32 %v5868_v21, %v5867_v2  ;;  %8440 = vpow2.f32 %v5518_v3  ;;  %v5397_v23 = vsub.f32 %v10887_v44, %v5323_v36  ;;  %v8692_v21 = vld [vmem:[%s9026_s17 + $0x708] sm:$0xff] }
 0x28a   : > { %8442 = vpow2.f32 %v5520_v61  ;;  %v5325_v12 = vmax.f32 %v10925_v58, %v5324_v4  ;;  %v5330_v35 = vrot.slane %v10964_v34, 4  ;;  %v5875_v48 = vadd.f32 %v5874_v29, %v5873_v31  ;;  %v8694_v61 = vld [vmem:[%s9026_s17 + $0x718] sm:$0xff] }
 0x28b   : > { %8444 = vrcp.f32 %v5869_v11  ;;  %v5522_v55 = vmul.f32 1.442695, %v5397_v23 }
 0x28c   : > { %v5326_v40 = vrot.slane %v5325_v12, 2  ;;  %v5331_v33 = vmax.f32 %v10964_v34, %v5330_v35  ;;  %8446 = vrcp.f32 %v5875_v48  ;;  %v8695_v48 = vld [vmem:[%s9026_s17 + $0x720] sm:$0xff] }
 0x28d   : > { %v8435_v53 = vpop.eup %8434  ;;  %8448 = vpow2.f32 %v5522_v55 }
 0x28e   : > { %v10970_v19 = vpop.eup %8436  ;;  %v6030_v44 = vmul.f32 %v8435_v53, %v10889_v15  ;;  %v5327_v49 = vmax.f32 %v5325_v12, %v5326_v40  ;;  %v5332_v52 = vrot.slane %v5331_v33, 2  ;;  %v8686_v15 = vld [vmem:[%s9026_s17 + $0x6d8] sm:$0xff] }
 0x28f   : > { %v8439_v27 = vpop.eup %8438  ;;  %v5876_v37 = vrot.slane %v10970_v19, 4 }
 0x290   : > { %v6256_v56 = vmul.f32 %v8683_v26, %v6030_v44  ;;  %v6257_v9 = vmul.f32 %v8684_v10, %v6030_v44  ;;  %v6258_v13 = vmul.f32 %v8685_v0, %v6030_v44  ;;  %v6259_v54 = vmul.f32 %v8686_v15, %v6030_v44  ;;  %v8698_v44 = vld [vmem:[%s9026_s17 + $0x738] sm:$0xff] }
 0x291   : > { %v6031_v22 = vmul.f32 %v8439_v27, %v10895_v50  ;;  %v5877_v17 = vadd.f32 %v10970_v19, %v5876_v37  ;;  %v5328_v43 = vrot.slane %v5327_v49, 1  ;;  %v5333_v6 = vmax.f32 %v5331_v33, %v5332_v52  ;;  %v8697_v33 = vld [vmem:[%s9026_s17 + $0x730] sm:$0xff] }
 0x292   : > { %6512 = vst [vmem:[%s9804_s4 + $0x6c0] sm:$0xff] %v6256_v56  ;;  %6513 = vst [vmem:[%s9804_s4 + $0x6c8] sm:$0xff] %v6257_v9 }
 0x293   : > { %6514 = vst [vmem:[%s9804_s4 + $0x6d0] sm:$0xff] %v6258_v13  ;;  %6515 = vst [vmem:[%s9804_s4 + $0x6d8] sm:$0xff] %v6259_v54  ;;  %v10984_v7 = vpop.eup %8440  ;;  %v6260_v20 = vmul.f32 %v8687_v63, %v6031_v22  ;;  %v6261_v1 = vmul.f32 %v8688_v25, %v6031_v22  ;;  %v6262_v50 = vmul.f32 %v8689_v42, %v6031_v22  ;;  %v5878_v59 = vrot.slane %v5877_v17, 2  ;;  %v8699_v42 = vld [vmem:[%s9026_s17 + $0x740] sm:$0xff] }
 0x294   : > { %v6263_v8 = vmul.f32 %v8690_v38, %v6031_v22  ;;  %v10990_v51 = vpop.eup %8442  ;;  %v5882_v46 = vrot.slane %v10984_v7, 4  ;;  %v5329_v32 = vmax.f32 %v5327_v49, %v5328_v43  ;;  %v5334_v57 = vrot.slane %v5333_v6, 1  ;;  %v8700_v38 = vld [vmem:[%s9026_s17 + $0x748] sm:$0xff] }
 0x295   : > { %v8445_v16 = vpop.eup %8444  ;;  %6516 = vst [vmem:[%s9804_s4 + $0x6e0] sm:$0xff] %v6260_v20  ;;  %6517 = vst [vmem:[%s9804_s4 + $0x6e8] sm:$0xff] %v6261_v1  ;;  %v5888_v2 = vrot.slane %v10990_v51, 4  ;;  %v5879_v28 = vadd.f32 %v5878_v59, %v5877_v17  ;;  %v8701_v59 = vld [vmem:[%s9026_s17 + $0x750] sm:$0xff] }
 0x296   : > { %6518 = vst [vmem:[%s9804_s4 + $0x6f0] sm:$0xff] %v6262_v50  ;;  %6519 = vst [vmem:[%s9804_s4 + $0x6f8] sm:$0xff] %v6263_v8  ;;  %v6032_v24 = vmul.f32 %v8445_v16, %v10917_v18  ;;  %v5883_v41 = vadd.f32 %v10984_v7, %v5882_v46  ;;  %v5398_v30 = vsub.f32 %v10925_v58, %v5329_v32  ;;  %v8447_v45 = vpop.eup %8446  ;;  %v8693_v18 = vld [vmem:[%s9026_s17 + $0x710] sm:$0xff]  ;;  %v8702_v32 = vld [vmem:[%s9026_s17 + $0x758] sm:$0xff] }
 0x297   : > { %v5889_v60 = vadd.f32 %v10990_v51, %v5888_v2  ;;  %v5335_v39 = vmax.f32 %v5333_v6, %v5334_v57  ;;  %v11002_v5 = vpop.eup %8448  ;;  %v6033_v36 = vmul.f32 %v8447_v45, %v10932_v62  ;;  %v5880_v4 = vrot.slane %v5879_v28, 1  ;;  %v8696_v62 = vld [vmem:[%s9026_s17 + $0x728] sm:$0xff] }
 0x298   : > { %v6264_v14 = vmul.f32 %v8691_v47, %v6032_v24  ;;  %v6265_v31 = vmul.f32 %v8692_v21, %v6032_v24  ;;  %v6266_v3 = vmul.f32 %v8693_v18, %v6032_v24  ;;  %v6267_v58 = vmul.f32 %v8694_v61, %v6032_v24  ;;  %v8704_v47 = vld [vmem:[%s9026_s17 + $0x768] sm:$0xff]  ;;  %v8705_v21 = vld [vmem:[%s9026_s17 + $0x770] sm:$0xff]  ;;  %v8706_v18 = vld [vmem:[%s9026_s17 + $0x778] sm:$0xff] }
 0x299   : > { %v5884_v11 = vrot.slane %v5883_v41, 2  ;;  %v5890_v29 = vrot.slane %v5889_v60, 2  ;;  %v5894_v23 = vrot.slane %v11002_v5, 4  ;;  %v5524_v12 = vmul.f32 1.442695, %v5398_v30 }
 0x29a   : > { %6520 = vst [vmem:[%s9804_s4 + $0x700] sm:$0xff] %v6264_v14  ;;  %6521 = vst [vmem:[%s9804_s4 + $0x708] sm:$0xff] %v6265_v31  ;;  %v5399_v35 = vsub.f32 %v10964_v34, %v5335_v39  ;;  %v6268_v55 = vmul.f32 %v8695_v48, %v6033_v36  ;;  %v6269_v40 = vmul.f32 %v8696_v62, %v6033_v36 }
 0x29b   : > { %6522 = vst [vmem:[%s9804_s4 + $0x710] sm:$0xff] %v6266_v3  ;;  %6523 = vst [vmem:[%s9804_s4 + $0x718] sm:$0xff] %v6267_v58  ;;  %v6270_v53 = vmul.f32 %v8697_v33, %v6033_v36  ;;  %v6271_v49 = vmul.f32 %v8698_v44, %v6033_v36  ;;  %v5881_v52 = vadd.f32 %v5880_v4, %v5879_v28  ;;  %8450 = vpow2.f32 %v5524_v12  ;;  %v8708_v58 = vld [vmem:[%s9026_s17 + $0x788] sm:$0xff]  ;;  %v8709_v4 = vld [vmem:[%s9026_s17 + $0x790] sm:$0xff] }
 0x29c   : > { %v5885_v27 = vadd.f32 %v5884_v11, %v5883_v41  ;;  %v5891_v37 = vadd.f32 %v5890_v29, %v5889_v60  ;;  %v5895_v26 = vadd.f32 %v11002_v5, %v5894_v23  ;;  %6524 = vst [vmem:[%s9804_s4 + $0x720] sm:$0xff] %v6268_v55  ;;  %6525 = vst [vmem:[%s9804_s4 + $0x728] sm:$0xff] %v6269_v40  ;;  %v5526_v34 = vmul.f32 1.442695, %v5399_v35  ;;  %v8703_v60 = vld [vmem:[%s9026_s17 + $0x760] sm:$0xff]  ;;  %v8710_v29 = vld [vmem:[%s9026_s17 + $0x798] sm:$0xff] }
 0x29d   : > { %6526 = vst [vmem:[%s9804_s4 + $0x730] sm:$0xff] %v6270_v53  ;;  %6527 = vst [vmem:[%s9804_s4 + $0x738] sm:$0xff] %v6271_v49  ;;  %8452 = vrcp.f32 %v5881_v52  ;;  %v8711_v55 = vld [vmem:[%s9026_s17 + $0x7a0] sm:$0xff]  ;;  %v8712_v40 = vld [vmem:[%s9026_s17 + $0x7a8] sm:$0xff] }
 0x29e   : > { %v5886_v56 = vrot.slane %v5885_v27, 1  ;;  %v5892_v10 = vrot.slane %v5891_v37, 1  ;;  %v5896_v9 = vrot.slane %v5895_v26, 2  ;;  %8454 = vpow2.f32 %v5526_v34  ;;  %v8713_v53 = vld [vmem:[%s9026_s17 + $0x7b0] sm:$0xff]  ;;  %v8714_v49 = vld [vmem:[%s9026_s17 + $0x7b8] sm:$0xff] }
 0x2a0   : > { %v5887_v0 = vadd.f32 %v5886_v56, %v5885_v27  ;;  %v5893_v13 = vadd.f32 %v5892_v10, %v5891_v37  ;;  %v5897_v15 = vadd.f32 %v5896_v9, %v5895_v26  ;;  %v8715_v10 = vld [vmem:[%s9026_s17 + $0x7c0] sm:$0xff] }
 0x2a2   : > { %8456 = vrcp.f32 %v5887_v0  ;;  %v5898_v54 = vrot.slane %v5897_v15, 1  ;;  %v8716_v0 = vld [vmem:[%s9026_s17 + $0x7c8] sm:$0xff] }
 0x2a3   : > { %8458 = vrcp.f32 %v5893_v13 }
 0x2a4   : > { %v5899_v22 = vadd.f32 %v5898_v54, %v5897_v15  ;;  %v8717_v15 = vld [vmem:[%s9026_s17 + $0x7d0] sm:$0xff] }
 0x2a5   : > { %v11024_v17 = vpop.eup %8450 }
 0x2a6   : > { %8460 = vrcp.f32 %v5899_v22  ;;  %v5900_v6 = vrot.slane %v11024_v17, 4  ;;  %v8718_v22 = vld [vmem:[%s9026_s17 + $0x7d8] sm:$0xff] }
 0x2a7   : > { %v8453_v43 = vpop.eup %8452 }
 0x2a8   : > { %v11027_v63 = vpop.eup %8454  ;;  %v6034_v20 = vmul.f32 %v8453_v43, %v10970_v19  ;;  %v5901_v25 = vadd.f32 %v11024_v17, %v5900_v6 }
 0x2a9   : > { %v5906_v1 = vrot.slane %v11027_v63, 4 }
 0x2aa   : > { %v6272_v50 = vmul.f32 %v8699_v42, %v6034_v20  ;;  %v6273_v8 = vmul.f32 %v8700_v38, %v6034_v20  ;;  %v6274_v46 = vmul.f32 %v8701_v59, %v6034_v20  ;;  %v6275_v57 = vmul.f32 %v8702_v32, %v6034_v20  ;;  %v8720_v20 = vld [vmem:[%s9026_s17 + $0x7e8] sm:$0xff] }
 0x2ab   : > { %v5902_v19 = vrot.slane %v5901_v25, 2  ;;  %v5907_v2 = vadd.f32 %v11027_v63, %v5906_v1  ;;  %v8721_v1 = vld [vmem:[%s9026_s17 + $0x7f0] sm:$0xff] }
 0x2ac   : > { %v8457_v16 = vpop.eup %8456  ;;  %6528 = vst [vmem:[%s9804_s4 + $0x740] sm:$0xff] %v6272_v50  ;;  %6529 = vst [vmem:[%s9804_s4 + $0x748] sm:$0xff] %v6273_v8  ;;  %v8722_v50 = vld [vmem:[%s9026_s17 + $0x7f8] sm:$0xff] }
 0x2ad   : > { %v8459_v24 = vpop.eup %8458  ;;  %6530 = vst [vmem:[%s9804_s4 + $0x750] sm:$0xff] %v6274_v46  ;;  %6531 = vst [vmem:[%s9804_s4 + $0x758] sm:$0xff] %v6275_v57  ;;  %v6035_v28 = vmul.f32 %v8457_v16, %v10984_v7  ;;  %v5903_v30 = vadd.f32 %v5902_v19, %v5901_v25  ;;  %v5908_v45 = vrot.slane %v5907_v2, 2  ;;  %v8707_v7 = vld [vmem:[%s9026_s17 + $0x780] sm:$0xff] }
 0x2ae   : > { %v6036_v41 = vmul.f32 %v8459_v24, %v10990_v51 }
 0x2af   : > { %v6276_v39 = vmul.f32 %v8703_v60, %v6035_v28  ;;  %v6277_v14 = vmul.f32 %v8704_v47, %v6035_v28  ;;  %v6278_v31 = vmul.f32 %v8705_v21, %v6035_v28  ;;  %v6279_v3 = vmul.f32 %v8706_v18, %v6035_v28 }
 0x2b0   : > { %v8461_v61 = vpop.eup %8460  ;;  %v6280_v51 = vmul.f32 %v8707_v7, %v6036_v41  ;;  %v6281_v36 = vmul.f32 %v8708_v58, %v6036_v41  ;;  %v6282_v11 = vmul.f32 %v8709_v4, %v6036_v41  ;;  %v6283_v23 = vmul.f32 %v8710_v29, %v6036_v41 }
 0x2b1   : > { %6532 = vst [vmem:[%s9804_s4 + $0x760] sm:$0xff] %v6276_v39  ;;  %6533 = vst [vmem:[%s9804_s4 + $0x768] sm:$0xff] %v6277_v14  ;;  %v6037_v12 = vmul.f32 %v8461_v61, %v11002_v5  ;;  %v5904_v35 = vrot.slane %v5903_v30, 1  ;;  %v5909_v48 = vadd.f32 %v5908_v45, %v5907_v2 }
 0x2b2   : > { %6534 = vst [vmem:[%s9804_s4 + $0x770] sm:$0xff] %v6278_v31  ;;  %6535 = vst [vmem:[%s9804_s4 + $0x778] sm:$0xff] %v6279_v3 }
 0x2b3   : > { %6536 = vst [vmem:[%s9804_s4 + $0x780] sm:$0xff] %v6280_v51  ;;  %6537 = vst [vmem:[%s9804_s4 + $0x788] sm:$0xff] %v6281_v36  ;;  %v6284_v62 = vmul.f32 %v8711_v55, %v6037_v12  ;;  %v6285_v33 = vmul.f32 %v8712_v40, %v6037_v12  ;;  %v6286_v44 = vmul.f32 %v8713_v53, %v6037_v12  ;;  %v5910_v27 = vrot.slane %v5909_v48, 1 }
 0x2b4   : > { %6538 = vst [vmem:[%s9804_s4 + $0x790] sm:$0xff] %v6282_v11  ;;  %6539 = vst [vmem:[%s9804_s4 + $0x798] sm:$0xff] %v6283_v23  ;;  %v6287_v5 = vmul.f32 %v8714_v49, %v6037_v12  ;;  %v5905_v52 = vadd.f32 %v5904_v35, %v5903_v30 }
 0x2b5   : > { %6540 = vst [vmem:[%s9804_s4 + $0x7a0] sm:$0xff] %v6284_v62  ;;  %6541 = vst [vmem:[%s9804_s4 + $0x7a8] sm:$0xff] %v6285_v33  ;;  %v5911_v37 = vadd.f32 %v5910_v27, %v5909_v48 }
 0x2b6   : > { %6542 = vst [vmem:[%s9804_s4 + $0x7b0] sm:$0xff] %v6286_v44  ;;  %6543 = vst [vmem:[%s9804_s4 + $0x7b8] sm:$0xff] %v6287_v5  ;;  %8462 = vrcp.f32 %v5905_v52 }
 0x2b7   : > { %8464 = vrcp.f32 %v5911_v37 }
 0x2c0   : > { %v8463_v26 = vpop.eup %8462 }
 0x2c1   : > { %v6038_v34 = vmul.f32 %v8463_v26, %v11024_v17  ;;  %v8465_v56 = vpop.eup %8464  ;;  %v8719_v17 = vld [vmem:[%s9026_s17 + $0x7e0] sm:$0xff] }
 0x2c2   : > { %v6039_v6 = vmul.f32 %v8465_v56, %v11027_v63 }
 0x2c3   : > { %v6288_v9 = vmul.f32 %v8715_v10, %v6038_v34  ;;  %v6289_v13 = vmul.f32 %v8716_v0, %v6038_v34  ;;  %v6290_v54 = vmul.f32 %v8717_v15, %v6038_v34  ;;  %v6291_v43 = vmul.f32 %v8718_v22, %v6038_v34 }
 0x2c4   : > { %v6292_v63 = vmul.f32 %v8719_v17, %v6039_v6  ;;  %v6293_v25 = vmul.f32 %v8720_v20, %v6039_v6  ;;  %v6294_v42 = vmul.f32 %v8721_v1, %v6039_v6  ;;  %v6295_v38 = vmul.f32 %v8722_v50, %v6039_v6 }
 0x2c5   : > { %6544 = vst [vmem:[%s9804_s4 + $0x7c0] sm:$0xff] %v6288_v9  ;;  %6545 = vst [vmem:[%s9804_s4 + $0x7c8] sm:$0xff] %v6289_v13 }
 0x2c6   : > { %6546 = vst [vmem:[%s9804_s4 + $0x7d0] sm:$0xff] %v6290_v54  ;;  %6547 = vst [vmem:[%s9804_s4 + $0x7d8] sm:$0xff] %v6291_v43 }
 0x2c7   : > { %6548 = vst [vmem:[%s9804_s4 + $0x7e0] sm:$0xff] %v6292_v63  ;;  %6549 = vst [vmem:[%s9804_s4 + $0x7e8] sm:$0xff] %v6293_v25 }
 0x2c8   : > { %6550 = vst [vmem:[%s9804_s4 + $0x7f0] sm:$0xff] %v6294_v42  ;;  %6551 = vst [vmem:[%s9804_s4 + $0x7f8] sm:$0xff] %v6295_v38 }
 0x2c9   : > { %8794 = shalt.err (!%p8791_p13)
}
 0x2ca   : > { %s8795_s8 = scalar_lea.hbm %s11083_s19, 32768  ;;  %s8799_s5 = scalar_lea.hbm %s11140_s3, 65536 }
 0x2cb   : > { %p8796_p7 = scmp.ne.s32.totalorder %s11083_s19, %s8795_s8  ;;  %p8800_p1 = scmp.lt.u32.totalorder %s11083_s19, %s11140_s3 }
 0x2cc   : > { %p8801_p11 = scmp.lt.u32.totalorder %s8799_s5, %s8795_s8  ;;  %p8803_p9 = scmp.lt.u32.totalorder %s8795_s8, %s11083_s19 }
 0x2cd   : > { %p8797_p3 = pnand %p8796_p7, %p11159_p10 }
 0x2ce   : > { %p8802_p8 = por %p8801_p11, %p8800_p1 }
 0x2cf   : > { %p8798_p12 = pneg %p8797_p3 }
 0x2d0   : > { %p8804_p2 = por %p8803_p9, %p8802_p8 }
 0x2d2   : > { %p8805_p4 = pnand %p8804_p2, %p8798_p12 }
 0x2d4   : > { %8808 = shalt.err (!%p8805_p4)
}
 0x2d5   : > { %s8862_s26 = smov 128   ;;  %s8863_s4 = smov 8  }
 0x2d6   : > { %8150 = dma.vmem_to_hbm [thread:$0]  (%p11159_p10), %s11085_s10, 32768, %s11083_s19, %s6553_s20, %s8862_s26, %s8862_s26, %s8863_s4  }
 0x2d7 PF: > { %s6582_s7 = sand.u32 1, %s8839_s12   ;;  %p11160_p5 = scmp.ne.s32.totalorder %s11149_s25, 0 }
 0x2d8   : > { %p11161_p0 = scmp.ge.s32.totalorder %s8851_s15, 2  ;;  %s6583_s16 = scalar_lea.sflag [#allocation4], %s6582_s7 }
 0x2da   : > { %p8161_p6 = pnand %p11161_p0, %p11160_p5 }
 0x2dc   : > { %8834 = dma.done.wait (!%p8161_p6), %s6583_s16, 32768  }
 0x2dd   : > { %8836 = vsyncadd (!%p8161_p6), %s6583_s16, 4294934528  ;;  %p17_p13 = scmp.ge.s32.totalorder %s8909_s18, 4   ;;  %s11162_s12 = smov %s8843_s13 }
 0x2de   : > { %s11163_s13 = smov %s8847_s14  ;;  %s11164_s14 = smov %s8921_s21 }
 0x2df   : > { %s11165_s15 = smov %s8909_s18  ;;  %19 = sbr.rel (!%p17_p13) target bundleno = 6 (0x6), region = 81 }
 0x2e6   :  { %6588 = vsyncpa [#allocation3], 1 }
 0x2e7   :  { %6590 = vsyncpa [#allocation3 + $0x1], 1 }
 0x2e8   :  { %6591 = vsyncpa [#allocation6], 1 }
 0x2e9   :  { %6592 = vsyncpa [#allocation4], 1 }
 0x2ea   :  { %6594 = vsyncpa [#allocation4 + $0x1], 1 }

</bundles_post_ra>
